<compile_context>
chip_gen: v7x
topology: tpu7x:2x2x1
jax: 0.10.0
libtpu: 0.0.40
codegen_flags: <defaults>
</compile_context>

<pallas_src>
import jax
import jax.numpy as jnp
from jax import lax
from jax.experimental import pallas as pl
from jax.experimental.pallas import tpu as pltpu


def _sigmoid(v):
    # exp on the EUP; approximate reciprocal also on the EUP (frees the VALU).
    return pl.reciprocal(1.0 + jnp.exp(-v), approx=True)


def _relu6(v):
    return jnp.minimum(jnp.maximum(v, 0.0), 6.0)


def _shift_matrices(H, W, dtype):
    """Nine (HW, HW) 0/1 matrices S_t, t = (dy+1)*3 + (dx+1), such that
    (v @ S_t)[:, y*W + x] = v[:, (y+dy)*W + (x+dx)] (zero outside the image).
    Lets the 3x3 depthwise convolutions run on the MXU."""
    HW = H * W
    idx = jnp.arange(HW, dtype=jnp.int32)
    yi, xi = idx // W, idx % W
    mats = []
    for dy in (-1, 0, 1):
        for dx in (-1, 0, 1):
            m = (yi[:, None] == (yi[None, :] + dy)) & \
                (xi[:, None] == (xi[None, :] + dx))
            mats.append(m)
    return jnp.stack(mats).astype(dtype)          # (9, HW, HW)


def _make_kernel(Cp, Ch, HW, Bt):
    bf16, f32 = jnp.bfloat16, jnp.float32

    def kernel(x_ref, h_ref, c_ref,
               wx9_ref, wi9_ref, wyx_ref, wyh_ref, by_ref, wg_ref, s_ref,
               ch_ref, cc_ref):
        # Small weights: load once per grid step, shared by all Bt batches.
        wx9 = wx9_ref[...]            # (Cp, 9)  f32   depthwise W taps
        wi9 = wi9_ref[...]            # (Ch, 9)  f32   depthwise Wi taps
        wyx = wyx_ref[...]            # (Ch, Cp) bf16  Wy | x' columns
        wyh = wyh_ref[...]            # (Ch, Ch) bf16  Wy | h columns
        by = by_ref[...]              # (Ch, 1)  f32   Wy bias + Wy_x @ W bias

        def dw3x3(v, w9):
            # depthwise 3x3 (zero padded) on the MXU, f32 accumulation:
            #   out = sum_t (w9[:, t] * v) @ S_t
            acc = None
            for t in range(9):
                op = (v * w9[:, t:t + 1]).astype(bf16)
                term = jnp.dot(op, s_ref[t], preferred_element_type=f32)
                acc = term if acc is None else acc + term
            return acc

        for bb in range(Bt):
            x = x_ref[bb]                                    # (Cp, HW) f32
            h = h_ref[bb]                                    # (Ch, HW) bf16
            c = c_ref[bb]                                    # (Ch, HW) f32

            # x' = depthwise3x3_W(x)        (W bias folded into `by`)
            xw = dw3x3(x, wx9)                               # (Cp, HW) f32

            # i = Wy([x'; h]) + by : both halves on the MXU (bf16 operands,
            # f32 accumulation) -- the rank-1 VPU loop is gone.
            i = (jnp.dot(wyh, h, preferred_element_type=f32)
                 + jnp.dot(wyx, xw.astype(bf16), preferred_element_type=f32)
                 + by)                                       # (Ch, HW) f32

            # b = depthwise3x3_Wi(i); straight to bf16 for the gate matmuls.
            b = dw3x3(i, wi9).astype(bf16)                   # (Ch, HW) bf16

            def gate(k):                                     # wg rows: i,f,c,o
                return jnp.dot(wg_ref[k * Ch:(k + 1) * Ch, :], b,
                               preferred_element_type=f32)   # (Ch, HW) f32

            # Gates one at a time, consumed immediately (no 4*Ch-row f32
            # intermediate); the o-gate only after cc is formed.
            ci = _sigmoid(gate(0))
            new = ci * _relu6(gate(2))
            cf = _sigmoid(gate(1))
            cc = cf * c + new
            cc_ref[bb] = cc
            co = _sigmoid(gate(3))
            ch_ref[bb] = co * _relu6(cc)

    return kernel


def _pick_batch_block(B, max_unroll=4):
    """Batches per grid step.  v5e/v6e have a single TensorCore, so one grid
    step amortizes the ~0.35 us per-step overhead; other chips (v7x, megacore)
    keep >= 2 grid steps so both cores are used."""
    try:
        kind = jax.devices()[0].device_kind.lower()
    except Exception:
        kind = ""
    single_tc = ("v5 lite" in kind) or ("v5e" in kind) or ("v6" in kind)
    bt = B if single_tc else max(1, B // 2)
    bt = max(1, min(bt, max_unroll))
    while B % bt:
        bt -= 1
    return max(bt, 1)


def bottleneck_lstm_cell(x_nchw, h_nchw, c_nchw, params, batch_block=None):
    """Pallas forward of BottleneckLSTMCell.  Inputs/outputs are NCHW."""
    B, Cin, H, W = x_nchw.shape
    Ch = h_nchw.shape[1]
    HW = H * W
    f32, bf16 = jnp.float32, jnp.bfloat16
    Cp = ((Cin + 7) // 8) * 8            # pad tiny input-channel axis to 8

    Bt = batch_block if batch_block is not None else _pick_batch_block(B)
    assert B % Bt == 0

    # NCHW -> (B, C, H*W): pure reshapes; x channel-padded with zero rows.
    x = jnp.zeros((B, Cp, HW), f32).at[:, :Cin].set(
        x_nchw.reshape(B, Cin, HW).astype(f32))
    h = h_nchw.reshape(B, Ch, HW).astype(bf16)     # MXU operand only
    c = c_nchw.reshape(B, Ch, HW).astype(f32)

    # Repack PyTorch-layout weights (tiny, traced once under jit).
    wx9 = jnp.zeros((Cp, 9), f32).at[:Cin].set(
        params["W_w"].reshape(Cin, 9).astype(f32))
    wi9 = params["Wi_w"].reshape(Ch, 9).astype(f32)
    wy = params["Wy_w"].reshape(Ch, Cin + Ch).astype(f32)
    wyx_f = wy[:, :Cin]
    wyx = jnp.zeros((Ch, Cp), f32).at[:, :Cin].set(wyx_f).astype(bf16)
    wyh = wy[:, Cin:].astype(bf16)
    # Fold the depthwise-W bias through Wy: Wy_x @ (xw + bW) = Wy_x@xw + Wy_x@bW
    by = (params["Wy_b"].reshape(Ch, 1).astype(f32)
          + jnp.matmul(wyx_f, params["W_b"].reshape(Cin, 1).astype(f32),
                       precision=lax.Precision.HIGHEST))
    wg = jnp.concatenate(
        [params["Wbi_w"].reshape(Ch, Ch), params["Wbf_w"].reshape(Ch, Ch),
         params["Wbc_w"].reshape(Ch, Ch), params["Wbo_w"].reshape(Ch, Ch)],
        axis=0).astype(bf16)                         # (4*Ch, Ch)
    smats = _shift_matrices(H, W, bf16)              # (9, HW, HW) bf16

    kernel = _make_kernel(Cp, Ch, HW, Bt)

    def per_b(chan):
        return pl.BlockSpec((Bt, chan, HW), lambda b: (b, 0, 0))

    def const2(r, cdim):
        return pl.BlockSpec((r, cdim), lambda b: (0, 0))

    ch_f, cc_f = pl.pallas_call(
        kernel,
        out_shape=(jax.ShapeDtypeStruct((B, Ch, HW), f32),
                   jax.ShapeDtypeStruct((B, Ch, HW), f32)),
        grid=(B // Bt,),
        in_specs=[
            per_b(Cp),                          # x (channel padded, f32)
            per_b(Ch),                          # h (bf16)
            per_b(Ch),                          # c (f32)
            const2(Cp, 9),                      # depthwise W taps
            const2(Ch, 9),                      # depthwise Wi taps
            const2(Ch, Cp),                     # Wy | x' columns (bf16)
            const2(Ch, Ch),                     # Wy | h columns (bf16)
            const2(Ch, 1),                      # fused bias
            const2(4 * Ch, Ch),                 # fused gate weights (bf16)
            pl.BlockSpec((9, HW, HW), lambda b: (0, 0, 0)),   # shift matrices
        ],
        out_specs=(per_b(Ch), per_b(Ch)),
        compiler_params=pltpu.CompilerParams(
            dimension_semantics=("parallel",)),
    )(x, h, c, wx9, wi9, wyx, wyh, by, wg, smats)

    return ch_f.reshape(B, Ch, H, W), cc_f.reshape(B, Ch, H, W)


def bottleneck_lstm_cell_ref(x, h, c, params):
    """Pure-JAX reference (NCHW), mirrors the PyTorch module exactly."""
    def conv(inp, w, b, groups, pad):
        out = lax.conv_general_dilated(
            inp, w, window_strides=(1, 1), padding=[(pad, pad), (pad, pad)],
            dimension_numbers=("NCHW", "OIHW", "NCHW"),
            feature_group_count=groups, precision=lax.Precision.HIGHEST)
        if b is not None:
            out = out + b.reshape(1, -1, 1, 1)
        return out

    Cin = x.shape[1]
    xw = conv(x, params["W_w"], params["W_b"], Cin, 1)
    y = jnp.concatenate([xw, h], axis=1)
    i = conv(y, params["Wy_w"], params["Wy_b"], 1, 0)
    b_ = conv(i, params["Wi_w"], None, h.shape[1], 1)
    ci = jax.nn.sigmoid(conv(b_, params["Wbi_w"], None, 1, 0))
    cf = jax.nn.sigmoid(conv(b_, params["Wbf_w"], None, 1, 0))
    cc = cf * c + ci * jnp.clip(conv(b_, params["Wbc_w"], None, 1, 0), 0.0, 6.0)
    co = jax.nn.sigmoid(conv(b_, params["Wbo_w"], None, 1, 0))
    ch = co * jnp.clip(cc, 0.0, 6.0)
    return ch, cc


if __name__ == "__main__":
    import numpy as np

    B, Cin, Ch, H, W = 2, 4, 32, 16, 16
    key = jax.random.PRNGKey(0)
    ks = jax.random.split(key, 12)
    f32 = jnp.float32

    x = jax.random.normal(ks[0], (B, Cin, H, W), f32)
    h = jax.random.normal(ks[1], (B, Ch, H, W), f32)
    c = jax.random.normal(ks[2], (B, Ch, H, W), f32)

    s = 0.2  # deterministic synthetic weights (PyTorch layouts)
    params = {
        "W_w":   s * jax.random.normal(ks[3],  (Cin, 1, 3, 3), f32),
        "W_b":   s * jax.random.normal(ks[4],  (Cin,), f32),
        "Wy_w":  s * jax.random.normal(ks[5],  (Ch, Cin + Ch, 1, 1), f32),
        "Wy_b":  s * jax.random.normal(ks[6],  (Ch,), f32),
        "Wi_w":  s * jax.random.normal(ks[7],  (Ch, 1, 3, 3), f32),
        "Wbi_w": s * jax.random.normal(ks[8],  (Ch, Ch, 1, 1), f32),
        "Wbf_w": s * jax.random.normal(ks[9],  (Ch, Ch, 1, 1), f32),
        "Wbc_w": s * jax.random.normal(ks[10], (Ch, Ch, 1, 1), f32),
        "Wbo_w": s * jax.random.normal(ks[11], (Ch, Ch, 1, 1), f32),
    }

    ch, cc = jax.jit(bottleneck_lstm_cell)(x, h, c, params)
    jax.block_until_ready((ch, cc))

    # Tolerance reflects the all-bf16-operand MXU path (depthwise convs, Wy
    # and gate matmuls all use bf16 operands with f32 accumulation) plus the
    # EUP approximate reciprocal in sigmoid; elementwise state math stays f32.
    ch_ref, cc_ref = bottleneck_lstm_cell_ref(x, h, c, params)
    np.testing.assert_allclose(np.asarray(ch), np.asarray(ch_ref), rtol=3e-2, atol=3e-2)
    np.testing.assert_allclose(np.asarray(cc), np.asarray(cc_ref), rtol=3e-2, atol=3e-2)

    print("KERNEL_OK")
</pallas_src>

<mosaic_0001>
module attributes {stable_mosaic.version = 11 : i64} {
  func.func @kernel(%arg0: i32, %arg1: memref<1x8x256xf32, #tpu.memory_space<vmem>>, %arg2: memref<1x32x256xbf16, #tpu.memory_space<vmem>>, %arg3: memref<1x32x256xf32, #tpu.memory_space<vmem>>, %arg4: memref<8x9xf32, #tpu.memory_space<vmem>>, %arg5: memref<32x9xf32, #tpu.memory_space<vmem>>, %arg6: memref<32x8xbf16, #tpu.memory_space<vmem>>, %arg7: memref<32x32xbf16, #tpu.memory_space<vmem>>, %arg8: memref<32x1xf32, #tpu.memory_space<vmem>>, %arg9: memref<128x32xbf16, #tpu.memory_space<vmem>>, %arg10: memref<9x256x256xbf16, #tpu.memory_space<vmem>>, %arg11: memref<1x32x256xf32, #tpu.memory_space<vmem>>, %arg12: memref<1x32x256xf32, #tpu.memory_space<vmem>>) attributes {dimension_semantics = [#tpu.dimension_semantics<parallel>], iteration_bounds = array<i64: 2>, scalar_prefetch = 0 : i64, scratch_operands = 0 : i64, tpu.core_type = #tpu.core_type<tc>, window_params = [{transform_indices = @transform_0, window_bounds = array<i64: 1, 8, 256>}, {transform_indices = @transform_1, window_bounds = array<i64: 1, 32, 256>}, {transform_indices = @transform_2, window_bounds = array<i64: 1, 32, 256>}, {pipeline_mode = #tpu.pipeline_mode<synchronous>, transform_indices = @transform_3, window_bounds = array<i64: 8, 9>}, {pipeline_mode = #tpu.pipeline_mode<synchronous>, transform_indices = @transform_4, window_bounds = array<i64: 32, 9>}, {pipeline_mode = #tpu.pipeline_mode<synchronous>, transform_indices = @transform_5, window_bounds = array<i64: 32, 8>}, {pipeline_mode = #tpu.pipeline_mode<synchronous>, transform_indices = @transform_6, window_bounds = array<i64: 32, 32>}, {pipeline_mode = #tpu.pipeline_mode<synchronous>, transform_indices = @transform_7, window_bounds = array<i64: 32, 1>}, {pipeline_mode = #tpu.pipeline_mode<synchronous>, transform_indices = @transform_8, window_bounds = array<i64: 128, 32>}, {pipeline_mode = #tpu.pipeline_mode<synchronous>, transform_indices = @transform_9, window_bounds = array<i64: 9, 256, 256>}, {transform_indices = @transform_10, window_bounds = array<i64: 1, 32, 256>}, {transform_indices = @transform_11, window_bounds = array<i64: 1, 32, 256>}]} {
    %c0 = arith.constant 0 : index
    %c0_0 = arith.constant 0 : index
    %0 = vector.load %arg4[%c0, %c0_0] : memref<8x9xf32, #tpu.memory_space<vmem>>, vector<8x9xf32>
    %c0_1 = arith.constant 0 : index
    %c0_2 = arith.constant 0 : index
    %1 = vector.load %arg5[%c0_1, %c0_2] : memref<32x9xf32, #tpu.memory_space<vmem>>, vector<32x9xf32>
    %c0_3 = arith.constant 0 : index
    %c0_4 = arith.constant 0 : index
    %2 = vector.load %arg6[%c0_3, %c0_4] : memref<32x8xbf16, #tpu.memory_space<vmem>>, vector<32x8xbf16>
    %c0_5 = arith.constant 0 : index
    %c0_6 = arith.constant 0 : index
    %3 = vector.load %arg7[%c0_5, %c0_6] : memref<32x32xbf16, #tpu.memory_space<vmem>>, vector<32x32xbf16>
    %c0_7 = arith.constant 0 : index
    %c0_8 = arith.constant 0 : index
    %4 = vector.load %arg8[%c0_7, %c0_8] : memref<32x1xf32, #tpu.memory_space<vmem>>, vector<32x1xf32>
    %c0_9 = arith.constant 0 : index
    %c0_10 = arith.constant 0 : index
    %c0_11 = arith.constant 0 : index
    %5 = vector.load %arg1[%c0_9, %c0_10, %c0_11] : memref<1x8x256xf32, #tpu.memory_space<vmem>>, vector<1x8x256xf32>
    %6 = vector.shape_cast %5 : vector<1x8x256xf32> to vector<8x256xf32>
    %c0_12 = arith.constant 0 : index
    %c0_13 = arith.constant 0 : index
    %c0_14 = arith.constant 0 : index
    %7 = vector.load %arg2[%c0_12, %c0_13, %c0_14] : memref<1x32x256xbf16, #tpu.memory_space<vmem>>, vector<1x32x256xbf16>
    %8 = vector.shape_cast %7 : vector<1x32x256xbf16> to vector<32x256xbf16>
    %c0_15 = arith.constant 0 : index
    %c0_16 = arith.constant 0 : index
    %c0_17 = arith.constant 0 : index
    %9 = vector.load %arg3[%c0_15, %c0_16, %c0_17] : memref<1x32x256xf32, #tpu.memory_space<vmem>>, vector<1x32x256xf32>
    %10 = vector.shape_cast %9 : vector<1x32x256xf32> to vector<32x256xf32>
    %11 = vector.extract_strided_slice %0 {offsets = [0, 0], sizes = [8, 1], strides = [1, 1]} : vector<8x9xf32> to vector<8x1xf32>
    %12 = vector.broadcast %11 : vector<8x1xf32> to vector<8x256xf32>
    %13 = arith.mulf %6, %12 : vector<8x256xf32>
    %14 = arith.truncf %13 : vector<8x256xf32> to vector<8x256xbf16>
    %c0_18 = arith.constant 0 : index
    %c0_19 = arith.constant 0 : index
    %c0_20 = arith.constant 0 : index
    %15 = vector.load %arg10[%c0_18, %c0_19, %c0_20] : memref<9x256x256xbf16, #tpu.memory_space<vmem>>, vector<1x256x256xbf16>
    %16 = vector.shape_cast %15 : vector<1x256x256xbf16> to vector<256x256xbf16>
    %cst = arith.constant dense<0.000000e+00> : vector<8x256xf32>
    %17 = tpu.matmul %14, %16, %cst {dimension_numbers = #tpu.dot_dimension_numbers<[1], [0], [0], [1], [0, 0, 1, 1], [], []>} : vector<8x256xbf16>, vector<256x256xbf16>, vector<8x256xf32> -> vector<8x256xf32>
    %18 = vector.extract_strided_slice %0 {offsets = [0, 1], sizes = [8, 1], strides = [1, 1]} : vector<8x9xf32> to vector<8x1xf32>
    %19 = vector.broadcast %18 : vector<8x1xf32> to vector<8x256xf32>
    %20 = arith.mulf %6, %19 : vector<8x256xf32>
    %21 = arith.truncf %20 : vector<8x256xf32> to vector<8x256xbf16>
    %c1 = arith.constant 1 : index
    %c0_21 = arith.constant 0 : index
    %c0_22 = arith.constant 0 : index
    %22 = vector.load %arg10[%c1, %c0_21, %c0_22] : memref<9x256x256xbf16, #tpu.memory_space<vmem>>, vector<1x256x256xbf16>
    %23 = vector.shape_cast %22 : vector<1x256x256xbf16> to vector<256x256xbf16>
    %cst_23 = arith.constant dense<0.000000e+00> : vector<8x256xf32>
    %24 = tpu.matmul %21, %23, %cst_23 {dimension_numbers = #tpu.dot_dimension_numbers<[1], [0], [0], [1], [0, 0, 1, 1], [], []>} : vector<8x256xbf16>, vector<256x256xbf16>, vector<8x256xf32> -> vector<8x256xf32>
    %25 = arith.addf %17, %24 : vector<8x256xf32>
    %26 = vector.extract_strided_slice %0 {offsets = [0, 2], sizes = [8, 1], strides = [1, 1]} : vector<8x9xf32> to vector<8x1xf32>
    %27 = vector.broadcast %26 : vector<8x1xf32> to vector<8x256xf32>
    %28 = arith.mulf %6, %27 : vector<8x256xf32>
    %29 = arith.truncf %28 : vector<8x256xf32> to vector<8x256xbf16>
    %c2 = arith.constant 2 : index
    %c0_24 = arith.constant 0 : index
    %c0_25 = arith.constant 0 : index
    %30 = vector.load %arg10[%c2, %c0_24, %c0_25] : memref<9x256x256xbf16, #tpu.memory_space<vmem>>, vector<1x256x256xbf16>
    %31 = vector.shape_cast %30 : vector<1x256x256xbf16> to vector<256x256xbf16>
    %cst_26 = arith.constant dense<0.000000e+00> : vector<8x256xf32>
    %32 = tpu.matmul %29, %31, %cst_26 {dimension_numbers = #tpu.dot_dimension_numbers<[1], [0], [0], [1], [0, 0, 1, 1], [], []>} : vector<8x256xbf16>, vector<256x256xbf16>, vector<8x256xf32> -> vector<8x256xf32>
    %33 = arith.addf %25, %32 : vector<8x256xf32>
    %34 = vector.extract_strided_slice %0 {offsets = [0, 3], sizes = [8, 1], strides = [1, 1]} : vector<8x9xf32> to vector<8x1xf32>
    %35 = vector.broadcast %34 : vector<8x1xf32> to vector<8x256xf32>
    %36 = arith.mulf %6, %35 : vector<8x256xf32>
    %37 = arith.truncf %36 : vector<8x256xf32> to vector<8x256xbf16>
    %c3 = arith.constant 3 : index
    %c0_27 = arith.constant 0 : index
    %c0_28 = arith.constant 0 : index
    %38 = vector.load %arg10[%c3, %c0_27, %c0_28] : memref<9x256x256xbf16, #tpu.memory_space<vmem>>, vector<1x256x256xbf16>
    %39 = vector.shape_cast %38 : vector<1x256x256xbf16> to vector<256x256xbf16>
    %cst_29 = arith.constant dense<0.000000e+00> : vector<8x256xf32>
    %40 = tpu.matmul %37, %39, %cst_29 {dimension_numbers = #tpu.dot_dimension_numbers<[1], [0], [0], [1], [0, 0, 1, 1], [], []>} : vector<8x256xbf16>, vector<256x256xbf16>, vector<8x256xf32> -> vector<8x256xf32>
    %41 = arith.addf %33, %40 : vector<8x256xf32>
    %42 = vector.extract_strided_slice %0 {offsets = [0, 4], sizes = [8, 1], strides = [1, 1]} : vector<8x9xf32> to vector<8x1xf32>
    %43 = vector.broadcast %42 : vector<8x1xf32> to vector<8x256xf32>
    %44 = arith.mulf %6, %43 : vector<8x256xf32>
    %45 = arith.truncf %44 : vector<8x256xf32> to vector<8x256xbf16>
    %c4 = arith.constant 4 : index
    %c0_30 = arith.constant 0 : index
    %c0_31 = arith.constant 0 : index
    %46 = vector.load %arg10[%c4, %c0_30, %c0_31] : memref<9x256x256xbf16, #tpu.memory_space<vmem>>, vector<1x256x256xbf16>
    %47 = vector.shape_cast %46 : vector<1x256x256xbf16> to vector<256x256xbf16>
    %cst_32 = arith.constant dense<0.000000e+00> : vector<8x256xf32>
    %48 = tpu.matmul %45, %47, %cst_32 {dimension_numbers = #tpu.dot_dimension_numbers<[1], [0], [0], [1], [0, 0, 1, 1], [], []>} : vector<8x256xbf16>, vector<256x256xbf16>, vector<8x256xf32> -> vector<8x256xf32>
    %49 = arith.addf %41, %48 : vector<8x256xf32>
    %50 = vector.extract_strided_slice %0 {offsets = [0, 5], sizes = [8, 1], strides = [1, 1]} : vector<8x9xf32> to vector<8x1xf32>
    %51 = vector.broadcast %50 : vector<8x1xf32> to vector<8x256xf32>
    %52 = arith.mulf %6, %51 : vector<8x256xf32>
    %53 = arith.truncf %52 : vector<8x256xf32> to vector<8x256xbf16>
    %c5 = arith.constant 5 : index
    %c0_33 = arith.constant 0 : index
    %c0_34 = arith.constant 0 : index
    %54 = vector.load %arg10[%c5, %c0_33, %c0_34] : memref<9x256x256xbf16, #tpu.memory_space<vmem>>, vector<1x256x256xbf16>
    %55 = vector.shape_cast %54 : vector<1x256x256xbf16> to vector<256x256xbf16>
    %cst_35 = arith.constant dense<0.000000e+00> : vector<8x256xf32>
    %56 = tpu.matmul %53, %55, %cst_35 {dimension_numbers = #tpu.dot_dimension_numbers<[1], [0], [0], [1], [0, 0, 1, 1], [], []>} : vector<8x256xbf16>, vector<256x256xbf16>, vector<8x256xf32> -> vector<8x256xf32>
    %57 = arith.addf %49, %56 : vector<8x256xf32>
    %58 = vector.extract_strided_slice %0 {offsets = [0, 6], sizes = [8, 1], strides = [1, 1]} : vector<8x9xf32> to vector<8x1xf32>
    %59 = vector.broadcast %58 : vector<8x1xf32> to vector<8x256xf32>
    %60 = arith.mulf %6, %59 : vector<8x256xf32>
    %61 = arith.truncf %60 : vector<8x256xf32> to vector<8x256xbf16>
    %c6 = arith.constant 6 : index
    %c0_36 = arith.constant 0 : index
    %c0_37 = arith.constant 0 : index
    %62 = vector.load %arg10[%c6, %c0_36, %c0_37] : memref<9x256x256xbf16, #tpu.memory_space<vmem>>, vector<1x256x256xbf16>
    %63 = vector.shape_cast %62 : vector<1x256x256xbf16> to vector<256x256xbf16>
    %cst_38 = arith.constant dense<0.000000e+00> : vector<8x256xf32>
    %64 = tpu.matmul %61, %63, %cst_38 {dimension_numbers = #tpu.dot_dimension_numbers<[1], [0], [0], [1], [0, 0, 1, 1], [], []>} : vector<8x256xbf16>, vector<256x256xbf16>, vector<8x256xf32> -> vector<8x256xf32>
    %65 = arith.addf %57, %64 : vector<8x256xf32>
    %66 = vector.extract_strided_slice %0 {offsets = [0, 7], sizes = [8, 1], strides = [1, 1]} : vector<8x9xf32> to vector<8x1xf32>
    %67 = vector.broadcast %66 : vector<8x1xf32> to vector<8x256xf32>
    %68 = arith.mulf %6, %67 : vector<8x256xf32>
    %69 = arith.truncf %68 : vector<8x256xf32> to vector<8x256xbf16>
    %c7 = arith.constant 7 : index
    %c0_39 = arith.constant 0 : index
    %c0_40 = arith.constant 0 : index
    %70 = vector.load %arg10[%c7, %c0_39, %c0_40] : memref<9x256x256xbf16, #tpu.memory_space<vmem>>, vector<1x256x256xbf16>
    %71 = vector.shape_cast %70 : vector<1x256x256xbf16> to vector<256x256xbf16>
    %cst_41 = arith.constant dense<0.000000e+00> : vector<8x256xf32>
    %72 = tpu.matmul %69, %71, %cst_41 {dimension_numbers = #tpu.dot_dimension_numbers<[1], [0], [0], [1], [0, 0, 1, 1], [], []>} : vector<8x256xbf16>, vector<256x256xbf16>, vector<8x256xf32> -> vector<8x256xf32>
    %73 = arith.addf %65, %72 : vector<8x256xf32>
    %74 = vector.extract_strided_slice %0 {offsets = [0, 8], sizes = [8, 1], strides = [1, 1]} : vector<8x9xf32> to vector<8x1xf32>
    %75 = vector.broadcast %74 : vector<8x1xf32> to vector<8x256xf32>
    %76 = arith.mulf %6, %75 : vector<8x256xf32>
    %77 = arith.truncf %76 : vector<8x256xf32> to vector<8x256xbf16>
    %c8 = arith.constant 8 : index
    %c0_42 = arith.constant 0 : index
    %c0_43 = arith.constant 0 : index
    %78 = vector.load %arg10[%c8, %c0_42, %c0_43] : memref<9x256x256xbf16, #tpu.memory_space<vmem>>, vector<1x256x256xbf16>
    %79 = vector.shape_cast %78 : vector<1x256x256xbf16> to vector<256x256xbf16>
    %cst_44 = arith.constant dense<0.000000e+00> : vector<8x256xf32>
    %80 = tpu.matmul %77, %79, %cst_44 {dimension_numbers = #tpu.dot_dimension_numbers<[1], [0], [0], [1], [0, 0, 1, 1], [], []>} : vector<8x256xbf16>, vector<256x256xbf16>, vector<8x256xf32> -> vector<8x256xf32>
    %81 = arith.addf %73, %80 : vector<8x256xf32>
    %cst_45 = arith.constant dense<0.000000e+00> : vector<32x256xf32>
    %82 = tpu.matmul %3, %8, %cst_45 {dimension_numbers = #tpu.dot_dimension_numbers<[1], [0], [0], [1], [0, 0, 1, 1], [], []>} : vector<32x32xbf16>, vector<32x256xbf16>, vector<32x256xf32> -> vector<32x256xf32>
    %83 = arith.truncf %81 : vector<8x256xf32> to vector<8x256xbf16>
    %cst_46 = arith.constant dense<0.000000e+00> : vector<32x256xf32>
    %84 = tpu.matmul %2, %83, %cst_46 {dimension_numbers = #tpu.dot_dimension_numbers<[1], [0], [0], [1], [0, 0, 1, 1], [], []>} : vector<32x8xbf16>, vector<8x256xbf16>, vector<32x256xf32> -> vector<32x256xf32>
    %85 = arith.addf %82, %84 : vector<32x256xf32>
    %86 = vector.broadcast %4 : vector<32x1xf32> to vector<32x256xf32>
    %87 = arith.addf %85, %86 : vector<32x256xf32>
    %88 = vector.extract_strided_slice %1 {offsets = [0, 0], sizes = [32, 1], strides = [1, 1]} : vector<32x9xf32> to vector<32x1xf32>
    %89 = vector.broadcast %88 : vector<32x1xf32> to vector<32x256xf32>
    %90 = arith.mulf %87, %89 : vector<32x256xf32>
    %91 = arith.truncf %90 : vector<32x256xf32> to vector<32x256xbf16>
    %c0_47 = arith.constant 0 : index
    %c0_48 = arith.constant 0 : index
    %c0_49 = arith.constant 0 : index
    %92 = vector.load %arg10[%c0_47, %c0_48, %c0_49] : memref<9x256x256xbf16, #tpu.memory_space<vmem>>, vector<1x256x256xbf16>
    %93 = vector.shape_cast %92 : vector<1x256x256xbf16> to vector<256x256xbf16>
    %cst_50 = arith.constant dense<0.000000e+00> : vector<32x256xf32>
    %94 = tpu.matmul %91, %93, %cst_50 {dimension_numbers = #tpu.dot_dimension_numbers<[1], [0], [0], [1], [0, 0, 1, 1], [], []>} : vector<32x256xbf16>, vector<256x256xbf16>, vector<32x256xf32> -> vector<32x256xf32>
    %95 = vector.extract_strided_slice %1 {offsets = [0, 1], sizes = [32, 1], strides = [1, 1]} : vector<32x9xf32> to vector<32x1xf32>
    %96 = vector.broadcast %95 : vector<32x1xf32> to vector<32x256xf32>
    %97 = arith.mulf %87, %96 : vector<32x256xf32>
    %98 = arith.truncf %97 : vector<32x256xf32> to vector<32x256xbf16>
    %c1_51 = arith.constant 1 : index
    %c0_52 = arith.constant 0 : index
    %c0_53 = arith.constant 0 : index
    %99 = vector.load %arg10[%c1_51, %c0_52, %c0_53] : memref<9x256x256xbf16, #tpu.memory_space<vmem>>, vector<1x256x256xbf16>
    %100 = vector.shape_cast %99 : vector<1x256x256xbf16> to vector<256x256xbf16>
    %cst_54 = arith.constant dense<0.000000e+00> : vector<32x256xf32>
    %101 = tpu.matmul %98, %100, %cst_54 {dimension_numbers = #tpu.dot_dimension_numbers<[1], [0], [0], [1], [0, 0, 1, 1], [], []>} : vector<32x256xbf16>, vector<256x256xbf16>, vector<32x256xf32> -> vector<32x256xf32>
    %102 = arith.addf %94, %101 : vector<32x256xf32>
    %103 = vector.extract_strided_slice %1 {offsets = [0, 2], sizes = [32, 1], strides = [1, 1]} : vector<32x9xf32> to vector<32x1xf32>
    %104 = vector.broadcast %103 : vector<32x1xf32> to vector<32x256xf32>
    %105 = arith.mulf %87, %104 : vector<32x256xf32>
    %106 = arith.truncf %105 : vector<32x256xf32> to vector<32x256xbf16>
    %c2_55 = arith.constant 2 : index
    %c0_56 = arith.constant 0 : index
    %c0_57 = arith.constant 0 : index
    %107 = vector.load %arg10[%c2_55, %c0_56, %c0_57] : memref<9x256x256xbf16, #tpu.memory_space<vmem>>, vector<1x256x256xbf16>
    %108 = vector.shape_cast %107 : vector<1x256x256xbf16> to vector<256x256xbf16>
    %cst_58 = arith.constant dense<0.000000e+00> : vector<32x256xf32>
    %109 = tpu.matmul %106, %108, %cst_58 {dimension_numbers = #tpu.dot_dimension_numbers<[1], [0], [0], [1], [0, 0, 1, 1], [], []>} : vector<32x256xbf16>, vector<256x256xbf16>, vector<32x256xf32> -> vector<32x256xf32>
    %110 = arith.addf %102, %109 : vector<32x256xf32>
    %111 = vector.extract_strided_slice %1 {offsets = [0, 3], sizes = [32, 1], strides = [1, 1]} : vector<32x9xf32> to vector<32x1xf32>
    %112 = vector.broadcast %111 : vector<32x1xf32> to vector<32x256xf32>
    %113 = arith.mulf %87, %112 : vector<32x256xf32>
    %114 = arith.truncf %113 : vector<32x256xf32> to vector<32x256xbf16>
    %c3_59 = arith.constant 3 : index
    %c0_60 = arith.constant 0 : index
    %c0_61 = arith.constant 0 : index
    %115 = vector.load %arg10[%c3_59, %c0_60, %c0_61] : memref<9x256x256xbf16, #tpu.memory_space<vmem>>, vector<1x256x256xbf16>
    %116 = vector.shape_cast %115 : vector<1x256x256xbf16> to vector<256x256xbf16>
    %cst_62 = arith.constant dense<0.000000e+00> : vector<32x256xf32>
    %117 = tpu.matmul %114, %116, %cst_62 {dimension_numbers = #tpu.dot_dimension_numbers<[1], [0], [0], [1], [0, 0, 1, 1], [], []>} : vector<32x256xbf16>, vector<256x256xbf16>, vector<32x256xf32> -> vector<32x256xf32>
    %118 = arith.addf %110, %117 : vector<32x256xf32>
    %119 = vector.extract_strided_slice %1 {offsets = [0, 4], sizes = [32, 1], strides = [1, 1]} : vector<32x9xf32> to vector<32x1xf32>
    %120 = vector.broadcast %119 : vector<32x1xf32> to vector<32x256xf32>
    %121 = arith.mulf %87, %120 : vector<32x256xf32>
    %122 = arith.truncf %121 : vector<32x256xf32> to vector<32x256xbf16>
    %c4_63 = arith.constant 4 : index
    %c0_64 = arith.constant 0 : index
    %c0_65 = arith.constant 0 : index
    %123 = vector.load %arg10[%c4_63, %c0_64, %c0_65] : memref<9x256x256xbf16, #tpu.memory_space<vmem>>, vector<1x256x256xbf16>
    %124 = vector.shape_cast %123 : vector<1x256x256xbf16> to vector<256x256xbf16>
    %cst_66 = arith.constant dense<0.000000e+00> : vector<32x256xf32>
    %125 = tpu.matmul %122, %124, %cst_66 {dimension_numbers = #tpu.dot_dimension_numbers<[1], [0], [0], [1], [0, 0, 1, 1], [], []>} : vector<32x256xbf16>, vector<256x256xbf16>, vector<32x256xf32> -> vector<32x256xf32>
    %126 = arith.addf %118, %125 : vector<32x256xf32>
    %127 = vector.extract_strided_slice %1 {offsets = [0, 5], sizes = [32, 1], strides = [1, 1]} : vector<32x9xf32> to vector<32x1xf32>
    %128 = vector.broadcast %127 : vector<32x1xf32> to vector<32x256xf32>
    %129 = arith.mulf %87, %128 : vector<32x256xf32>
    %130 = arith.truncf %129 : vector<32x256xf32> to vector<32x256xbf16>
    %c5_67 = arith.constant 5 : index
    %c0_68 = arith.constant 0 : index
    %c0_69 = arith.constant 0 : index
    %131 = vector.load %arg10[%c5_67, %c0_68, %c0_69] : memref<9x256x256xbf16, #tpu.memory_space<vmem>>, vector<1x256x256xbf16>
    %132 = vector.shape_cast %131 : vector<1x256x256xbf16> to vector<256x256xbf16>
    %cst_70 = arith.constant dense<0.000000e+00> : vector<32x256xf32>
    %133 = tpu.matmul %130, %132, %cst_70 {dimension_numbers = #tpu.dot_dimension_numbers<[1], [0], [0], [1], [0, 0, 1, 1], [], []>} : vector<32x256xbf16>, vector<256x256xbf16>, vector<32x256xf32> -> vector<32x256xf32>
    %134 = arith.addf %126, %133 : vector<32x256xf32>
    %135 = vector.extract_strided_slice %1 {offsets = [0, 6], sizes = [32, 1], strides = [1, 1]} : vector<32x9xf32> to vector<32x1xf32>
    %136 = vector.broadcast %135 : vector<32x1xf32> to vector<32x256xf32>
    %137 = arith.mulf %87, %136 : vector<32x256xf32>
    %138 = arith.truncf %137 : vector<32x256xf32> to vector<32x256xbf16>
    %c6_71 = arith.constant 6 : index
    %c0_72 = arith.constant 0 : index
    %c0_73 = arith.constant 0 : index
    %139 = vector.load %arg10[%c6_71, %c0_72, %c0_73] : memref<9x256x256xbf16, #tpu.memory_space<vmem>>, vector<1x256x256xbf16>
    %140 = vector.shape_cast %139 : vector<1x256x256xbf16> to vector<256x256xbf16>
    %cst_74 = arith.constant dense<0.000000e+00> : vector<32x256xf32>
    %141 = tpu.matmul %138, %140, %cst_74 {dimension_numbers = #tpu.dot_dimension_numbers<[1], [0], [0], [1], [0, 0, 1, 1], [], []>} : vector<32x256xbf16>, vector<256x256xbf16>, vector<32x256xf32> -> vector<32x256xf32>
    %142 = arith.addf %134, %141 : vector<32x256xf32>
    %143 = vector.extract_strided_slice %1 {offsets = [0, 7], sizes = [32, 1], strides = [1, 1]} : vector<32x9xf32> to vector<32x1xf32>
    %144 = vector.broadcast %143 : vector<32x1xf32> to vector<32x256xf32>
    %145 = arith.mulf %87, %144 : vector<32x256xf32>
    %146 = arith.truncf %145 : vector<32x256xf32> to vector<32x256xbf16>
    %c7_75 = arith.constant 7 : index
    %c0_76 = arith.constant 0 : index
    %c0_77 = arith.constant 0 : index
    %147 = vector.load %arg10[%c7_75, %c0_76, %c0_77] : memref<9x256x256xbf16, #tpu.memory_space<vmem>>, vector<1x256x256xbf16>
    %148 = vector.shape_cast %147 : vector<1x256x256xbf16> to vector<256x256xbf16>
    %cst_78 = arith.constant dense<0.000000e+00> : vector<32x256xf32>
    %149 = tpu.matmul %146, %148, %cst_78 {dimension_numbers = #tpu.dot_dimension_numbers<[1], [0], [0], [1], [0, 0, 1, 1], [], []>} : vector<32x256xbf16>, vector<256x256xbf16>, vector<32x256xf32> -> vector<32x256xf32>
    %150 = arith.addf %142, %149 : vector<32x256xf32>
    %151 = vector.extract_strided_slice %1 {offsets = [0, 8], sizes = [32, 1], strides = [1, 1]} : vector<32x9xf32> to vector<32x1xf32>
    %152 = vector.broadcast %151 : vector<32x1xf32> to vector<32x256xf32>
    %153 = arith.mulf %87, %152 : vector<32x256xf32>
    %154 = arith.truncf %153 : vector<32x256xf32> to vector<32x256xbf16>
    %c8_79 = arith.constant 8 : index
    %c0_80 = arith.constant 0 : index
    %c0_81 = arith.constant 0 : index
    %155 = vector.load %arg10[%c8_79, %c0_80, %c0_81] : memref<9x256x256xbf16, #tpu.memory_space<vmem>>, vector<1x256x256xbf16>
    %156 = vector.shape_cast %155 : vector<1x256x256xbf16> to vector<256x256xbf16>
    %cst_82 = arith.constant dense<0.000000e+00> : vector<32x256xf32>
    %157 = tpu.matmul %154, %156, %cst_82 {dimension_numbers = #tpu.dot_dimension_numbers<[1], [0], [0], [1], [0, 0, 1, 1], [], []>} : vector<32x256xbf16>, vector<256x256xbf16>, vector<32x256xf32> -> vector<32x256xf32>
    %158 = arith.addf %150, %157 : vector<32x256xf32>
    %159 = arith.truncf %158 : vector<32x256xf32> to vector<32x256xbf16>
    %c0_83 = arith.constant 0 : index
    %c0_84 = arith.constant 0 : index
    %160 = vector.load %arg9[%c0_83, %c0_84] : memref<128x32xbf16, #tpu.memory_space<vmem>>, vector<32x32xbf16>
    %cst_85 = arith.constant dense<0.000000e+00> : vector<32x256xf32>
    %161 = tpu.matmul %160, %159, %cst_85 {dimension_numbers = #tpu.dot_dimension_numbers<[1], [0], [0], [1], [0, 0, 1, 1], [], []>} : vector<32x32xbf16>, vector<32x256xbf16>, vector<32x256xf32> -> vector<32x256xf32>
    %cst_86 = arith.constant 0.000000e+00 : f32
    %162 = vector.broadcast %cst_86 : f32 to vector<32x256xf32>
    %163 = arith.subf %162, %161 : vector<32x256xf32>
    %164 = math.exp %163 : vector<32x256xf32>
    %cst_87 = arith.constant 1.000000e+00 : f32
    %165 = vector.broadcast %cst_87 : f32 to vector<32x256xf32>
    %166 = arith.addf %165, %164 : vector<32x256xf32>
    %167 = tpu.reciprocal %166 {approx = true} : vector<32x256xf32> -> vector<32x256xf32>
    %c64 = arith.constant 64 : index
    %c0_88 = arith.constant 0 : index
    %168 = vector.load %arg9[%c64, %c0_88] : memref<128x32xbf16, #tpu.memory_space<vmem>>, vector<32x32xbf16>
    %cst_89 = arith.constant dense<0.000000e+00> : vector<32x256xf32>
    %169 = tpu.matmul %168, %159, %cst_89 {dimension_numbers = #tpu.dot_dimension_numbers<[1], [0], [0], [1], [0, 0, 1, 1], [], []>} : vector<32x32xbf16>, vector<32x256xbf16>, vector<32x256xf32> -> vector<32x256xf32>
    %cst_90 = arith.constant 0.000000e+00 : f32
    %170 = vector.broadcast %cst_90 : f32 to vector<32x256xf32>
    %171 = arith.maximumf %169, %170 : vector<32x256xf32>
    %cst_91 = arith.constant 6.000000e+00 : f32
    %172 = vector.broadcast %cst_91 : f32 to vector<32x256xf32>
    %173 = arith.minimumf %171, %172 : vector<32x256xf32>
    %174 = arith.mulf %167, %173 : vector<32x256xf32>
    %c32 = arith.constant 32 : index
    %c0_92 = arith.constant 0 : index
    %175 = vector.load %arg9[%c32, %c0_92] : memref<128x32xbf16, #tpu.memory_space<vmem>>, vector<32x32xbf16>
    %cst_93 = arith.constant dense<0.000000e+00> : vector<32x256xf32>
    %176 = tpu.matmul %175, %159, %cst_93 {dimension_numbers = #tpu.dot_dimension_numbers<[1], [0], [0], [1], [0, 0, 1, 1], [], []>} : vector<32x32xbf16>, vector<32x256xbf16>, vector<32x256xf32> -> vector<32x256xf32>
    %cst_94 = arith.constant 0.000000e+00 : f32
    %177 = vector.broadcast %cst_94 : f32 to vector<32x256xf32>
    %178 = arith.subf %177, %176 : vector<32x256xf32>
    %179 = math.exp %178 : vector<32x256xf32>
    %cst_95 = arith.constant 1.000000e+00 : f32
    %180 = vector.broadcast %cst_95 : f32 to vector<32x256xf32>
    %181 = arith.addf %180, %179 : vector<32x256xf32>
    %182 = tpu.reciprocal %181 {approx = true} : vector<32x256xf32> -> vector<32x256xf32>
    %183 = arith.mulf %182, %10 : vector<32x256xf32>
    %184 = arith.addf %183, %174 : vector<32x256xf32>
    %c0_96 = arith.constant 0 : index
    %c0_97 = arith.constant 0 : index
    %c0_98 = arith.constant 0 : index
    %185 = vector.load %arg12[%c0_96, %c0_97, %c0_98] : memref<1x32x256xf32, #tpu.memory_space<vmem>>, vector<1x32x256xf32>
    %186 = vector.shape_cast %185 : vector<1x32x256xf32> to vector<32x256xf32>
    %187 = vector.shape_cast %184 : vector<32x256xf32> to vector<1x32x256xf32>
    tpu.vector_store %arg12[%c0_96, %c0_97, %c0_98], %187 {strides = array<i32>} : memref<1x32x256xf32, #tpu.memory_space<vmem>>, vector<1x32x256xf32>,
    %c96 = arith.constant 96 : index
    %c0_99 = arith.constant 0 : index
    %188 = vector.load %arg9[%c96, %c0_99] : memref<128x32xbf16, #tpu.memory_space<vmem>>, vector<32x32xbf16>
    %cst_100 = arith.constant dense<0.000000e+00> : vector<32x256xf32>
    %189 = tpu.matmul %188, %159, %cst_100 {dimension_numbers = #tpu.dot_dimension_numbers<[1], [0], [0], [1], [0, 0, 1, 1], [], []>} : vector<32x32xbf16>, vector<32x256xbf16>, vector<32x256xf32> -> vector<32x256xf32>
    %cst_101 = arith.constant 0.000000e+00 : f32
    %190 = vector.broadcast %cst_101 : f32 to vector<32x256xf32>
    %191 = arith.subf %190, %189 : vector<32x256xf32>
    %192 = math.exp %191 : vector<32x256xf32>
    %cst_102 = arith.constant 1.000000e+00 : f32
    %193 = vector.broadcast %cst_102 : f32 to vector<32x256xf32>
    %194 = arith.addf %193, %192 : vector<32x256xf32>
    %195 = tpu.reciprocal %194 {approx = true} : vector<32x256xf32> -> vector<32x256xf32>
    %cst_103 = arith.constant 0.000000e+00 : f32
    %196 = vector.broadcast %cst_103 : f32 to vector<32x256xf32>
    %197 = arith.maximumf %184, %196 : vector<32x256xf32>
    %cst_104 = arith.constant 6.000000e+00 : f32
    %198 = vector.broadcast %cst_104 : f32 to vector<32x256xf32>
    %199 = arith.minimumf %197, %198 : vector<32x256xf32>
    %200 = arith.mulf %195, %199 : vector<32x256xf32>
    %c0_105 = arith.constant 0 : index
    %c0_106 = arith.constant 0 : index
    %c0_107 = arith.constant 0 : index
    %201 = vector.load %arg11[%c0_105, %c0_106, %c0_107] : memref<1x32x256xf32, #tpu.memory_space<vmem>>, vector<1x32x256xf32>
    %202 = vector.shape_cast %201 : vector<1x32x256xf32> to vector<32x256xf32>
    %203 = vector.shape_cast %200 : vector<32x256xf32> to vector<1x32x256xf32>
    tpu.vector_store %arg11[%c0_105, %c0_106, %c0_107], %203 {strides = array<i32>} : memref<1x32x256xf32, #tpu.memory_space<vmem>>, vector<1x32x256xf32>,
    return
  }
  func.func @transform_0(%arg0: i32) -> (i32, i32, i32) {
    %c0_i32 = arith.constant 0 : i32
    %c0_i32_0 = arith.constant 0 : i32
    %c0_i32_1 = arith.constant 0 : i32
    return %arg0, %c0_i32, %c0_i32_0 : i32, i32, i32
  }
  func.func @transform_1(%arg0: i32) -> (i32, i32, i32) {
    %c0_i32 = arith.constant 0 : i32
    %c0_i32_0 = arith.constant 0 : i32
    %c0_i32_1 = arith.constant 0 : i32
    return %arg0, %c0_i32, %c0_i32_0 : i32, i32, i32
  }
  func.func @transform_2(%arg0: i32) -> (i32, i32, i32) {
    %c0_i32 = arith.constant 0 : i32
    %c0_i32_0 = arith.constant 0 : i32
    %c0_i32_1 = arith.constant 0 : i32
    return %arg0, %c0_i32, %c0_i32_0 : i32, i32, i32
  }
  func.func @transform_3(%arg0: i32) -> (i32, i32) {
    %c0_i32 = arith.constant 0 : i32
    %c0_i32_0 = arith.constant 0 : i32
    %c0_i32_1 = arith.constant 0 : i32
    return %c0_i32, %c0_i32_0 : i32, i32
  }
  func.func @transform_4(%arg0: i32) -> (i32, i32) {
    %c0_i32 = arith.constant 0 : i32
    %c0_i32_0 = arith.constant 0 : i32
    %c0_i32_1 = arith.constant 0 : i32
    return %c0_i32, %c0_i32_0 : i32, i32
  }
  func.func @transform_5(%arg0: i32) -> (i32, i32) {
    %c0_i32 = arith.constant 0 : i32
    %c0_i32_0 = arith.constant 0 : i32
    %c0_i32_1 = arith.constant 0 : i32
    return %c0_i32, %c0_i32_0 : i32, i32
  }
  func.func @transform_6(%arg0: i32) -> (i32, i32) {
    %c0_i32 = arith.constant 0 : i32
    %c0_i32_0 = arith.constant 0 : i32
    %c0_i32_1 = arith.constant 0 : i32
    return %c0_i32, %c0_i32_0 : i32, i32
  }
  func.func @transform_7(%arg0: i32) -> (i32, i32) {
    %c0_i32 = arith.constant 0 : i32
    %c0_i32_0 = arith.constant 0 : i32
    %c0_i32_1 = arith.constant 0 : i32
    return %c0_i32, %c0_i32_0 : i32, i32
  }
  func.func @transform_8(%arg0: i32) -> (i32, i32) {
    %c0_i32 = arith.constant 0 : i32
    %c0_i32_0 = arith.constant 0 : i32
    %c0_i32_1 = arith.constant 0 : i32
    return %c0_i32, %c0_i32_0 : i32, i32
  }
  func.func @transform_9(%arg0: i32) -> (i32, i32, i32) {
    %c0_i32 = arith.constant 0 : i32
    %c0_i32_0 = arith.constant 0 : i32
    %c0_i32_1 = arith.constant 0 : i32
    %c0_i32_2 = arith.constant 0 : i32
    return %c0_i32, %c0_i32_0, %c0_i32_1 : i32, i32, i32
  }
  func.func @transform_10(%arg0: i32) -> (i32, i32, i32) {
    %c0_i32 = arith.constant 0 : i32
    %c0_i32_0 = arith.constant 0 : i32
    %c0_i32_1 = arith.constant 0 : i32
    return %arg0, %c0_i32, %c0_i32_0 : i32, i32, i32
  }
  func.func @transform_11(%arg0: i32) -> (i32, i32, i32) {
    %c0_i32 = arith.constant 0 : i32
    %c0_i32_0 = arith.constant 0 : i32
    %c0_i32_1 = arith.constant 0 : i32
    return %arg0, %c0_i32, %c0_i32_0 : i32, i32, i32
  }
}

</mosaic_0001>

<bundles_post_ra>
// kernel: bottleneck_lstm_cell.1
= control target key start
LH: loop header
LB: loop body
LE: loop exit
PB: predicated region body
PF: predicated region fallthrough
CT: control target
= control target key end

     0   :  { %s5918_s17 = smov 0   ;;  %s8443_s0 = inlined_call_operand.vmem [shape: f32[2,8,256], index: 0, kind: input, shape index: {}]   ;;  %s8444_s1 = inlined_call_operand.vmem [shape: bf16[2,32,256], index: 1, kind: input, shape index: {}]   ;;  %s8445_s2 = inlined_call_operand.vmem [shape: f32[2,32,256], index: 2, kind: input, shape index: {}]   ;;  %s8446_s3 = inlined_call_operand.vmem [shape: f32[8,9], index: 3, kind: input, shape index: {}]   ;;  %s8447_s4 = inlined_call_operand.vmem [shape: f32[32,9], index: 4, kind: input, shape index: {}]   ;;  %s8448_s5 = inlined_call_operand.vmem [shape: bf16[32,8], index: 5, kind: input, shape index: {}]   ;;  %s8449_s6 = inlined_call_operand.vmem [shape: bf16[32,32], index: 6, kind: input, shape index: {}]   ;;  %s8450_s7 = inlined_call_operand.vmem [shape: f32[32,1], index: 7, kind: input, shape index: {}]   ;;  %s8451_s8 = inlined_call_operand.vmem [shape: bf16[128,32], index: 8, kind: input, shape index: {}]   ;;  %s8452_s9 = inlined_call_operand.vmem [shape: bf16[9,256,256], index: 9, kind: input, shape index: {}]   ;;  %s8453_s10 = inlined_call_operand.vmem [shape: f32[2,32,256], index: 10, kind: output, shape index: {0}]   ;;  %s8454_s11 = inlined_call_operand.vmem [shape: f32[2,32,256], index: 11, kind: output, shape index: {1}]  }
   0x1 LB: > { %s4258_s18 = sadd.s32 4294967295, %s5847_s17   ;;  %p4262_p0 = scmp.ge.s32.totalorder %s5847_s17, 1  ;;  %s5847_s17 = sphi %s5918_s17, %s22_s17  }
   0x2   : > { %p360_p1 = scmp.lt.s32.totalorder %s5847_s17, 3 }
   0x4   : > { %p361_p2 = pnand %p4262_p0, %p360_p1 }
   0x6   : > { %364 = sbr.rel (%p361_p2) target bundleno = 2147 (0x863), region = 60 }
   0xd   : > { %v5929_v0 = vld [vmem:[%s8446_s3] sm:$0xff]  ;;  %v5849_v1 = vmov 1   ;;  %v5850_v4 = vmov 2   ;;  %v5007_v5 = vld [vmem:[%s8452_s9 + $0x114] ss:$8 sps:$4 sm:$0xff]   ;;  %v8455_v6 = vmov 0  }
   0xe   : > { %4974 = vset.pattern.permute.xlu0 %v5849_v1  ;;  %v5004_v2 = vld [vmem:[%s8452_s9 + $0x104] ss:$8 sps:$4 sm:$0xff]   ;;  %v5006_v3 = vld [vmem:[%s8452_s9 + $0x100] ss:$8 sps:$4 sm:$0xff]   ;;  %4976 = vset.pattern.permute.xlu1 %v5850_v4  ;;  %v5009_v7 = vld [vmem:[%s8452_s9 + $0x110] ss:$8 sps:$4 sm:$0xff]  }
   0xf   : > { %514 = vperm.xlu0 %4974, %v5929_v0   ;;  %957 = vperm.xlu1 %4976, %v5929_v0   ;;  %v5010_v8 = vld [vmem:[%s8452_s9 + $0x124] ss:$8 sps:$4 sm:$0xff]   ;;  %v5012_v9 = vld [vmem:[%s8452_s9 + $0x120] ss:$8 sps:$4 sm:$0xff]   ;;  %v5013_v10 = vld [vmem:[%s8452_s9 + $0x134] ss:$8 sps:$4 sm:$0xff]  }
  0x10   : > { %714 = vmatprep.subr.bf16.mxu0 %v5004_v2  ;;  %2722 = vmatprep.mubr.bf16.mxu1 %v8455_v6  ;;  %v5015_v11 = vld [vmem:[%s8452_s9 + $0x130] ss:$8 sps:$4 sm:$0xff]   ;;  %v5016_v12 = vld [vmem:[%s8452_s9 + $0x144] ss:$8 sps:$4 sm:$0xff]   ;;  %v5018_v13 = vld [vmem:[%s8452_s9 + $0x140] ss:$8 sps:$4 sm:$0xff]  }
  0x11   : > { %715 = vmatpush1.bf16.msra.mxu0 %v5006_v3  ;;  %v5019_v14 = vld [vmem:[%s8452_s9 + $0x154] ss:$8 sps:$4 sm:$0xff]   ;;  %v5021_v15 = vld [vmem:[%s8452_s9 + $0x150] ss:$8 sps:$4 sm:$0xff]   ;;  %v5022_v16 = vld [vmem:[%s8452_s9 + $0x164] ss:$8 sps:$4 sm:$0xff]  }
  0x12   : > { %716 = vmatprep.subr.bf16.mxu0 %v5007_v5  ;;  %v5024_v17 = vld [vmem:[%s8452_s9 + $0x160] ss:$8 sps:$4 sm:$0xff]   ;;  %v5025_v18 = vld [vmem:[%s8452_s9 + $0x174] ss:$8 sps:$4 sm:$0xff]   ;;  %v5027_v19 = vld [vmem:[%s8452_s9 + $0x170] ss:$8 sps:$4 sm:$0xff]  }
  0x13   : > { %4975 = vset.pattern.permute.xlu0 %v8455_v6  ;;  %v5028_v20 = vld [vmem:[%s8452_s9 + $0x184] ss:$8 sps:$4 sm:$0xff]   ;;  %v5030_v21 = vld [vmem:[%s8452_s9 + $0x180] ss:$8 sps:$4 sm:$0xff]   ;;  %v5031_v22 = vld [vmem:[%s8452_s9 + $0x194] ss:$8 sps:$4 sm:$0xff]  }
  0x14   : > { %474 = vperm.xlu0 %4975, %v5929_v0   ;;  %v5033_v23 = vld [vmem:[%s8452_s9 + $0x190] ss:$8 sps:$4 sm:$0xff]   ;;  %v5034_v24 = vld [vmem:[%s8452_s9 + $0x1a4] ss:$8 sps:$4 sm:$0xff]   ;;  %v5036_v25 = vld [vmem:[%s8452_s9 + $0x1a0] ss:$8 sps:$4 sm:$0xff]  }
  0x15   : > { %717 = vmatpush1.bf16.msra.mxu0 %v5009_v7  ;;  %v5037_v26 = vld [vmem:[%s8452_s9 + $0x1b4] ss:$8 sps:$4 sm:$0xff]   ;;  %v5039_v27 = vld [vmem:[%s8452_s9 + $0x1b0] ss:$8 sps:$4 sm:$0xff]   ;;  %v5040_v28 = vld [vmem:[%s8452_s9 + $0x1c4] ss:$8 sps:$4 sm:$0xff]  }
  0x16   : > { %718 = vmatprep.subr.bf16.mxu0 %v5010_v8  ;;  %v5042_v29 = vld [vmem:[%s8452_s9 + $0x1c0] ss:$8 sps:$4 sm:$0xff]   ;;  %v5043_v30 = vld [vmem:[%s8452_s9 + $0x1d4] ss:$8 sps:$4 sm:$0xff]   ;;  %v5045_v31 = vld [vmem:[%s8452_s9 + $0x1d0] ss:$8 sps:$4 sm:$0xff]  }
  0x17   : > { %v5046_v32 = vld [vmem:[%s8452_s9 + $0x1e4] ss:$8 sps:$4 sm:$0xff]   ;;  %v5048_v33 = vld [vmem:[%s8452_s9 + $0x1e0] ss:$8 sps:$4 sm:$0xff]   ;;  %v5049_v34 = vld [vmem:[%s8452_s9 + $0x1f4] ss:$8 sps:$4 sm:$0xff]  }
  0x18   : > { %v5051_v35 = vld [vmem:[%s8452_s9 + $0x1f0] ss:$8 sps:$4 sm:$0xff]   ;;  %v5054_v36 = vld [vmem:[%s8452_s9 + $0x4] ss:$8 sps:$4 sm:$0xff]   ;;  %v5852_v37 = vmov 3   ;;  %p415_p3 = scmp.lt.s32.totalorder %s4258_s18, 1 }
  0x19   : > { %719 = vmatpush1.bf16.msra.mxu0 %v5012_v9  ;;  %4977 = vset.pattern.permute.xlu1 %v5852_v37  ;;  %v5853_v41 = vmov 4   ;;  %v5052_v44 = vld [vmem:[%s8452_s9] ss:$8 sps:$4 sm:$0xff]   ;;  %v5057_v47 = vld [vmem:[%s8452_s9 + $0x14] ss:$8 sps:$4 sm:$0xff]   ;;  %vm2683_vm0 = vcmask 1043456  }
  0x1a   : > { %720 = vmatprep.subr.bf16.mxu0 %v5013_v10  ;;  %1201 = vperm.xlu1 %4977, %v5929_v0   ;;  %s8510_s18 = smov (!%p415_p3, %s4258_s18), 1  ;;  %v5055_v50 = vld [vmem:[%s8452_s9 + $0x10] ss:$8 sps:$4 sm:$0xff]   ;;  %v5060_v51 = vld [vmem:[%s8452_s9 + $0x24] ss:$8 sps:$4 sm:$0xff]   ;;  %vm2676_vm1 = vcmask 64512  }
  0x1b   : > { %s4848_s19 = sshll.u32 %s8510_s18, 4  ;;  %v5058_v53 = vld [vmem:[%s8452_s9 + $0x20] ss:$8 sps:$4 sm:$0xff]   ;;  %v5063_v54 = vld [vmem:[%s8452_s9 + $0x34] ss:$8 sps:$4 sm:$0xff]   ;;  %s4849_s16 = sshll.u32 %s8510_s18, 5 }
  0x1c   : > { %s6049_s22 = scalar_lea.vmem %s8443_s0, %s4848_s19  ;;  %v5061_v55 = vld [vmem:[%s8452_s9 + $0x30] ss:$8 sps:$4 sm:$0xff]   ;;  %v5066_v56 = vld [vmem:[%s8452_s9 + $0x44] ss:$8 sps:$4 sm:$0xff]   ;;  %v5064_v57 = vld [vmem:[%s8452_s9 + $0x40] ss:$8 sps:$4 sm:$0xff]   ;;  %s6896_s24 = scalar_lea.vmem %s8444_s1, %s4849_s16 }
  0x1d   : > { %721 = vmatpush1.bf16.msra.mxu0 %v5015_v11  ;;  %v6052_v38 = vld [vmem:[%s6049_s22] sm:$0xff]  ;;  %v6055_v39 = vld [vmem:[%s6049_s22 + $0x8] sm:$0xff]  ;;  %v5069_v58 = vld [vmem:[%s8452_s9 + $0x54] ss:$8 sps:$4 sm:$0xff]   ;;  %vm2773_vm2 = vcmask 261120   ;;  %s8359_s28 = sshll.u32 %s8510_s18, 6 }
  0x1e   : > { %722 = vmatprep.subr.bf16.mxu0 %v5016_v12  ;;  %4978 = vset.pattern.permute.xlu1 %v5853_v41  ;;  %v5067_v59 = vld [vmem:[%s8452_s9 + $0x50] ss:$8 sps:$4 sm:$0xff]   ;;  %v5072_v60 = vld [vmem:[%s8452_s9 + $0x64] ss:$8 sps:$4 sm:$0xff]   ;;  %v5070_v61 = vld [vmem:[%s8452_s9 + $0x60] ss:$8 sps:$4 sm:$0xff]   ;;  %s8367_s18 = scalar_lea.vmem %s8445_s2, %s8359_s28  ;;  %s8383_s12 = scalar_lea.vmem %s8454_s11, %s8359_s28 }
  0x1f   : > { %1445 = vperm.xlu1 %4978, %v5929_v0   ;;  %v5075_v62 = vld [vmem:[%s8452_s9 + $0x74] ss:$8 sps:$4 sm:$0xff]   ;;  %v5073_v63 = vld [vmem:[%s8452_s9 + $0x70] ss:$8 sps:$4 sm:$0xff]   ;;  %v5078_v2 = vld [vmem:[%s8452_s9 + $0x84] ss:$8 sps:$4 sm:$0xff]   ;;  %s8426_s15 = scalar_lea.vmem %s8453_s10, %s8359_s28 }
  0x20   : > { %v5076_v3 = vld [vmem:[%s8452_s9 + $0x80] ss:$8 sps:$4 sm:$0xff]   ;;  %v5081_v5 = vld [vmem:[%s8452_s9 + $0x94] ss:$8 sps:$4 sm:$0xff]   ;;  %v5079_v7 = vld [vmem:[%s8452_s9 + $0x90] ss:$8 sps:$4 sm:$0xff]  }
  0x21   : > { %723 = vmatpush1.bf16.msra.mxu0 %v5018_v13  ;;  %v5084_v8 = vld [vmem:[%s8452_s9 + $0xa4] ss:$8 sps:$4 sm:$0xff]   ;;  %v5082_v9 = vld [vmem:[%s8452_s9 + $0xa0] ss:$8 sps:$4 sm:$0xff]   ;;  %v5087_v10 = vld [vmem:[%s8452_s9 + $0xb4] ss:$8 sps:$4 sm:$0xff]  }
  0x22   : > { %724 = vmatprep.subr.bf16.mxu0 %v5019_v14  ;;  %v5085_v11 = vld [vmem:[%s8452_s9 + $0xb0] ss:$8 sps:$4 sm:$0xff]   ;;  %v5090_v12 = vld [vmem:[%s8452_s9 + $0xc4] ss:$8 sps:$4 sm:$0xff]   ;;  %v5088_v13 = vld [vmem:[%s8452_s9 + $0xc0] ss:$8 sps:$4 sm:$0xff]  }
  0x23   : > { %v5093_v14 = vld [vmem:[%s8452_s9 + $0xd4] ss:$8 sps:$4 sm:$0xff]  }
  0x25   : > { %725 = vmatpush1.bf16.msra.mxu0 %v5021_v15  ;;  %v5091_v15 = vld [vmem:[%s8452_s9 + $0xd0] ss:$8 sps:$4 sm:$0xff]  }
  0x26   : > { %726 = vmatprep.subr.bf16.mxu0 %v5022_v16  ;;  %v5096_v16 = vld [vmem:[%s8452_s9 + $0xe4] ss:$8 sps:$4 sm:$0xff]  }
  0x29   : > { %727 = vmatpush1.bf16.msra.mxu0 %v5024_v17  ;;  %v5094_v17 = vld [vmem:[%s8452_s9 + $0xe0] ss:$8 sps:$4 sm:$0xff]  }
  0x2a   : > { %728 = vmatprep.subr.bf16.mxu0 %v5025_v18  ;;  %v5099_v18 = vld [vmem:[%s8452_s9 + $0xf4] ss:$8 sps:$4 sm:$0xff]  }
  0x2d   : > { %729 = vmatpush1.bf16.msra.mxu0 %v5027_v19 }
  0x2e   : > { %730 = vmatprep.subr.bf16.mxu0 %v5028_v20 }
  0x31   : > { %731 = vmatpush1.bf16.msra.mxu0 %v5030_v21  ;;  %v5097_v21 = vld [vmem:[%s8452_s9 + $0xf0] ss:$8 sps:$4 sm:$0xff]  }
  0x32   : > { %732 = vmatprep.subr.bf16.mxu0 %v5031_v22 }
  0x35   : > { %733 = vmatpush1.bf16.msra.mxu0 %v5033_v23  ;;  %v5102_v23 = vld [vmem:[%s8452_s9 + $0x204] ss:$8 sps:$4 sm:$0xff]  }
  0x36   : > { %734 = vmatprep.subr.bf16.mxu0 %v5034_v24  ;;  %v5854_v24 = vmov 5  }
  0x37   : > { %4979 = vset.pattern.permute.xlu0 %v5854_v24 }
  0x38   : > { %1689 = vperm.xlu0 %4979, %v5929_v0   ;;  %v5108_v0 = vld [vmem:[%s8452_s9 + $0x224] ss:$8 sps:$4 sm:$0xff]  }
  0x39   : > { %735 = vmatpush1.bf16.msra.mxu0 %v5036_v25 }
  0x3a   : > { %736 = vmatprep.subr.bf16.mxu0 %v5037_v26  ;;  %v5100_v26 = vld [vmem:[%s8452_s9 + $0x200] ss:$8 sps:$4 sm:$0xff]  }
  0x3d   : > { %737 = vmatpush1.bf16.msra.mxu0 %v5039_v27 }
  0x3e   : > { %738 = vmatprep.subr.bf16.mxu0 %v5040_v28  ;;  %v5105_v28 = vld [vmem:[%s8452_s9 + $0x214] ss:$8 sps:$4 sm:$0xff]  }
  0x41   : > { %739 = vmatpush1.bf16.msra.mxu0 %v5042_v29  ;;  %v5103_v29 = vld [vmem:[%s8452_s9 + $0x210] ss:$8 sps:$4 sm:$0xff]  }
  0x42   : > { %740 = vmatprep.subr.bf16.mxu0 %v5043_v30  ;;  %v5106_v30 = vld [vmem:[%s8452_s9 + $0x220] ss:$8 sps:$4 sm:$0xff]  }
  0x45   : > { %741 = vmatpush1.bf16.msra.mxu0 %v5045_v31  ;;  %v5111_v31 = vld [vmem:[%s8452_s9 + $0x234] ss:$8 sps:$4 sm:$0xff]  }
  0x46   : > { %742 = vmatprep.subr.bf16.mxu0 %v5046_v32  ;;  %v5109_v32 = vld [vmem:[%s8452_s9 + $0x230] ss:$8 sps:$4 sm:$0xff]  }
  0x49   : > { %743 = vmatpush1.bf16.msra.mxu0 %v5048_v33  ;;  %v5114_v33 = vld [vmem:[%s8452_s9 + $0x244] ss:$8 sps:$4 sm:$0xff]  }
  0x4a   : > { %744 = vmatprep.subr.bf16.mxu0 %v5049_v34  ;;  %v5112_v34 = vld [vmem:[%s8452_s9 + $0x240] ss:$8 sps:$4 sm:$0xff]  }
  0x4d   : > { %745 = vmatpush1.bf16.msra.mxu0 %v5051_v35  ;;  %v5117_v35 = vld [vmem:[%s8452_s9 + $0x254] ss:$8 sps:$4 sm:$0xff]  }
  0x4e   : > { %915 = vmatprep.subr.bf16.mxu0 %v5054_v36  ;;  %v5115_v36 = vld [vmem:[%s8452_s9 + $0x250] ss:$8 sps:$4 sm:$0xff]  }
  0x8e   : > { %v515_v40 = vpop.permute.xlu0 %514  ;;  %v6152_v19 = vpop.permute.xlu1 %957 }
  0x8f   : > { %v517_v42 = vmul.f32 %v515_v40, %v6052_v38  ;;  %v518_v43 = vmul.f32 %v515_v40, %v6055_v39  ;;  %v961_v22 = vmul.f32 %v6152_v19, %v6055_v39  ;;  %v5120_v40 = vld [vmem:[%s8452_s9 + $0x264] ss:$8 sps:$4 sm:$0xff]  }
  0x91   : > { %v519_v45 = vpack.c.bf16 %v517_v42, %v517_v42  ;;  %v520_v46 = vpack.c.bf16 %v518_v43, %v518_v43  ;;  %v963_v27 = vpack.c.bf16 %v961_v22, %v961_v22  ;;  %v5118_v42 = vld [vmem:[%s8452_s9 + $0x260] ss:$8 sps:$4 sm:$0xff]   ;;  %v5123_v43 = vld [vmem:[%s8452_s9 + $0x274] ss:$8 sps:$4 sm:$0xff]  }
  0x92   : > { %v5171_v22 = vld [vmem:[%s8452_s9 + $0x374] ss:$8 sps:$4 sm:$0xff]  }
  0x93   : > { %746 = vmatprep.mubr.bf16.mxu0 %v520_v46  ;;  %v475_v48 = vpop.permute.xlu0 %474  ;;  %v5124_v46 = vld [vmem:[%s8452_s9 + $0x280] ss:$8 sps:$4 sm:$0xff]  }
  0x94   : > { %747 = vmatmul.mubr.bf16.vlgmr.msra.gmra.mrb[0].mxu0 %v519_v45  ;;  %v478_v49 = vmul.f32 %v475_v48, %v6055_v39  ;;  %v477_v20 = vmul.f32 %v475_v48, %v6052_v38  ;;  %v5126_v45 = vld [vmem:[%s8452_s9 + $0x284] ss:$8 sps:$4 sm:$0xff]   ;;  %v5127_v48 = vld [vmem:[%s8452_s9 + $0x290] ss:$8 sps:$4 sm:$0xff]  }
  0x95   : > { %916 = vmatpush1.bf16.msra.mxu0 %v5052_v44  ;;  %v5121_v44 = vld [vmem:[%s8452_s9 + $0x270] ss:$8 sps:$4 sm:$0xff]  }
  0x96   : > { %917 = vmatprep.subr.bf16.mxu0 %v5057_v47  ;;  %v480_v52 = vpack.c.bf16 %v478_v49, %v478_v49  ;;  %v479_v25 = vpack.c.bf16 %v477_v20, %v477_v20  ;;  %v5129_v47 = vld [vmem:[%s8452_s9 + $0x294] ss:$8 sps:$4 sm:$0xff]   ;;  %v5132_v49 = vld [vmem:[%s8452_s9 + $0x2a4] ss:$8 sps:$4 sm:$0xff]  }
  0x97   : > { %v5168_v20 = vld [vmem:[%s8452_s9 + $0x364] ss:$8 sps:$4 sm:$0xff]  }
  0x98   : > { %947 = vmatprep.mubr.bf16.mxu0 %v480_v52  ;;  %v5133_v52 = vld [vmem:[%s8452_s9 + $0x2b0] ss:$8 sps:$4 sm:$0xff]  }
  0x99   : > { %918 = vmatpush1.bf16.msra.mxu0 %v5055_v50  ;;  %v5130_v50 = vld [vmem:[%s8452_s9 + $0x2a0] ss:$8 sps:$4 sm:$0xff]  }
  0x9a   : > { %919 = vmatprep.subr.bf16.mxu0 %v5060_v51  ;;  %v5135_v51 = vld [vmem:[%s8452_s9 + $0x2b4] ss:$8 sps:$4 sm:$0xff]  }
  0x9d   : > { %920 = vmatpush1.bf16.msra.mxu0 %v5058_v53  ;;  %v5138_v53 = vld [vmem:[%s8452_s9 + $0x2c4] ss:$8 sps:$4 sm:$0xff]  }
  0x9e   : > { %921 = vmatprep.subr.bf16.mxu0 %v5063_v54  ;;  %v5136_v54 = vld [vmem:[%s8452_s9 + $0x2c0] ss:$8 sps:$4 sm:$0xff]  }
  0xa1   : > { %922 = vmatpush1.bf16.msra.mxu0 %v5061_v55  ;;  %v5141_v55 = vld [vmem:[%s8452_s9 + $0x2d4] ss:$8 sps:$4 sm:$0xff]  }
  0xa2   : > { %923 = vmatprep.subr.bf16.mxu0 %v5066_v56  ;;  %v5139_v56 = vld [vmem:[%s8452_s9 + $0x2d0] ss:$8 sps:$4 sm:$0xff]  }
  0xa5   : > { %924 = vmatpush1.bf16.msra.mxu0 %v5064_v57  ;;  %v5144_v57 = vld [vmem:[%s8452_s9 + $0x2e4] ss:$8 sps:$4 sm:$0xff]  }
  0xa6   : > { %925 = vmatprep.subr.bf16.mxu0 %v5069_v58  ;;  %v5142_v58 = vld [vmem:[%s8452_s9 + $0x2e0] ss:$8 sps:$4 sm:$0xff]  }
  0xa9   : > { %926 = vmatpush1.bf16.msra.mxu0 %v5067_v59  ;;  %v5147_v59 = vld [vmem:[%s8452_s9 + $0x2f4] ss:$8 sps:$4 sm:$0xff]  }
  0xaa   : > { %927 = vmatprep.subr.bf16.mxu0 %v5072_v60  ;;  %v6255_v60 = vpop.permute.xlu1 %1201 }
  0xad   : > { %928 = vmatpush1.bf16.msra.mxu0 %v5070_v61  ;;  %v960_v61 = vmul.f32 %v6152_v19, %v6052_v38  ;;  %v5163_v19 = vld [vmem:[%s8452_s9 + $0x350] ss:$8 sps:$4 sm:$0xff]  }
  0xae   : > { %929 = vmatprep.subr.bf16.mxu0 %v5075_v62  ;;  %v5145_v62 = vld [vmem:[%s8452_s9 + $0x2f0] ss:$8 sps:$4 sm:$0xff]  }
  0xb1   : > { %930 = vmatpush1.bf16.msra.mxu0 %v5073_v63  ;;  %v1205_v63 = vmul.f32 %v6255_v60, %v6055_v39 }
  0xb2   : > { %931 = vmatprep.subr.bf16.mxu0 %v5078_v2  ;;  %v5150_v2 = vld [vmem:[%s8452_s9 + $0x304] ss:$8 sps:$4 sm:$0xff]  }
  0xb5   : > { %932 = vmatpush1.bf16.msra.mxu0 %v5076_v3  ;;  %v5855_v3 = vmov 6  }
  0xb6   : > { %933 = vmatprep.subr.bf16.mxu0 %v5081_v5  ;;  %4980 = vset.pattern.permute.xlu1 %v5855_v3  ;;  %v6271_v5 = vld [vmem:[%s8446_s3] sm:$0xff] }
  0xb7   : > { %1933 = vperm.xlu1 %4980, %v6271_v5  }
  0xb9   : > { %934 = vmatpush1.bf16.msra.mxu0 %v5079_v7  ;;  %v962_v7 = vpack.c.bf16 %v960_v61, %v960_v61  ;;  %v5211_v61 = vld [vmem:[%s8452_s9 + $0x450] ss:$8 sps:$4 sm:$0xff]  }
  0xba   : > { %935 = vmatprep.subr.bf16.mxu0 %v5084_v8  ;;  %v5148_v8 = vld [vmem:[%s8452_s9 + $0x300] ss:$8 sps:$4 sm:$0xff]  }
  0xbd   : > { %936 = vmatpush1.bf16.msra.mxu0 %v5082_v9  ;;  %v1207_v9 = vpack.c.bf16 %v1205_v63, %v1205_v63  ;;  %v5214_v63 = vld [vmem:[%s8452_s9 + $0x460] ss:$8 sps:$4 sm:$0xff]  }
  0xbe   : > { %937 = vmatprep.subr.bf16.mxu0 %v5087_v10  ;;  %v5153_v10 = vld [vmem:[%s8452_s9 + $0x314] ss:$8 sps:$4 sm:$0xff]  }
  0xc1   : > { %938 = vmatpush1.bf16.msra.mxu0 %v5085_v11  ;;  %v5151_v11 = vld [vmem:[%s8452_s9 + $0x310] ss:$8 sps:$4 sm:$0xff]  }
  0xc2   : > { %939 = vmatprep.subr.bf16.mxu0 %v5090_v12  ;;  %v5156_v12 = vld [vmem:[%s8452_s9 + $0x324] ss:$8 sps:$4 sm:$0xff]  }
  0xc5   : > { %940 = vmatpush1.bf16.msra.mxu0 %v5088_v13  ;;  %v5154_v13 = vld [vmem:[%s8452_s9 + $0x320] ss:$8 sps:$4 sm:$0xff]  }
  0xc6   : > { %941 = vmatprep.subr.bf16.mxu0 %v5093_v14  ;;  %v5159_v14 = vld [vmem:[%s8452_s9 + $0x334] ss:$8 sps:$4 sm:$0xff]  }
  0xc9   : > { %942 = vmatpush1.bf16.msra.mxu0 %v5091_v15  ;;  %v5157_v15 = vld [vmem:[%s8452_s9 + $0x330] ss:$8 sps:$4 sm:$0xff]  }
  0xca   : > { %943 = vmatprep.subr.bf16.mxu0 %v5096_v16  ;;  %v5162_v16 = vld [vmem:[%s8452_s9 + $0x344] ss:$8 sps:$4 sm:$0xff]  }
  0xcd   : > { %944 = vmatpush1.bf16.msra.mxu0 %v5094_v17  ;;  %v5160_v17 = vld [vmem:[%s8452_s9 + $0x340] ss:$8 sps:$4 sm:$0xff]  }
  0xce   : > { %945 = vmatprep.subr.bf16.mxu0 %v5099_v18  ;;  %v5165_v18 = vld [vmem:[%s8452_s9 + $0x354] ss:$8 sps:$4 sm:$0xff]  }
  0xd1   : > { %946 = vmatpush1.bf16.msra.mxu0 %v5097_v21  ;;  %v5166_v21 = vld [vmem:[%s8452_s9 + $0x360] ss:$8 sps:$4 sm:$0xff]  }
  0xd2   : > { %1157 = vmatprep.subr.bf16.mxu0 %v5102_v23  ;;  %v5169_v23 = vld [vmem:[%s8452_s9 + $0x370] ss:$8 sps:$4 sm:$0xff]  }
  0xd4   : > { %948 = vmatmul.mubr.bf16.vlgmr.msra.gmra.mrb[0].mxu0 %v479_v25  ;;  %v5174_v25 = vld [vmem:[%s8452_s9 + $0x384] ss:$8 sps:$4 sm:$0xff]  }
  0xd5   : > { %1158 = vmatpush1.bf16.msra.mxu0 %v5100_v26  ;;  %1189 = vmatprep.mubr.bf16.mxu0 %v963_v27  ;;  %v5172_v26 = vld [vmem:[%s8452_s9 + $0x380] ss:$8 sps:$4 sm:$0xff]   ;;  %v5177_v27 = vld [vmem:[%s8452_s9 + $0x394] ss:$8 sps:$4 sm:$0xff]  }
  0xd6   : > { %1159 = vmatprep.subr.bf16.mxu0 %v5105_v28  ;;  %v5175_v28 = vld [vmem:[%s8452_s9 + $0x390] ss:$8 sps:$4 sm:$0xff]  }
  0xd9   : > { %1160 = vmatpush1.bf16.msra.mxu0 %v5103_v29  ;;  %v5180_v29 = vld [vmem:[%s8452_s9 + $0x3a4] ss:$8 sps:$4 sm:$0xff]  }
  0xda   : > { %1161 = vmatprep.subr.bf16.mxu0 %v5108_v0  ;;  %v5178_v0 = vld [vmem:[%s8452_s9 + $0x3a0] ss:$8 sps:$4 sm:$0xff]  }
  0xdd   : > { %1162 = vmatpush1.bf16.msra.mxu0 %v5106_v30  ;;  %v5183_v30 = vld [vmem:[%s8452_s9 + $0x3b4] ss:$8 sps:$4 sm:$0xff]  }
  0xde   : > { %1163 = vmatprep.subr.bf16.mxu0 %v5111_v31  ;;  %v5181_v31 = vld [vmem:[%s8452_s9 + $0x3b0] ss:$8 sps:$4 sm:$0xff]  }
  0xe1   : > { %1164 = vmatpush1.bf16.msra.mxu0 %v5109_v32  ;;  %v5186_v32 = vld [vmem:[%s8452_s9 + $0x3c4] ss:$8 sps:$4 sm:$0xff]  }
  0xe2   : > { %1165 = vmatprep.subr.bf16.mxu0 %v5114_v33  ;;  %v5184_v33 = vld [vmem:[%s8452_s9 + $0x3c0] ss:$8 sps:$4 sm:$0xff]  }
  0xe5   : > { %1166 = vmatpush1.bf16.msra.mxu0 %v5112_v34  ;;  %v5189_v34 = vld [vmem:[%s8452_s9 + $0x3d4] ss:$8 sps:$4 sm:$0xff]  }
  0xe6   : > { %1167 = vmatprep.subr.bf16.mxu0 %v5117_v35  ;;  %v5187_v35 = vld [vmem:[%s8452_s9 + $0x3d0] ss:$8 sps:$4 sm:$0xff]  }
  0xe9   : > { %1168 = vmatpush1.bf16.msra.mxu0 %v5115_v36  ;;  %v5192_v36 = vld [vmem:[%s8452_s9 + $0x3e4] ss:$8 sps:$4 sm:$0xff]  }
  0xea   : > { %1169 = vmatprep.subr.bf16.mxu0 %v5120_v40  ;;  %v5190_v40 = vld [vmem:[%s8452_s9 + $0x3e0] ss:$8 sps:$4 sm:$0xff]  }
  0xed   : > { %1170 = vmatpush1.bf16.msra.mxu0 %v5118_v42  ;;  %v5195_v42 = vld [vmem:[%s8452_s9 + $0x3f4] ss:$8 sps:$4 sm:$0xff]  }
  0xee   : > { %1171 = vmatprep.subr.bf16.mxu0 %v5123_v43  ;;  %v6364_v43 = vpop.permute.xlu1 %1445 }
  0xf1   : > { %1172 = vmatpush1.bf16.msra.mxu0 %v5121_v44  ;;  %v1204_v44 = vmul.f32 %v6255_v60, %v6052_v38  ;;  %v5213_v60 = vld [vmem:[%s8452_s9 + $0x454] ss:$8 sps:$4 sm:$0xff]  }
  0xf2   : > { %1173 = vmatprep.subr.bf16.mxu0 %v5126_v45  ;;  %v5193_v45 = vld [vmem:[%s8452_s9 + $0x3f0] ss:$8 sps:$4 sm:$0xff]  }
  0xf5   : > { %1174 = vmatpush1.bf16.msra.mxu0 %v5124_v46  ;;  %v1449_v46 = vmul.f32 %v6364_v43, %v6055_v39 }
  0xf6   : > { %1175 = vmatprep.subr.bf16.mxu0 %v5129_v47  ;;  %v5198_v47 = vld [vmem:[%s8452_s9 + $0x404] ss:$8 sps:$4 sm:$0xff]  }
  0xf9   : > { %1176 = vmatpush1.bf16.msra.mxu0 %v5127_v48  ;;  %v5856_v48 = vmov 7  }
  0xfa   : > { %1177 = vmatprep.subr.bf16.mxu0 %v5132_v49  ;;  %4981 = vset.pattern.permute.xlu1 %v5856_v48  ;;  %v1206_v49 = vpack.c.bf16 %v1204_v44, %v1204_v44  ;;  %v5259_v44 = vld [vmem:[%s8452_s9 + $0x550] ss:$8 sps:$4 sm:$0xff]  }
  0xfb   : > { %2177 = vperm.xlu1 %4981, %v6271_v5  }
  0xfd   : > { %1178 = vmatpush1.bf16.msra.mxu0 %v5130_v50  ;;  %v5196_v50 = vld [vmem:[%s8452_s9 + $0x400] ss:$8 sps:$4 sm:$0xff]  }
  0xfe   : > { %1179 = vmatprep.subr.bf16.mxu0 %v5135_v51  ;;  %v1451_v51 = vpack.c.bf16 %v1449_v46, %v1449_v46  ;;  %v5262_v46 = vld [vmem:[%s8452_s9 + $0x560] ss:$8 sps:$4 sm:$0xff]  }
  0xff   : > { %4983 = vset.pattern.permute.xlu1 %v8455_v6 }
 0x101   : > { %1180 = vmatpush1.bf16.msra.mxu0 %v5133_v52  ;;  %v5201_v52 = vld [vmem:[%s8452_s9 + $0x414] ss:$8 sps:$4 sm:$0xff]  }
 0x102   : > { %1181 = vmatprep.subr.bf16.mxu0 %v5138_v53  ;;  %v5199_v53 = vld [vmem:[%s8452_s9 + $0x410] ss:$8 sps:$4 sm:$0xff]  }
 0x105   : > { %1182 = vmatpush1.bf16.msra.mxu0 %v5136_v54  ;;  %v5204_v54 = vld [vmem:[%s8452_s9 + $0x424] ss:$8 sps:$4 sm:$0xff]  }
 0x106   : > { %1183 = vmatprep.subr.bf16.mxu0 %v5141_v55  ;;  %v5202_v55 = vld [vmem:[%s8452_s9 + $0x420] ss:$8 sps:$4 sm:$0xff]  }
 0x109   : > { %1184 = vmatpush1.bf16.msra.mxu0 %v5139_v56  ;;  %v5207_v56 = vld [vmem:[%s8452_s9 + $0x434] ss:$8 sps:$4 sm:$0xff]  }
 0x10a   : > { %1185 = vmatprep.subr.bf16.mxu0 %v5144_v57  ;;  %v5205_v57 = vld [vmem:[%s8452_s9 + $0x430] ss:$8 sps:$4 sm:$0xff]  }
 0x10d   : > { %1186 = vmatpush1.bf16.msra.mxu0 %v5142_v58  ;;  %v5210_v58 = vld [vmem:[%s8452_s9 + $0x444] ss:$8 sps:$4 sm:$0xff]  }
 0x10e   : > { %1187 = vmatprep.subr.bf16.mxu0 %v5147_v59  ;;  %v5208_v59 = vld [vmem:[%s8452_s9 + $0x440] ss:$8 sps:$4 sm:$0xff]  }
 0x111   : > { %1188 = vmatpush1.bf16.msra.mxu0 %v5145_v62  ;;  %v5216_v62 = vld [vmem:[%s8452_s9 + $0x464] ss:$8 sps:$4 sm:$0xff]  }
 0x112   : > { %1401 = vmatprep.subr.bf16.mxu0 %v5150_v2  ;;  %v5219_v2 = vld [vmem:[%s8452_s9 + $0x474] ss:$8 sps:$4 sm:$0xff]  }
 0x114   : > { %1190 = vmatmul.mubr.bf16.vlgmr.msra.gmra.mrb[0].mxu0 %v962_v7  ;;  %v5217_v7 = vld [vmem:[%s8452_s9 + $0x470] ss:$8 sps:$4 sm:$0xff]  }
 0x115   : > { %1402 = vmatpush1.bf16.msra.mxu0 %v5148_v8  ;;  %1433 = vmatprep.mubr.bf16.mxu0 %v1207_v9  ;;  %v5222_v8 = vld [vmem:[%s8452_s9 + $0x484] ss:$8 sps:$4 sm:$0xff]   ;;  %v5220_v9 = vld [vmem:[%s8452_s9 + $0x480] ss:$8 sps:$4 sm:$0xff]  }
 0x116   : > { %1403 = vmatprep.subr.bf16.mxu0 %v5153_v10  ;;  %v5225_v10 = vld [vmem:[%s8452_s9 + $0x494] ss:$8 sps:$4 sm:$0xff]  }
 0x119   : > { %1404 = vmatpush1.bf16.msra.mxu0 %v5151_v11  ;;  %v5223_v11 = vld [vmem:[%s8452_s9 + $0x490] ss:$8 sps:$4 sm:$0xff]  }
 0x11a   : > { %1405 = vmatprep.subr.bf16.mxu0 %v5156_v12  ;;  %v5228_v12 = vld [vmem:[%s8452_s9 + $0x4a4] ss:$8 sps:$4 sm:$0xff]  }
 0x11d   : > { %1406 = vmatpush1.bf16.msra.mxu0 %v5154_v13  ;;  %v5226_v13 = vld [vmem:[%s8452_s9 + $0x4a0] ss:$8 sps:$4 sm:$0xff]  }
 0x11e   : > { %1407 = vmatprep.subr.bf16.mxu0 %v5159_v14  ;;  %v5231_v14 = vld [vmem:[%s8452_s9 + $0x4b4] ss:$8 sps:$4 sm:$0xff]  }
 0x121   : > { %1408 = vmatpush1.bf16.msra.mxu0 %v5157_v15  ;;  %v5229_v15 = vld [vmem:[%s8452_s9 + $0x4b0] ss:$8 sps:$4 sm:$0xff]  }
 0x122   : > { %1409 = vmatprep.subr.bf16.mxu0 %v5162_v16  ;;  %v5234_v16 = vld [vmem:[%s8452_s9 + $0x4c4] ss:$8 sps:$4 sm:$0xff]  }
 0x125   : > { %1410 = vmatpush1.bf16.msra.mxu0 %v5160_v17  ;;  %v5232_v17 = vld [vmem:[%s8452_s9 + $0x4c0] ss:$8 sps:$4 sm:$0xff]  }
 0x126   : > { %1411 = vmatprep.subr.bf16.mxu0 %v5165_v18  ;;  %v5237_v18 = vld [vmem:[%s8452_s9 + $0x4d4] ss:$8 sps:$4 sm:$0xff]  }
 0x129   : > { %1412 = vmatpush1.bf16.msra.mxu0 %v5163_v19  ;;  %v5235_v19 = vld [vmem:[%s8452_s9 + $0x4d0] ss:$8 sps:$4 sm:$0xff]  }
 0x12a   : > { %1413 = vmatprep.subr.bf16.mxu0 %v5168_v20  ;;  %v5240_v20 = vld [vmem:[%s8452_s9 + $0x4e4] ss:$8 sps:$4 sm:$0xff]  }
 0x12d   : > { %1414 = vmatpush1.bf16.msra.mxu0 %v5166_v21  ;;  %v5238_v21 = vld [vmem:[%s8452_s9 + $0x4e0] ss:$8 sps:$4 sm:$0xff]  }
 0x12e   : > { %1415 = vmatprep.subr.bf16.mxu0 %v5171_v22  ;;  %v5243_v22 = vld [vmem:[%s8452_s9 + $0x4f4] ss:$8 sps:$4 sm:$0xff]  }
 0x131   : > { %1416 = vmatpush1.bf16.msra.mxu0 %v5169_v23  ;;  %v6469_v23 = vpop.permute.xlu0 %1689 }
 0x132   : > { %1417 = vmatprep.subr.bf16.mxu0 %v5174_v25  ;;  %v1448_v25 = vmul.f32 %v6364_v43, %v6052_v38  ;;  %v5261_v43 = vld [vmem:[%s8452_s9 + $0x554] ss:$8 sps:$4 sm:$0xff]  }
 0x135   : > { %1418 = vmatpush1.bf16.msra.mxu0 %v5172_v26  ;;  %v5241_v26 = vld [vmem:[%s8452_s9 + $0x4f0] ss:$8 sps:$4 sm:$0xff]  }
 0x136   : > { %1419 = vmatprep.subr.bf16.mxu0 %v5177_v27  ;;  %v1693_v27 = vmul.f32 %v6469_v23, %v6055_v39 }
 0x139   : > { %1420 = vmatpush1.bf16.msra.mxu0 %v5175_v28  ;;  %v5246_v28 = vld [vmem:[%s8452_s9 + $0x504] ss:$8 sps:$4 sm:$0xff]  }
 0x13a   : > { %1421 = vmatprep.subr.bf16.mxu0 %v5180_v29  ;;  %v5857_v29 = vmov 8  }
 0x13b   : > { %4982 = vset.pattern.permute.xlu0 %v5857_v29 }
 0x13c   : > { %2421 = vperm.xlu0 %4982, %v6271_v5   ;;  %v5247_v5 = vld [vmem:[%s8452_s9 + $0x510] ss:$8 sps:$4 sm:$0xff]  }
 0x13d   : > { %1422 = vmatpush1.bf16.msra.mxu0 %v5178_v0  ;;  %v1450_v0 = vpack.c.bf16 %v1448_v25, %v1448_v25  ;;  %v5307_v25 = vld [vmem:[%s8452_s9 + $0x650] ss:$8 sps:$4 sm:$0xff]  }
 0x13e   : > { %1423 = vmatprep.subr.bf16.mxu0 %v5183_v30  ;;  %v5244_v30 = vld [vmem:[%s8452_s9 + $0x500] ss:$8 sps:$4 sm:$0xff]  }
 0x140   : > { %4984 = vset.pattern.permute.xlu0 %v5849_v1 }
 0x141   : > { %1424 = vmatpush1.bf16.msra.mxu0 %v5181_v31  ;;  %v1695_v31 = vpack.c.bf16 %v1693_v27, %v1693_v27  ;;  %v5310_v27 = vld [vmem:[%s8452_s9 + $0x660] ss:$8 sps:$4 sm:$0xff]  }
 0x142   : > { %1425 = vmatprep.subr.bf16.mxu0 %v5186_v32  ;;  %v5249_v32 = vld [vmem:[%s8452_s9 + $0x514] ss:$8 sps:$4 sm:$0xff]  }
 0x145   : > { %1426 = vmatpush1.bf16.msra.mxu0 %v5184_v33  ;;  %v5252_v33 = vld [vmem:[%s8452_s9 + $0x524] ss:$8 sps:$4 sm:$0xff]  }
 0x146   : > { %1427 = vmatprep.subr.bf16.mxu0 %v5189_v34  ;;  %v5250_v34 = vld [vmem:[%s8452_s9 + $0x520] ss:$8 sps:$4 sm:$0xff]  }
 0x149   : > { %1428 = vmatpush1.bf16.msra.mxu0 %v5187_v35  ;;  %v5255_v35 = vld [vmem:[%s8452_s9 + $0x534] ss:$8 sps:$4 sm:$0xff]  }
 0x14a   : > { %1429 = vmatprep.subr.bf16.mxu0 %v5192_v36  ;;  %v5253_v36 = vld [vmem:[%s8452_s9 + $0x530] ss:$8 sps:$4 sm:$0xff]  }
 0x14d   : > { %1430 = vmatpush1.bf16.msra.mxu0 %v5190_v40  ;;  %v5258_v40 = vld [vmem:[%s8452_s9 + $0x544] ss:$8 sps:$4 sm:$0xff]  }
 0x14e   : > { %1431 = vmatprep.subr.bf16.mxu0 %v5195_v42  ;;  %v5256_v42 = vld [vmem:[%s8452_s9 + $0x540] ss:$8 sps:$4 sm:$0xff]  }
 0x151   : > { %1432 = vmatpush1.bf16.msra.mxu0 %v5193_v45  ;;  %v5264_v45 = vld [vmem:[%s8452_s9 + $0x564] ss:$8 sps:$4 sm:$0xff]  }
 0x152   : > { %1645 = vmatprep.subr.bf16.mxu0 %v5198_v47  ;;  %v5267_v47 = vld [vmem:[%s8452_s9 + $0x574] ss:$8 sps:$4 sm:$0xff]  }
 0x154   : > { %1434 = vmatmul.mubr.bf16.vlgmr.msra.gmra.mrb[0].mxu0 %v1206_v49  ;;  %v5265_v49 = vld [vmem:[%s8452_s9 + $0x570] ss:$8 sps:$4 sm:$0xff]  }
 0x155   : > { %1646 = vmatpush1.bf16.msra.mxu0 %v5196_v50  ;;  %1677 = vmatprep.mubr.bf16.mxu0 %v1451_v51  ;;  %v5270_v50 = vld [vmem:[%s8452_s9 + $0x584] ss:$8 sps:$4 sm:$0xff]   ;;  %v5268_v51 = vld [vmem:[%s8452_s9 + $0x580] ss:$8 sps:$4 sm:$0xff]  }
 0x156   : > { %1647 = vmatprep.subr.bf16.mxu0 %v5201_v52  ;;  %v5273_v52 = vld [vmem:[%s8452_s9 + $0x594] ss:$8 sps:$4 sm:$0xff]  }
 0x159   : > { %1648 = vmatpush1.bf16.msra.mxu0 %v5199_v53  ;;  %v5271_v53 = vld [vmem:[%s8452_s9 + $0x590] ss:$8 sps:$4 sm:$0xff]  }
 0x15a   : > { %1649 = vmatprep.subr.bf16.mxu0 %v5204_v54  ;;  %v5276_v54 = vld [vmem:[%s8452_s9 + $0x5a4] ss:$8 sps:$4 sm:$0xff]  }
 0x15d   : > { %1650 = vmatpush1.bf16.msra.mxu0 %v5202_v55  ;;  %v5274_v55 = vld [vmem:[%s8452_s9 + $0x5a0] ss:$8 sps:$4 sm:$0xff]  }
 0x15e   : > { %1651 = vmatprep.subr.bf16.mxu0 %v5207_v56  ;;  %v5279_v56 = vld [vmem:[%s8452_s9 + $0x5b4] ss:$8 sps:$4 sm:$0xff]  }
 0x161   : > { %1652 = vmatpush1.bf16.msra.mxu0 %v5205_v57  ;;  %v5277_v57 = vld [vmem:[%s8452_s9 + $0x5b0] ss:$8 sps:$4 sm:$0xff]  }
 0x162   : > { %1653 = vmatprep.subr.bf16.mxu0 %v5210_v58  ;;  %v5282_v58 = vld [vmem:[%s8452_s9 + $0x5c4] ss:$8 sps:$4 sm:$0xff]  }
 0x165   : > { %1654 = vmatpush1.bf16.msra.mxu0 %v5208_v59  ;;  %v5280_v59 = vld [vmem:[%s8452_s9 + $0x5c0] ss:$8 sps:$4 sm:$0xff]  }
 0x166   : > { %1655 = vmatprep.subr.bf16.mxu0 %v5213_v60  ;;  %v5285_v60 = vld [vmem:[%s8452_s9 + $0x5d4] ss:$8 sps:$4 sm:$0xff]  }
 0x169   : > { %1656 = vmatpush1.bf16.msra.mxu0 %v5211_v61  ;;  %v5283_v61 = vld [vmem:[%s8452_s9 + $0x5d0] ss:$8 sps:$4 sm:$0xff]  }
 0x16a   : > { %1657 = vmatprep.subr.bf16.mxu0 %v5216_v62  ;;  %v5288_v62 = vld [vmem:[%s8452_s9 + $0x5e4] ss:$8 sps:$4 sm:$0xff]  }
 0x16d   : > { %1658 = vmatpush1.bf16.msra.mxu0 %v5214_v63  ;;  %v5286_v63 = vld [vmem:[%s8452_s9 + $0x5e0] ss:$8 sps:$4 sm:$0xff]  }
 0x16e   : > { %1659 = vmatprep.subr.bf16.mxu0 %v5219_v2  ;;  %v5291_v2 = vld [vmem:[%s8452_s9 + $0x5f4] ss:$8 sps:$4 sm:$0xff]  }
 0x171   : > { %1660 = vmatpush1.bf16.msra.mxu0 %v5217_v7  ;;  %v6574_v7 = vpop.permute.xlu1 %1933 }
 0x172   : > { %1661 = vmatprep.subr.bf16.mxu0 %v5222_v8  ;;  %v1692_v8 = vmul.f32 %v6469_v23, %v6052_v38  ;;  %v5309_v23 = vld [vmem:[%s8452_s9 + $0x654] ss:$8 sps:$4 sm:$0xff]  }
 0x175   : > { %1662 = vmatpush1.bf16.msra.mxu0 %v5220_v9  ;;  %v5289_v9 = vld [vmem:[%s8452_s9 + $0x5f0] ss:$8 sps:$4 sm:$0xff]  }
 0x176   : > { %1663 = vmatprep.subr.bf16.mxu0 %v5225_v10  ;;  %v1937_v10 = vmul.f32 %v6574_v7, %v6055_v39 }
 0x179   : > { %1664 = vmatpush1.bf16.msra.mxu0 %v5223_v11  ;;  %v5294_v11 = vld [vmem:[%s8452_s9 + $0x604] ss:$8 sps:$4 sm:$0xff]  }
 0x17a   : > { %1665 = vmatprep.subr.bf16.mxu0 %v5228_v12  ;;  %v1694_v12 = vpack.c.bf16 %v1692_v8, %v1692_v8  ;;  %v5358_v8 = vld [vmem:[%s8452_s9 + $0x760] ss:$8 sps:$4 sm:$0xff]  }
 0x17d   : > { %1666 = vmatpush1.bf16.msra.mxu0 %v5226_v13  ;;  %v5292_v13 = vld [vmem:[%s8452_s9 + $0x600] ss:$8 sps:$4 sm:$0xff]  }
 0x17e   : > { %1667 = vmatprep.subr.bf16.mxu0 %v5231_v14  ;;  %v1939_v14 = vpack.c.bf16 %v1937_v10, %v1937_v10  ;;  %v5361_v10 = vld [vmem:[%s8452_s9 + $0x770] ss:$8 sps:$4 sm:$0xff]  }
 0x181   : > { %1668 = vmatpush1.bf16.msra.mxu0 %v5229_v15  ;;  %v5297_v15 = vld [vmem:[%s8452_s9 + $0x614] ss:$8 sps:$4 sm:$0xff]  }
 0x182   : > { %1669 = vmatprep.subr.bf16.mxu0 %v5234_v16  ;;  %v5295_v16 = vld [vmem:[%s8452_s9 + $0x610] ss:$8 sps:$4 sm:$0xff]  }
 0x185   : > { %1670 = vmatpush1.bf16.msra.mxu0 %v5232_v17  ;;  %v5300_v17 = vld [vmem:[%s8452_s9 + $0x624] ss:$8 sps:$4 sm:$0xff]  }
 0x186   : > { %1671 = vmatprep.subr.bf16.mxu0 %v5237_v18  ;;  %v5298_v18 = vld [vmem:[%s8452_s9 + $0x620] ss:$8 sps:$4 sm:$0xff]  }
 0x189   : > { %1672 = vmatpush1.bf16.msra.mxu0 %v5235_v19  ;;  %v5303_v19 = vld [vmem:[%s8452_s9 + $0x634] ss:$8 sps:$4 sm:$0xff]  }
 0x18a   : > { %1673 = vmatprep.subr.bf16.mxu0 %v5240_v20  ;;  %v5301_v20 = vld [vmem:[%s8452_s9 + $0x630] ss:$8 sps:$4 sm:$0xff]  }
 0x18d   : > { %1674 = vmatpush1.bf16.msra.mxu0 %v5238_v21  ;;  %v5306_v21 = vld [vmem:[%s8452_s9 + $0x644] ss:$8 sps:$4 sm:$0xff]  }
 0x18e   : > { %1675 = vmatprep.subr.bf16.mxu0 %v5243_v22  ;;  %v5304_v22 = vld [vmem:[%s8452_s9 + $0x640] ss:$8 sps:$4 sm:$0xff]  }
 0x191   : > { %1676 = vmatpush1.bf16.msra.mxu0 %v5241_v26  ;;  %v5312_v26 = vld [vmem:[%s8452_s9 + $0x664] ss:$8 sps:$4 sm:$0xff]  }
 0x192   : > { %1889 = vmatprep.subr.bf16.mxu0 %v5246_v28  ;;  %v5315_v28 = vld [vmem:[%s8452_s9 + $0x674] ss:$8 sps:$4 sm:$0xff]  }
 0x194   : > { %1678 = vmatmul.mubr.bf16.vlgmr.msra.gmra.mrb[0].mxu0 %v1450_v0  ;;  %v5313_v0 = vld [vmem:[%s8452_s9 + $0x670] ss:$8 sps:$4 sm:$0xff]  }
 0x195   : > { %1890 = vmatpush1.bf16.msra.mxu0 %v5244_v30  ;;  %1921 = vmatprep.mubr.bf16.mxu0 %v1695_v31  ;;  %v5318_v30 = vld [vmem:[%s8452_s9 + $0x684] ss:$8 sps:$4 sm:$0xff]   ;;  %v5316_v31 = vld [vmem:[%s8452_s9 + $0x680] ss:$8 sps:$4 sm:$0xff]  }
 0x196   : > { %1891 = vmatprep.subr.bf16.mxu0 %v5249_v32  ;;  %v5321_v32 = vld [vmem:[%s8452_s9 + $0x694] ss:$8 sps:$4 sm:$0xff]  }
 0x199   : > { %1892 = vmatpush1.bf16.msra.mxu0 %v5247_v5  ;;  %v5319_v5 = vld [vmem:[%s8452_s9 + $0x690] ss:$8 sps:$4 sm:$0xff]  }
 0x19a   : > { %1893 = vmatprep.subr.bf16.mxu0 %v5252_v33  ;;  %v5324_v33 = vld [vmem:[%s8452_s9 + $0x6a4] ss:$8 sps:$4 sm:$0xff]  }
 0x19d   : > { %1894 = vmatpush1.bf16.msra.mxu0 %v5250_v34  ;;  %v5322_v34 = vld [vmem:[%s8452_s9 + $0x6a0] ss:$8 sps:$4 sm:$0xff]  }
 0x19e   : > { %1895 = vmatprep.subr.bf16.mxu0 %v5255_v35  ;;  %v5327_v35 = vld [vmem:[%s8452_s9 + $0x6b4] ss:$8 sps:$4 sm:$0xff]  }
 0x1a1   : > { %1896 = vmatpush1.bf16.msra.mxu0 %v5253_v36  ;;  %v5325_v36 = vld [vmem:[%s8452_s9 + $0x6b0] ss:$8 sps:$4 sm:$0xff]  }
 0x1a2   : > { %1897 = vmatprep.subr.bf16.mxu0 %v5258_v40  ;;  %v5330_v40 = vld [vmem:[%s8452_s9 + $0x6c4] ss:$8 sps:$4 sm:$0xff]  }
 0x1a5   : > { %1898 = vmatpush1.bf16.msra.mxu0 %v5256_v42  ;;  %v5328_v42 = vld [vmem:[%s8452_s9 + $0x6c0] ss:$8 sps:$4 sm:$0xff]  }
 0x1a6   : > { %1899 = vmatprep.subr.bf16.mxu0 %v5261_v43  ;;  %v5333_v43 = vld [vmem:[%s8452_s9 + $0x6d4] ss:$8 sps:$4 sm:$0xff]  }
 0x1a9   : > { %1900 = vmatpush1.bf16.msra.mxu0 %v5259_v44  ;;  %v5331_v44 = vld [vmem:[%s8452_s9 + $0x6d0] ss:$8 sps:$4 sm:$0xff]  }
 0x1aa   : > { %1901 = vmatprep.subr.bf16.mxu0 %v5264_v45  ;;  %v5336_v45 = vld [vmem:[%s8452_s9 + $0x6e4] ss:$8 sps:$4 sm:$0xff]  }
 0x1ad   : > { %1902 = vmatpush1.bf16.msra.mxu0 %v5262_v46  ;;  %v5334_v46 = vld [vmem:[%s8452_s9 + $0x6e0] ss:$8 sps:$4 sm:$0xff]  }
 0x1ae   : > { %1903 = vmatprep.subr.bf16.mxu0 %v5267_v47  ;;  %v5339_v47 = vld [vmem:[%s8452_s9 + $0x6f4] ss:$8 sps:$4 sm:$0xff]  }
 0x1b1   : > { %1904 = vmatpush1.bf16.msra.mxu0 %v5265_v49  ;;  %v6676_v49 = vpop.permute.xlu1 %2177 }
 0x1b2   : > { %1905 = vmatprep.subr.bf16.mxu0 %v5270_v50  ;;  %v1936_v50 = vmul.f32 %v6574_v7, %v6052_v38  ;;  %v5360_v7 = vld [vmem:[%s8452_s9 + $0x764] ss:$8 sps:$4 sm:$0xff]  }
 0x1b5   : > { %1906 = vmatpush1.bf16.msra.mxu0 %v5268_v51  ;;  %v5337_v51 = vld [vmem:[%s8452_s9 + $0x6f0] ss:$8 sps:$4 sm:$0xff]  }
 0x1b6   : > { %1907 = vmatprep.subr.bf16.mxu0 %v5273_v52  ;;  %v2181_v52 = vmul.f32 %v6676_v49, %v6055_v39  ;;  %v5343_v39 = vld [vmem:[%s8452_s9 + $0x710] ss:$8 sps:$4 sm:$0xff]  }
 0x1b8   : > { %v2183_v38 = vpack.c.bf16 %v2181_v52, %v2181_v52  ;;  %v5406_v52 = vld [vmem:[%s8452_s9 + $0x860] ss:$8 sps:$4 sm:$0xff]  }
 0x1b9   : > { %1908 = vmatpush1.bf16.msra.mxu0 %v5271_v53  ;;  %v5342_v53 = vld [vmem:[%s8452_s9 + $0x704] ss:$8 sps:$4 sm:$0xff]  }
 0x1ba   : > { %1909 = vmatprep.subr.bf16.mxu0 %v5276_v54  ;;  %v1938_v54 = vpack.c.bf16 %v1936_v50, %v1936_v50  ;;  %v5403_v50 = vld [vmem:[%s8452_s9 + $0x850] ss:$8 sps:$4 sm:$0xff]  }
 0x1bd   : > { %1910 = vmatpush1.bf16.msra.mxu0 %v5274_v55  ;;  %v5340_v55 = vld [vmem:[%s8452_s9 + $0x700] ss:$8 sps:$4 sm:$0xff]  }
 0x1be   : > { %1911 = vmatprep.subr.bf16.mxu0 %v5279_v56  ;;  %v5345_v56 = vld [vmem:[%s8452_s9 + $0x714] ss:$8 sps:$4 sm:$0xff]  }
 0x1c1   : > { %1912 = vmatpush1.bf16.msra.mxu0 %v5277_v57  ;;  %v5348_v57 = vld [vmem:[%s8452_s9 + $0x724] ss:$8 sps:$4 sm:$0xff]  }
 0x1c2   : > { %1913 = vmatprep.subr.bf16.mxu0 %v5282_v58  ;;  %v5346_v58 = vld [vmem:[%s8452_s9 + $0x720] ss:$8 sps:$4 sm:$0xff]  }
 0x1c5   : > { %1914 = vmatpush1.bf16.msra.mxu0 %v5280_v59  ;;  %v5351_v59 = vld [vmem:[%s8452_s9 + $0x734] ss:$8 sps:$4 sm:$0xff]  }
 0x1c6   : > { %1915 = vmatprep.subr.bf16.mxu0 %v5285_v60  ;;  %v5349_v60 = vld [vmem:[%s8452_s9 + $0x730] ss:$8 sps:$4 sm:$0xff]  }
 0x1c9   : > { %1916 = vmatpush1.bf16.msra.mxu0 %v5283_v61  ;;  %v5354_v61 = vld [vmem:[%s8452_s9 + $0x744] ss:$8 sps:$4 sm:$0xff]  }
 0x1ca   : > { %1917 = vmatprep.subr.bf16.mxu0 %v5288_v62  ;;  %v5352_v62 = vld [vmem:[%s8452_s9 + $0x740] ss:$8 sps:$4 sm:$0xff]  }
 0x1cd   : > { %1918 = vmatpush1.bf16.msra.mxu0 %v5286_v63  ;;  %v5357_v63 = vld [vmem:[%s8452_s9 + $0x754] ss:$8 sps:$4 sm:$0xff]  }
 0x1ce   : > { %1919 = vmatprep.subr.bf16.mxu0 %v5291_v2  ;;  %v5355_v2 = vld [vmem:[%s8452_s9 + $0x750] ss:$8 sps:$4 sm:$0xff]  }
 0x1d1   : > { %1920 = vmatpush1.bf16.msra.mxu0 %v5289_v9  ;;  %v5363_v9 = vld [vmem:[%s8452_s9 + $0x774] ss:$8 sps:$4 sm:$0xff]  }
 0x1d2   : > { %2133 = vmatprep.subr.bf16.mxu0 %v5294_v11  ;;  %v5366_v11 = vld [vmem:[%s8452_s9 + $0x784] ss:$8 sps:$4 sm:$0xff]  }
 0x1d4   : > { %1922 = vmatmul.mubr.bf16.vlgmr.msra.gmra.mrb[0].mxu0 %v1694_v12  ;;  %v5364_v12 = vld [vmem:[%s8452_s9 + $0x780] ss:$8 sps:$4 sm:$0xff]  }
 0x1d5   : > { %2134 = vmatpush1.bf16.msra.mxu0 %v5292_v13  ;;  %2165 = vmatprep.mubr.bf16.mxu0 %v1939_v14  ;;  %v5369_v13 = vld [vmem:[%s8452_s9 + $0x794] ss:$8 sps:$4 sm:$0xff]   ;;  %v5367_v14 = vld [vmem:[%s8452_s9 + $0x790] ss:$8 sps:$4 sm:$0xff]  }
 0x1d6   : > { %2135 = vmatprep.subr.bf16.mxu0 %v5297_v15  ;;  %v5372_v15 = vld [vmem:[%s8452_s9 + $0x7a4] ss:$8 sps:$4 sm:$0xff]  }
 0x1d9   : > { %2136 = vmatpush1.bf16.msra.mxu0 %v5295_v16  ;;  %v5370_v16 = vld [vmem:[%s8452_s9 + $0x7a0] ss:$8 sps:$4 sm:$0xff]  }
 0x1da   : > { %2137 = vmatprep.subr.bf16.mxu0 %v5300_v17  ;;  %v5375_v17 = vld [vmem:[%s8452_s9 + $0x7b4] ss:$8 sps:$4 sm:$0xff]  }
 0x1dd   : > { %2138 = vmatpush1.bf16.msra.mxu0 %v5298_v18  ;;  %v5373_v18 = vld [vmem:[%s8452_s9 + $0x7b0] ss:$8 sps:$4 sm:$0xff]  }
 0x1de   : > { %2139 = vmatprep.subr.bf16.mxu0 %v5303_v19  ;;  %v5378_v19 = vld [vmem:[%s8452_s9 + $0x7c4] ss:$8 sps:$4 sm:$0xff]  }
 0x1e1   : > { %2140 = vmatpush1.bf16.msra.mxu0 %v5301_v20  ;;  %v5376_v20 = vld [vmem:[%s8452_s9 + $0x7c0] ss:$8 sps:$4 sm:$0xff]  }
 0x1e2   : > { %2141 = vmatprep.subr.bf16.mxu0 %v5306_v21  ;;  %v5381_v21 = vld [vmem:[%s8452_s9 + $0x7d4] ss:$8 sps:$4 sm:$0xff]  }
 0x1e5   : > { %2142 = vmatpush1.bf16.msra.mxu0 %v5304_v22  ;;  %v5379_v22 = vld [vmem:[%s8452_s9 + $0x7d0] ss:$8 sps:$4 sm:$0xff]  }
 0x1e6   : > { %2143 = vmatprep.subr.bf16.mxu0 %v5309_v23  ;;  %v5384_v23 = vld [vmem:[%s8452_s9 + $0x7e4] ss:$8 sps:$4 sm:$0xff]  }
 0x1e9   : > { %2144 = vmatpush1.bf16.msra.mxu0 %v5307_v25  ;;  %v5382_v25 = vld [vmem:[%s8452_s9 + $0x7e0] ss:$8 sps:$4 sm:$0xff]  }
 0x1ea   : > { %2145 = vmatprep.subr.bf16.mxu0 %v5312_v26  ;;  %v5387_v26 = vld [vmem:[%s8452_s9 + $0x7f4] ss:$8 sps:$4 sm:$0xff]  }
 0x1ed   : > { %2146 = vmatpush1.bf16.msra.mxu0 %v5310_v27  ;;  %v6778_v27 = vpop.permute.xlu0 %2421 }
 0x1ee   : > { %2147 = vmatprep.subr.bf16.mxu0 %v5315_v28  ;;  %v6781_v28 = vld [vmem:[%s6049_s22] sm:$0xff] }
 0x1f1   : > { %2148 = vmatpush1.bf16.msra.mxu0 %v5313_v0  ;;  %v2180_v0 = vmul.f32 %v6781_v28, %v6676_v49  ;;  %v5405_v49 = vld [vmem:[%s8452_s9 + $0x854] ss:$8 sps:$4 sm:$0xff]  }
 0x1f2   : > { %2149 = vmatprep.subr.bf16.mxu0 %v5318_v30  ;;  %v5385_v30 = vld [vmem:[%s8452_s9 + $0x7f0] ss:$8 sps:$4 sm:$0xff]  }
 0x1f5   : > { %2150 = vmatpush1.bf16.msra.mxu0 %v5316_v31  ;;  %v5552_v31 = vld [vmem:[%s6049_s22 + $0x8] sm:$0xff] }
 0x1f6   : > { %2151 = vmatprep.subr.bf16.mxu0 %v5321_v32  ;;  %v2425_v32 = vmul.f32 %v5552_v31, %v6778_v27  ;;  %v5445_v31 = vld [vmem:[%s8449_s6 + $0x8] sm:$0xff]  }
 0x1f9   : > { %2152 = vmatpush1.bf16.msra.mxu0 %v5319_v5  ;;  %v5390_v5 = vld [vmem:[%s8452_s9 + $0x804] ss:$8 sps:$4 sm:$0xff]  }
 0x1fa   : > { %2153 = vmatprep.subr.bf16.mxu0 %v5324_v33  ;;  %v2182_v33 = vpack.c.bf16 %v2180_v0, %v2180_v0  ;;  %v5554_v0 = vld [vmem:[%s8452_s9 + $0x100] ss:$8 sps:$4 sm:$0xff]  }
 0x1fd   : > { %2154 = vmatpush1.bf16.msra.mxu0 %v5322_v34  ;;  %v5388_v34 = vld [vmem:[%s8452_s9 + $0x800] ss:$8 sps:$4 sm:$0xff]  }
 0x1fe   : > { %2155 = vmatprep.subr.bf16.mxu0 %v5327_v35  ;;  %v2427_v35 = vpack.c.bf16 %v2425_v32, %v2425_v32  ;;  %v5556_v32 = vld [vmem:[%s8452_s9 + $0x110] ss:$8 sps:$4 sm:$0xff]  }
 0x201   : > { %2156 = vmatpush1.bf16.msra.mxu0 %v5325_v36  ;;  %v5393_v36 = vld [vmem:[%s8452_s9 + $0x814] ss:$8 sps:$4 sm:$0xff]  }
 0x202   : > { %2157 = vmatprep.subr.bf16.mxu0 %v5330_v40  ;;  %v5391_v40 = vld [vmem:[%s8452_s9 + $0x810] ss:$8 sps:$4 sm:$0xff]  }
 0x205   : > { %2158 = vmatpush1.bf16.msra.mxu0 %v5328_v42  ;;  %v5396_v42 = vld [vmem:[%s8452_s9 + $0x824] ss:$8 sps:$4 sm:$0xff]  }
 0x206   : > { %2159 = vmatprep.subr.bf16.mxu0 %v5333_v43  ;;  %v5394_v43 = vld [vmem:[%s8452_s9 + $0x820] ss:$8 sps:$4 sm:$0xff]  }
 0x209   : > { %2160 = vmatpush1.bf16.msra.mxu0 %v5331_v44  ;;  %v5399_v44 = vld [vmem:[%s8452_s9 + $0x834] ss:$8 sps:$4 sm:$0xff]  }
 0x20a   : > { %2161 = vmatprep.subr.bf16.mxu0 %v5336_v45  ;;  %v5397_v45 = vld [vmem:[%s8452_s9 + $0x830] ss:$8 sps:$4 sm:$0xff]  }
 0x20d   : > { %2162 = vmatpush1.bf16.msra.mxu0 %v5334_v46  ;;  %v5402_v46 = vld [vmem:[%s8452_s9 + $0x844] ss:$8 sps:$4 sm:$0xff]  }
 0x20e   : > { %2163 = vmatprep.subr.bf16.mxu0 %v5339_v47  ;;  %v5400_v47 = vld [vmem:[%s8452_s9 + $0x840] ss:$8 sps:$4 sm:$0xff]  }
 0x211   : > { %2164 = vmatpush1.bf16.msra.mxu0 %v5337_v51  ;;  %v5408_v51 = vld [vmem:[%s8452_s9 + $0x864] ss:$8 sps:$4 sm:$0xff]  }
 0x212   : > { %2377 = vmatprep.subr.bf16.mxu0 %v5342_v53  ;;  %v5411_v53 = vld [vmem:[%s8452_s9 + $0x874] ss:$8 sps:$4 sm:$0xff]  }
 0x214   : > { %2166 = vmatmul.mubr.bf16.vlgmr.msra.gmra.mrb[0].mxu0 %v1938_v54  ;;  %v5409_v54 = vld [vmem:[%s8452_s9 + $0x870] ss:$8 sps:$4 sm:$0xff]  }
 0x215   : > { %2378 = vmatpush1.bf16.msra.mxu0 %v5340_v55  ;;  %2409 = vmatprep.mubr.bf16.mxu0 %v2183_v38  ;;  %v5414_v55 = vld [vmem:[%s8452_s9 + $0x884] ss:$8 sps:$4 sm:$0xff]   ;;  %v5412_v38 = vld [vmem:[%s8452_s9 + $0x880] ss:$8 sps:$4 sm:$0xff]  }
 0x216   : > { %2379 = vmatprep.subr.bf16.mxu0 %v5345_v56  ;;  %v5417_v56 = vld [vmem:[%s8452_s9 + $0x894] ss:$8 sps:$4 sm:$0xff]  }
 0x219   : > { %2380 = vmatpush1.bf16.msra.mxu0 %v5343_v39  ;;  %v5415_v39 = vld [vmem:[%s8452_s9 + $0x890] ss:$8 sps:$4 sm:$0xff]  }
 0x21a   : > { %2381 = vmatprep.subr.bf16.mxu0 %v5348_v57  ;;  %v5420_v57 = vld [vmem:[%s8452_s9 + $0x8a4] ss:$8 sps:$4 sm:$0xff]  }
 0x21d   : > { %2382 = vmatpush1.bf16.msra.mxu0 %v5346_v58  ;;  %v5418_v58 = vld [vmem:[%s8452_s9 + $0x8a0] ss:$8 sps:$4 sm:$0xff]  }
 0x21e   : > { %2383 = vmatprep.subr.bf16.mxu0 %v5351_v59  ;;  %v5423_v59 = vld [vmem:[%s8452_s9 + $0x8b4] ss:$8 sps:$4 sm:$0xff]  }
 0x221   : > { %2384 = vmatpush1.bf16.msra.mxu0 %v5349_v60  ;;  %v5421_v60 = vld [vmem:[%s8452_s9 + $0x8b0] ss:$8 sps:$4 sm:$0xff]  }
 0x222   : > { %2385 = vmatprep.subr.bf16.mxu0 %v5354_v61  ;;  %v5426_v61 = vld [vmem:[%s8452_s9 + $0x8c4] ss:$8 sps:$4 sm:$0xff]  }
 0x225   : > { %2386 = vmatpush1.bf16.msra.mxu0 %v5352_v62  ;;  %v5424_v62 = vld [vmem:[%s8452_s9 + $0x8c0] ss:$8 sps:$4 sm:$0xff]  }
 0x226   : > { %2387 = vmatprep.subr.bf16.mxu0 %v5357_v63  ;;  %v5429_v63 = vld [vmem:[%s8452_s9 + $0x8d4] ss:$8 sps:$4 sm:$0xff]  }
 0x229   : > { %2388 = vmatpush1.bf16.msra.mxu0 %v5355_v2  ;;  %v5427_v2 = vld [vmem:[%s8452_s9 + $0x8d0] ss:$8 sps:$4 sm:$0xff]  }
 0x22a   : > { %2389 = vmatprep.subr.bf16.mxu0 %v5360_v7  ;;  %v5432_v7 = vld [vmem:[%s8452_s9 + $0x8e4] ss:$8 sps:$4 sm:$0xff]  }
 0x22d   : > { %2390 = vmatpush1.bf16.msra.mxu0 %v5358_v8  ;;  %v5430_v8 = vld [vmem:[%s8452_s9 + $0x8e0] ss:$8 sps:$4 sm:$0xff]  }
 0x22e   : > { %2391 = vmatprep.subr.bf16.mxu0 %v5363_v9  ;;  %v5435_v9 = vld [vmem:[%s8452_s9 + $0x8f4] ss:$8 sps:$4 sm:$0xff]  }
 0x231   : > { %2392 = vmatpush1.bf16.msra.mxu0 %v5361_v10  ;;  %v2424_v10 = vmul.f32 %v6781_v28, %v6778_v27  ;;  %v5553_v27 = vld [vmem:[%s8452_s9 + $0x104] ss:$8 sps:$4 sm:$0xff]  }
 0x232   : > { %2393 = vmatprep.subr.bf16.mxu0 %v5366_v11  ;;  %v5433_v11 = vld [vmem:[%s8452_s9 + $0x8f0] ss:$8 sps:$4 sm:$0xff]   ;;  %v5444_v28 = vld [vmem:[%s8449_s6] sm:$0xff]  }
 0x235   : > { %2394 = vmatpush1.bf16.msra.mxu0 %v5364_v12  ;;  %v2426_v12 = vpack.c.bf16 %v2424_v10, %v2424_v10 }
 0x236   : > { %2395 = vmatprep.subr.bf16.mxu0 %v5369_v13  ;;  %v454_v13 = vld [vmem:[%s8450_s7] sm:$0xff] }
 0x237   : > { %2835 = vperm.xlu1 %4983, %v454_v13  }
 0x239   : > { %2396 = vmatpush1.bf16.msra.mxu0 %v5367_v14  ;;  %v455_v14 = vld [vmem:[%s8450_s7 + $0x8] sm:$0xff] }
 0x23a   : > { %2397 = vmatprep.subr.bf16.mxu0 %v5372_v15  ;;  %v443_v15 = vld [vmem:[%s8447_s4 + $0x8] sm:$0xff] }
 0x23b   : > { %2840 = vperm.xlu1 %4983, %v455_v14  }
 0x23d   : > { %2398 = vmatpush1.bf16.msra.mxu0 %v5370_v16  ;;  %v456_v16 = vld [vmem:[%s8450_s7 + $0x10] sm:$0xff] }
 0x23e   : > { %2399 = vmatprep.subr.bf16.mxu0 %v5375_v17  ;;  %v444_v17 = vld [vmem:[%s8447_s4 + $0x10] sm:$0xff] }
 0x23f   : > { %4985 = vset.pattern.permute.xlu1 %v5849_v1 }
 0x240   : > { %2898 = vperm.xlu1 %4985, %v443_v15  }
 0x241   : > { %2400 = vmatpush1.bf16.msra.mxu0 %v5373_v18  ;;  %v445_v18 = vld [vmem:[%s8447_s4 + $0x18] sm:$0xff] }
 0x242   : > { %2401 = vmatprep.subr.bf16.mxu0 %v5378_v19  ;;  %v442_v19 = vld [vmem:[%s8447_s4] sm:$0xff] }
 0x243   : > { %2894 = vperm.xlu0 %4984, %v442_v19  }
 0x244   : > { %4986 = vset.pattern.permute.xlu1 %v8455_v6 }
 0x245   : > { %2402 = vmatpush1.bf16.msra.mxu0 %v5376_v20  ;;  %2845 = vperm.xlu1 %4986, %v456_v16   ;;  %v457_v20 = vld [vmem:[%s8450_s7 + $0x18] sm:$0xff] }
 0x246   : > { %2403 = vmatprep.subr.bf16.mxu0 %v5381_v21 }
 0x247   : > { %4987 = vset.pattern.permute.xlu0 %v8455_v6 }
 0x248   : > { %2850 = vperm.xlu0 %4987, %v457_v20  }
 0x249   : > { %2404 = vmatpush1.bf16.msra.mxu0 %v5379_v22  ;;  %4988 = vset.pattern.permute.xlu1 %v5849_v1 }
 0x24a   : > { %2405 = vmatprep.subr.bf16.mxu0 %v5384_v23  ;;  %2902 = vperm.xlu1 %4988, %v444_v17   ;;  %v5443_v23 = vld [vmem:[%s6896_s24 + $0x14] ss:$8 sps:$4 sm:$0xff]  }
 0x24c   : > { %2863 = vperm.xlu0 %4987, %v442_v19  }
 0x24d   : > { %2406 = vmatpush1.bf16.msra.mxu0 %v5382_v25  ;;  %v5441_v25 = vld [vmem:[%s6896_s24 + $0x10] ss:$8 sps:$4 sm:$0xff]  }
 0x24e   : > { %2407 = vmatprep.subr.bf16.mxu0 %v5387_v26  ;;  %2906 = vperm.xlu1 %4988, %v445_v18   ;;  %v5440_v26 = vld [vmem:[%s8448_s5 + $0x8] sm:$0xff]  }
 0x250   : > { %2873 = vperm.xlu0 %4987, %v444_v17  }
 0x251   : > { %2408 = vmatpush1.bf16.msra.mxu0 %v5385_v30  ;;  %v5555_v30 = vld [vmem:[%s8452_s9 + $0x114] ss:$8 sps:$4 sm:$0xff]  }
 0x252   : > { %2621 = vmatprep.subr.bf16.mxu0 %v5390_v5  ;;  %4989 = vset.pattern.permute.xlu1 %v8455_v6  ;;  %v5557_v5 = vld [vmem:[%s8452_s9 + $0x124] ss:$8 sps:$4 sm:$0xff]  }
 0x253   : > { %2868 = vperm.xlu1 %4989, %v443_v15  }
 0x254   : > { %2410 = vmatmul.mubr.bf16.vlgmr.msra.gmra.mrb[0].mxu0 %v2182_v33  ;;  %4990 = vset.pattern.permute.xlu0 %v5850_v4  ;;  %v5558_v33 = vld [vmem:[%s8452_s9 + $0x120] ss:$8 sps:$4 sm:$0xff]  }
 0x255   : > { %2622 = vmatpush1.bf16.msra.mxu0 %v5388_v34  ;;  %2653 = vmatprep.mubr.bf16.mxu0 %v2427_v35  ;;  %v5559_v34 = vld [vmem:[%s8452_s9 + $0x134] ss:$8 sps:$4 sm:$0xff]   ;;  %v5560_v35 = vld [vmem:[%s8452_s9 + $0x130] ss:$8 sps:$4 sm:$0xff]  }
 0x256   : > { %2623 = vmatprep.subr.bf16.mxu0 %v5393_v36  ;;  %3028 = vperm.xlu0 %4990, %v442_v19   ;;  %v5561_v36 = vld [vmem:[%s8452_s9 + $0x144] ss:$8 sps:$4 sm:$0xff]  }
 0x257   : > { %2878 = vperm.xlu1 %4989, %v445_v18  }
 0x259   : > { %2624 = vmatpush1.bf16.msra.mxu0 %v5391_v40  ;;  %v5562_v40 = vld [vmem:[%s8452_s9 + $0x140] ss:$8 sps:$4 sm:$0xff]  }
 0x25a   : > { %2625 = vmatprep.subr.bf16.mxu0 %v5396_v42  ;;  %3040 = vperm.xlu0 %4990, %v445_v18   ;;  %v5563_v42 = vld [vmem:[%s8452_s9 + $0x154] ss:$8 sps:$4 sm:$0xff]  }
 0x25b   : > { %4991 = vset.pattern.permute.xlu1 %v5850_v4 }
 0x25c   : > { %3032 = vperm.xlu1 %4991, %v443_v15  }
 0x25d   : > { %2626 = vmatpush1.bf16.msra.mxu0 %v5394_v43  ;;  %v5564_v43 = vld [vmem:[%s8452_s9 + $0x150] ss:$8 sps:$4 sm:$0xff]  }
 0x25e   : > { %2627 = vmatprep.subr.bf16.mxu0 %v5399_v44  ;;  %4993 = vset.pattern.permute.xlu0 %v5852_v37  ;;  %v5565_v44 = vld [vmem:[%s8452_s9 + $0x164] ss:$8 sps:$4 sm:$0xff]  }
 0x25f   : > { %3121 = vperm.xlu0 %4993, %v443_v15  }
 0x260   : > { %3036 = vperm.xlu1 %4991, %v444_v17  }
 0x261   : > { %2628 = vmatpush1.bf16.msra.mxu0 %v5397_v45  ;;  %v5566_v45 = vld [vmem:[%s8452_s9 + $0x160] ss:$8 sps:$4 sm:$0xff]  }
 0x262   : > { %2629 = vmatprep.subr.bf16.mxu0 %v5402_v46  ;;  %v5567_v46 = vld [vmem:[%s8452_s9 + $0x174] ss:$8 sps:$4 sm:$0xff]  }
 0x263   : > { %4994 = vset.pattern.permute.xlu0 %v5853_v41 }
 0x264   : > { %4992 = vset.pattern.permute.xlu1 %v5852_v37  ;;  %3206 = vperm.xlu0 %4994, %v442_v19  }
 0x265   : > { %2630 = vmatpush1.bf16.msra.mxu0 %v5400_v47  ;;  %3117 = vperm.xlu1 %4992, %v442_v19   ;;  %v5568_v47 = vld [vmem:[%s8452_s9 + $0x170] ss:$8 sps:$4 sm:$0xff]  }
 0x266   : > { %2631 = vmatprep.subr.bf16.mxu0 %v5405_v49  ;;  %v5569_v49 = vld [vmem:[%s8452_s9 + $0x184] ss:$8 sps:$4 sm:$0xff]  }
 0x268   : > { %3218 = vperm.xlu0 %4994, %v445_v18  }
 0x269   : > { %2632 = vmatpush1.bf16.msra.mxu0 %v5403_v50  ;;  %3125 = vperm.xlu1 %4992, %v444_v17   ;;  %v5570_v50 = vld [vmem:[%s8452_s9 + $0x180] ss:$8 sps:$4 sm:$0xff]  }
 0x26a   : > { %2633 = vmatprep.subr.bf16.mxu0 %v5408_v51  ;;  %v5571_v51 = vld [vmem:[%s8452_s9 + $0x194] ss:$8 sps:$4 sm:$0xff]  }
 0x26c   : > { %4997 = vset.pattern.permute.xlu0 %v5854_v24 }
 0x26d   : > { %2634 = vmatpush1.bf16.msra.mxu0 %v5406_v52  ;;  %3129 = vperm.xlu1 %4992, %v445_v18   ;;  %v5572_v52 = vld [vmem:[%s8452_s9 + $0x190] ss:$8 sps:$4 sm:$0xff]  }
 0x26e   : > { %2635 = vmatprep.subr.bf16.mxu0 %v5411_v53  ;;  %3299 = vperm.xlu0 %4997, %v443_v15   ;;  %v5573_v53 = vld [vmem:[%s8452_s9 + $0x1a4] ss:$8 sps:$4 sm:$0xff]  }
 0x271   : > { %2636 = vmatpush1.bf16.msra.mxu0 %v5409_v54  ;;  %4995 = vset.pattern.permute.xlu1 %v5853_v41  ;;  %v5574_v54 = vld [vmem:[%s8452_s9 + $0x1a0] ss:$8 sps:$4 sm:$0xff]  }
 0x272   : > { %2637 = vmatprep.subr.bf16.mxu0 %v5414_v55  ;;  %3210 = vperm.xlu1 %4995, %v443_v15   ;;  %v5575_v55 = vld [vmem:[%s8452_s9 + $0x1b4] ss:$8 sps:$4 sm:$0xff]  }
 0x273   : > { %4998 = vset.pattern.permute.xlu0 %v5855_v3 }
 0x274   : > { %3384 = vperm.xlu0 %4998, %v442_v19  }
 0x275   : > { %2638 = vmatpush1.bf16.msra.mxu0 %v5412_v38  ;;  %v5576_v38 = vld [vmem:[%s8452_s9 + $0x1b0] ss:$8 sps:$4 sm:$0xff]  }
 0x276   : > { %2639 = vmatprep.subr.bf16.mxu0 %v5417_v56  ;;  %3214 = vperm.xlu1 %4995, %v444_v17   ;;  %v5577_v56 = vld [vmem:[%s8452_s9 + $0x1c4] ss:$8 sps:$4 sm:$0xff]  }
 0x278   : > { %3396 = vperm.xlu0 %4998, %v445_v18  }
 0x279   : > { %2640 = vmatpush1.bf16.msra.mxu0 %v5415_v39  ;;  %v5578_v39 = vld [vmem:[%s8452_s9 + $0x1c0] ss:$8 sps:$4 sm:$0xff]  }
 0x27a   : > { %2641 = vmatprep.subr.bf16.mxu0 %v5420_v57  ;;  %4996 = vset.pattern.permute.xlu1 %v5854_v24  ;;  %v5579_v57 = vld [vmem:[%s8452_s9 + $0x1d4] ss:$8 sps:$4 sm:$0xff]  }
 0x27b   : > { %3295 = vperm.xlu1 %4996, %v442_v19  }
 0x27c   : > { %5001 = vset.pattern.permute.xlu0 %v5856_v48 }
 0x27d   : > { %2642 = vmatpush1.bf16.msra.mxu0 %v5418_v58  ;;  %3477 = vperm.xlu0 %5001, %v443_v15   ;;  %v5580_v58 = vld [vmem:[%s8452_s9 + $0x1d0] ss:$8 sps:$4 sm:$0xff]  }
 0x27e   : > { %2643 = vmatprep.subr.bf16.mxu0 %v5423_v59  ;;  %v5581_v59 = vld [vmem:[%s8452_s9 + $0x1e4] ss:$8 sps:$4 sm:$0xff]  }
 0x27f   : > { %3303 = vperm.xlu1 %4996, %v444_v17  }
 0x281   : > { %2644 = vmatpush1.bf16.msra.mxu0 %v5421_v60  ;;  %5002 = vset.pattern.permute.xlu0 %v5857_v29  ;;  %v5582_v60 = vld [vmem:[%s8452_s9 + $0x1e0] ss:$8 sps:$4 sm:$0xff]  }
 0x282   : > { %2645 = vmatprep.subr.bf16.mxu0 %v5426_v61  ;;  %3562 = vperm.xlu0 %5002, %v442_v19   ;;  %v5583_v61 = vld [vmem:[%s8452_s9 + $0x1f4] ss:$8 sps:$4 sm:$0xff]  }
 0x283   : > { %3307 = vperm.xlu1 %4996, %v445_v18  }
 0x285   : > { %2646 = vmatpush1.bf16.msra.mxu0 %v5424_v62  ;;  %v5584_v62 = vld [vmem:[%s8452_s9 + $0x1f0] ss:$8 sps:$4 sm:$0xff]  }
 0x286   : > { %2647 = vmatprep.subr.bf16.mxu0 %v5429_v63  ;;  %3574 = vperm.xlu0 %5002, %v445_v18   ;;  %v5585_v63 = vld [vmem:[%s8452_s9 + $0x4] ss:$8 sps:$4 sm:$0xff]  }
 0x287   : > { %4999 = vset.pattern.permute.xlu1 %v5855_v3  ;;  %v5439_v3 = vld [vmem:[%s6896_s24 + $0x4] ss:$8 sps:$4 sm:$0xff]  }
 0x288   : > { %3388 = vperm.xlu1 %4999, %v443_v15  }
 0x289   : > { %2648 = vmatpush1.bf16.msra.mxu0 %v5427_v2 }
 0x28a   : > { %2649 = vmatprep.subr.bf16.mxu0 %v5432_v7 }
 0x28c   : > { %3392 = vperm.xlu1 %4999, %v444_v17  }
 0x28d   : > { %2650 = vmatpush1.bf16.msra.mxu0 %v5430_v8 }
 0x28e   : > { %2651 = vmatprep.subr.bf16.mxu0 %v5435_v9 }
 0x290   : > { %5000 = vset.pattern.permute.xlu1 %v5856_v48  ;;  %v5436_v48 = vld [vmem:[%s8448_s5] sm:$0xff]  }
 0x291   : > { %2652 = vmatpush1.bf16.msra.mxu0 %v5433_v11  ;;  %3473 = vperm.xlu1 %5000, %v442_v19  }
 0x294   : > { %2654 = vmatmul.mubr.bf16.vlgmr.msra.gmra.mrb[0].mxu0 %v2426_v12 }
 0x295   : > { %3706 = vmatprep.mubr.bf16.mxu0 %v8455_v6  ;;  %3481 = vperm.xlu1 %5000, %v444_v17  }
 0x299   : > { %3485 = vperm.xlu1 %5000, %v445_v18  }
 0x29d   : > { %5003 = vset.pattern.permute.xlu1 %v5857_v29  ;;  %v5437_v29 = vld [vmem:[%s6896_s24] ss:$8 sps:$4 sm:$0xff]  }
 0x29e   : > { %3566 = vperm.xlu1 %5003, %v443_v15  }
 0x2a2   : > { %3570 = vperm.xlu1 %5003, %v444_v17  }
 0x2b6   : > { %v2836_v2 = vpop.permute.xlu1 %2835 }
 0x2ba   : > { %v2841_v7 = vpop.permute.xlu1 %2840 }
 0x2bf   : > { %v2899_v8 = vpop.permute.xlu1 %2898 }
 0x2c2   : > { %v2895_v16 = vpop.permute.xlu0 %2894 }
 0x2c4   : > { %v7058_v9 = vpop.permute.xlu1 %2845 }
 0x2c7   : > { %v7072_v18 = vpop.permute.xlu0 %2850 }
 0x2c9   : > { %v7060_v10 = vpop.permute.xlu1 %2902 }
 0x2cb   : > { %v2864_v20 = vpop.permute.xlu0 %2863 }
 0x2cd   : > { %v7062_v11 = vpop.permute.xlu1 %2906 }
 0x2d2   : > { %v2869_v12 = vpop.permute.xlu1 %2868 }
 0x2d6   : > { %v7064_v13 = vpop.permute.xlu1 %2878 }
 0x2db   : > { %v7066_v14 = vpop.permute.xlu1 %3032 }
 0x2df   : > { %v7068_v15 = vpop.permute.xlu1 %3036 }
 0x2e4   : > { %v7070_v17 = vpop.permute.xlu1 %3117 }
 0x2e8   : > { %v7074_v19 = vpop.permute.xlu1 %3125 }
 0x367   : > { %v2655_v1 = vpop.f32.mrb[0].mxu0 }
 0x368   : > { %v2664_v4 = vpack.c.bf16 %v2655_v1, %v2655_v1  ;;  %v2657_v37 = vpop.f32.mrb[1].mxu0  ;;  %v7076_v1 = vpop.permute.xlu1 %3129 }
 0x369   : > { %v2665_v41 = vpack.c.bf16 %v2657_v37, %v2657_v37  ;;  %v2659_v24 = vpop.f32.mrb[2].mxu0 }
 0x36a   : > { %v2660_v21 = vpop.f32.mrb[3].mxu0  ;;  %v2685_v22 = vsel %vm2683_vm0, %v2664_v4, 0  ;;  %v7078_v4 = vpop.permute.xlu0 %2873 }
 0x36b   : > { %4819 = vmatprep.subr.msk.bf16.mxu1 %vm2683_vm0, %v2665_v41 }
 0x36c   : > { %2691 = vmatpush1.bf16.msra.mxu1 %v2685_v22  ;;  %v7080_v37 = vpop.permute.xlu1 %3210 }
 0x36d   : > { %2780 = vmatprep.subr.bf16.mxu1 %v5439_v3 }
 0x36e   : > { %v3029_v41 = vpop.permute.xlu0 %3028 }
 0x36f   : > { %4820 = vmatmul.mubr.msk.bf16.vlgmr.msra.gmra.mrb[0].mxu1 %vm2676_vm1, %v5436_v48 }
 0x370   : > { %2781 = vmatpush1.bf16.msra.mxu1 %v5437_v29  ;;  %2732 = vmatprep.mubr.bf16.mxu1 %v8455_v6  ;;  %v7082_v24 = vpop.permute.xlu1 %3214 }
 0x371   : > { %2782 = vmatprep.subr.bf16.mxu1 %v5443_v23 }
 0x372   : > { %v7084_v3 = vpop.permute.xlu0 %3040 }
 0x374   : > { %2783 = vmatpush1.bf16.msra.mxu1 %v5441_v25  ;;  %v7086_v21 = vpop.permute.xlu1 %3295 }
 0x375   : > { %2921 = vmatprep.subr.bf16.mxu1 %v5553_v27 }
 0x376   : > { %v3122_v22 = vpop.permute.xlu0 %3121 }
 0x377   : > { %4821 = vmatmul.mubr.msk.bf16.gmra.mrb[4].mxu1 %vm2676_vm1, %v5440_v26 }
 0x378   : > { %2812 = vmatprep.mubr.bf16.mxu1 %v8455_v6  ;;  %v7088_v48 = vpop.permute.xlu1 %3303 }
 0x37a   : > { %v7090_v29 = vpop.permute.xlu0 %3206 }
 0x37c   : > { %v7092_v23 = vpop.permute.xlu1 %3307 }
 0x37e   : > { %v7094_v25 = vpop.permute.xlu0 %3218 }
 0x37f   : > { %4828 = vmatmul.mubr.msk.bf16.vlgmr.msra.gmra.mrb[0].mxu1 %vm2773_vm2, %v5444_v28 }
 0x380   : > { %2822 = vmatprep.mubr.bf16.mxu1 %v8455_v6  ;;  %2922 = vmatpush1.bf16.msra.mxu1 %v5554_v0  ;;  %v7096_v26 = vpop.permute.xlu1 %3388 }
 0x381   : > { %2923 = vmatprep.subr.bf16.mxu1 %v5555_v30 }
 0x382   : > { %v7098_v27 = vpop.permute.xlu0 %3299 }
 0x384   : > { %2924 = vmatpush1.bf16.msra.mxu1 %v5556_v32  ;;  %v7100_v28 = vpop.permute.xlu1 %3392 }
 0x385   : > { %2925 = vmatprep.subr.bf16.mxu1 %v5557_v5 }
 0x386   : > { %v7102_v0 = vpop.permute.xlu0 %3384 }
 0x387   : > { %4829 = vmatmul.mubr.msk.bf16.gmra.mrb[4].mxu1 %vm2773_vm2, %v5445_v31 }
 0x388   : > { %2926 = vmatpush1.bf16.msra.mxu1 %v5558_v33  ;;  %v7104_v30 = vpop.permute.xlu1 %3473 }
 0x389   : > { %2927 = vmatprep.subr.bf16.mxu1 %v5559_v34 }
 0x38a   : > { %v7106_v31 = vpop.permute.xlu0 %3396 }
 0x38c   : > { %2928 = vmatpush1.bf16.msra.mxu1 %v5560_v35  ;;  %v7108_v32 = vpop.permute.xlu1 %3481 }
 0x38d   : > { %2929 = vmatprep.subr.bf16.mxu1 %v5561_v36 }
 0x38e   : > { %v7110_v5 = vpop.permute.xlu0 %3477 }
 0x390   : > { %2930 = vmatpush1.bf16.msra.mxu1 %v5562_v40  ;;  %v7112_v33 = vpop.permute.xlu1 %3485 }
 0x391   : > { %2931 = vmatprep.subr.bf16.mxu1 %v5563_v42 }
 0x392   : > { %v3563_v35 = vpop.permute.xlu0 %3562 }
 0x394   : > { %2932 = vmatpush1.bf16.msra.mxu1 %v5564_v43 }
 0x395   : > { %2933 = vmatprep.subr.bf16.mxu1 %v5565_v44  ;;  %v3567_v44 = vpop.permute.xlu1 %3566 }
 0x398   : > { %2934 = vmatpush1.bf16.msra.mxu1 %v5566_v45 }
 0x399   : > { %2935 = vmatprep.subr.bf16.mxu1 %v5567_v46 }
 0x39c   : > { %2936 = vmatpush1.bf16.msra.mxu1 %v5568_v47 }
 0x39d   : > { %2937 = vmatprep.subr.bf16.mxu1 %v5569_v49 }
 0x3a0   : > { %2938 = vmatpush1.bf16.msra.mxu1 %v5570_v50 }
 0x3a1   : > { %2939 = vmatprep.subr.bf16.mxu1 %v5571_v51 }
 0x3a4   : > { %2940 = vmatpush1.bf16.msra.mxu1 %v5572_v52 }
 0x3a5   : > { %2941 = vmatprep.subr.bf16.mxu1 %v5573_v53 }
 0x3a8   : > { %2942 = vmatpush1.bf16.msra.mxu1 %v5574_v54 }
 0x3a9   : > { %2943 = vmatprep.subr.bf16.mxu1 %v5575_v55 }
 0x3ac   : > { %2944 = vmatpush1.bf16.msra.mxu1 %v5576_v38 }
 0x3ad   : > { %2945 = vmatprep.subr.bf16.mxu1 %v5577_v56 }
 0x3b0   : > { %2946 = vmatpush1.bf16.msra.mxu1 %v5578_v39 }
 0x3b1   : > { %2947 = vmatprep.subr.bf16.mxu1 %v5579_v57 }
 0x3b4   : > { %2948 = vmatpush1.bf16.msra.mxu1 %v5580_v58 }
 0x3b5   : > { %2949 = vmatprep.subr.bf16.mxu1 %v5581_v59 }
 0x3b8   : > { %2950 = vmatpush1.bf16.msra.mxu1 %v5582_v60 }
 0x3b9   : > { %2951 = vmatprep.subr.bf16.mxu1 %v5583_v61 }
 0x3bc   : > { %2952 = vmatpush1.bf16.msra.mxu1 %v5584_v62 }
 0x3bd   : > { %2974 = vmatprep.subr.bf16.mxu1 %v5585_v63 }
 0x452   : > { %v2814_v34 = vpop.f32.mrb[0].mxu1 }
 0x453   : > { %v7114_v36 = vadd.f32 %v2836_v2, %v2814_v34  ;;  %v2816_v40 = vpop.f32.mrb[1].mxu1 }
 0x454   : > { %v7116_v42 = vadd.f32 %v2836_v2, %v2816_v40  ;;  %v2818_v43 = vpop.f32.mrb[2].mxu1 }
 0x455   : > { %v7119_v45 = vmul.f32 %v3563_v35, %v7114_v36  ;;  %v7121_v46 = vadd.f32 %v2841_v7, %v2818_v43  ;;  %v2820_v47 = vpop.f32.mrb[3].mxu1  ;;  %v2909_v49 = vmul.f32 %v2895_v16, %v7114_v36  ;;  %v7125_v50 = vmul.f32 %v2864_v20, %v7114_v36 }
 0x456   : > { %v7128_v51 = vmul.f32 %v3563_v35, %v7116_v42  ;;  %v7130_v52 = vadd.f32 %v2841_v7, %v2820_v47  ;;  %v2910_v53 = vmul.f32 %v2895_v16, %v7116_v42  ;;  %v7134_v54 = vmul.f32 %v2864_v20, %v7116_v42 }
 0x457   : > { %8465 = vst [vmem:[#allocation2_spill] sm:$0xff] %v7119_v45  ;;  %v7137_v55 = vmul.f32 %v3567_v44, %v7121_v46  ;;  %v2911_v38 = vmul.f32 %v2899_v8, %v7121_v46  ;;  %v7141_v56 = vmul.f32 %v2869_v12, %v7121_v46  ;;  %v7144_v39 = vmul.f32 %v3029_v41, %v7116_v42 }
 0x458   : > { %8466 = vst [vmem:[#allocation3_spill] sm:$0xff] %v7128_v51  ;;  %v7147_v57 = vmul.f32 %v3567_v44, %v7130_v52  ;;  %v2912_v58 = vmul.f32 %v2899_v8, %v7130_v52  ;;  %v7151_v59 = vmul.f32 %v2869_v12, %v7130_v52  ;;  %v7155_v60 = vmul.f32 %v7066_v14, %v7130_v52  ;;  %v3571_v12 = vpop.permute.xlu1 %3570 }
 0x459   : > { %8467 = vst [vmem:[#allocation4_spill] sm:$0xff] %v7137_v55  ;;  %v2917_v62 = vpack.c.bf16 %v2911_v38, %v2909_v49  ;;  %v7162_v2 = vmul.f32 %v3029_v41, %v7114_v36  ;;  %v7175_v41 = vmul.f32 %v7066_v14, %v7121_v46  ;;  %v7179_v43 = vmul.f32 %v7070_v17, %v7116_v42 }
 0x45a   : > { %8468 = vst [vmem:[#allocation5_spill] sm:$0xff] %v7147_v57  ;;  %v2824_v8 = vpop.f32.mrb[4].mxu1  ;;  %v2918_v16 = vpack.c.bf16 %v2912_v58, %v2910_v53  ;;  %v7182_v44 = vmul.f32 %v3122_v22, %v7130_v52  ;;  %v3575_v53 = vpop.permute.xlu0 %3574  ;;  %v7189_v38 = vmul.f32 %v7070_v17, %v7114_v36  ;;  %v7192_v14 = vmul.f32 %v3122_v22, %v7121_v46  ;;  %v5595_v57 = vld [vmem:[%s8452_s9 + $0x54] ss:$8 sps:$4 sm:$0xff]  }
 0x45b   : > { %v7171_v35 = vadd.f32 %v7058_v9, %v2824_v8  ;;  %v2826_v40 = vpop.f32.mrb[5].mxu1  ;;  %v7196_v58 = vmul.f32 %v7090_v29, %v7116_v42  ;;  %v7438_v51 = vmul.f32 %v7104_v30, %v7116_v42 }
 0x45c   : > { %v7185_v47 = vadd.f32 %v7058_v9, %v2826_v40  ;;  %v2828_v49 = vpop.f32.mrb[6].mxu1  ;;  %2953 = vmatprep.mubr.bf16.mxu1 %v2918_v16 }
 0x45d   : > { %v7199_v8 = vmul.f32 %v3571_v12, %v7171_v35  ;;  %v7202_v9 = vadd.f32 %v7072_v18, %v2828_v49  ;;  %v2830_v40 = vpop.f32.mrb[7].mxu1  ;;  %2954 = vmatmul.mubr.bf16.vlgmr.msra.gmra.mrb[8].mxu1 %v2917_v62  ;;  %v2913_v16 = vmul.f32 %v7060_v10, %v7171_v35  ;;  %v7208_v17 = vmul.f32 %v7078_v4, %v7171_v35  ;;  %v5586_v49 = vld [vmem:[%s8452_s9] ss:$8 sps:$4 sm:$0xff]  }
 0x45e   : > { %v7211_v22 = vmul.f32 %v3571_v12, %v7185_v47  ;;  %v7214_v6 = vadd.f32 %v7072_v18, %v2830_v40  ;;  %2975 = vmatpush1.bf16.msra.mxu1 %v5586_v49  ;;  %v2914_v62 = vmul.f32 %v7060_v10, %v7185_v47  ;;  %v7223_v61 = vmul.f32 %v7078_v4, %v7185_v47  ;;  %v5587_v18 = vld [vmem:[%s8452_s9 + $0x14] ss:$8 sps:$4 sm:$0xff]  }
 0x45f   : > { %8469 = vst [vmem:[#allocation6_spill] sm:$0xff] %v7199_v8  ;;  %v7226_v7 = vmul.f32 %v3575_v53, %v7202_v9  ;;  %2976 = vmatprep.subr.bf16.mxu1 %v5587_v18  ;;  %v2915_v12 = vmul.f32 %v7062_v11, %v7202_v9  ;;  %v7235_v40 = vmul.f32 %v7064_v13, %v7202_v9 }
 0x460   : > { %8470 = vst [vmem:[#allocation7_spill] sm:$0xff] %v7211_v22  ;;  %v7240_v4 = vmul.f32 %v3575_v53, %v7214_v6  ;;  %v2916_v49 = vmul.f32 %v7062_v11, %v7214_v6  ;;  %v7246_v34 = vmul.f32 %v7064_v13, %v7214_v6  ;;  %v7250_v18 = vmul.f32 %v7068_v15, %v7185_v47  ;;  %v5588_v13 = vld [vmem:[%s8452_s9 + $0x10] ss:$8 sps:$4 sm:$0xff]   ;;  %v5593_v22 = vld [vmem:[%s8452_s9 + $0x44] ss:$8 sps:$4 sm:$0xff]  }
 0x461   : > { %8471 = vst [vmem:[#allocation8_spill] sm:$0xff] %v7226_v7  ;;  %v2919_v20 = vpack.c.bf16 %v2915_v12, %v2913_v16  ;;  %v7258_v53 = vmul.f32 %v7084_v3, %v7214_v6  ;;  %v7269_v16 = vmul.f32 %v7068_v15, %v7171_v35  ;;  %v5589_v12 = vld [vmem:[%s8452_s9 + $0x24] ss:$8 sps:$4 sm:$0xff]   ;;  %v7278_v10 = vmul.f32 %v7084_v3, %v7202_v9 }
 0x462   : > { %8472 = vst [vmem:[#allocation9_spill] sm:$0xff] %v7240_v4  ;;  %2977 = vmatpush1.bf16.msra.mxu1 %v5588_v13  ;;  %v2920_v45 = vpack.c.bf16 %v2916_v49, %v2914_v62  ;;  %v7286_v15 = vmul.f32 %v7074_v19, %v7185_v47  ;;  %v7290_v13 = vmul.f32 %v7076_v1, %v7214_v6 }
 0x463   : > { %2978 = vmatprep.subr.bf16.mxu1 %v5589_v12  ;;  %v7294_v12 = vmul.f32 %v7074_v19, %v7171_v35  ;;  %v7298_v3 = vmul.f32 %v7076_v1, %v7202_v9  ;;  %v7304_v49 = vmul.f32 %v7080_v37, %v7130_v52  ;;  %v7308_v62 = vmul.f32 %v7090_v29, %v7114_v36  ;;  %v5590_v1 = vld [vmem:[%s8452_s9 + $0x20] ss:$8 sps:$4 sm:$0xff]  }
 0x464   : > { %2963 = vmatprep.mubr.bf16.mxu1 %v2920_v45  ;;  %v7312_v19 = vmul.f32 %v7080_v37, %v7121_v46  ;;  %v7326_v11 = vmul.f32 %v7082_v24, %v7185_v47  ;;  %v5591_v37 = vld [vmem:[%s8452_s9 + $0x34] ss:$8 sps:$4 sm:$0xff]   ;;  %v7345_v29 = vmul.f32 %v7094_v25, %v7202_v9  ;;  %v7363_v45 = vmul.f32 %v7098_v27, %v7121_v46 }
 0x465   : > { %2964 = vmatmul.mubr.bf16.gmra.mrb[12].mxu1 %v2919_v20  ;;  %v8473_v20 = vpack.c.bf16 %v7151_v59, %v7134_v54  ;;  %v7337_v59 = vmul.f32 %v7094_v25, %v7214_v6  ;;  %v7357_v54 = vmul.f32 %v7086_v21, %v7114_v36  ;;  %v7367_v25 = vmul.f32 %v7088_v48, %v7185_v47 }
 0x466   : > { %2979 = vmatpush1.bf16.msra.mxu1 %v5590_v1  ;;  %v7353_v1 = vmul.f32 %v7098_v27, %v7130_v52  ;;  %v7371_v63 = vmul.f32 %v7092_v23, %v7214_v6  ;;  %v7382_v8 = vmul.f32 %v7088_v48, %v7171_v35  ;;  %v7386_v7 = vmul.f32 %v7092_v23, %v7202_v9 }
 0x467   : > { %3006 = vmatprep.mubr.bf16.mxu1 %v8473_v20  ;;  %2980 = vmatprep.subr.bf16.mxu1 %v5591_v37  ;;  %v7341_v20 = vmul.f32 %v7082_v24, %v7171_v35  ;;  %v7349_v37 = vmul.f32 %v7086_v21, %v7116_v42  ;;  %v5592_v21 = vld [vmem:[%s8452_s9 + $0x30] ss:$8 sps:$4 sm:$0xff]   ;;  %v7397_v27 = vmul.f32 %v7102_v0, %v7116_v42 }
 0x468   : > { %v7401_v48 = vmul.f32 %v7096_v26, %v7130_v52  ;;  %v7415_v24 = vmul.f32 %v7100_v28, %v7185_v47  ;;  %v7421_v55 = vmul.f32 %v7106_v31, %v7214_v6  ;;  %v7425_v23 = vmul.f32 %v7100_v28, %v7171_v35 }
 0x469   : > { %v7442_v28 = vmul.f32 %v7110_v5, %v7130_v52  ;;  %v7457_v4 = vmul.f32 %v7110_v5, %v7121_v46  ;;  %v7461_v52 = vmul.f32 %v7108_v32, %v7185_v47  ;;  %v7475_v42 = vmul.f32 %v7112_v33, %v7202_v9 }
 0x46a   : > { %2981 = vmatpush1.bf16.msra.mxu1 %v5592_v21  ;;  %v7411_v21 = vmul.f32 %v7096_v26, %v7121_v46  ;;  %v5594_v26 = vld [vmem:[%s8452_s9 + $0x40] ss:$8 sps:$4 sm:$0xff]   ;;  %v5596_v46 = vld [vmem:[%s8452_s9 + $0x50] ss:$8 sps:$4 sm:$0xff]  }
 0x46b   : > { %2982 = vmatprep.subr.bf16.mxu1 %v5593_v22  ;;  %v7407_v22 = vmul.f32 %v7102_v0, %v7114_v36  ;;  %v7429_v0 = vmul.f32 %v7106_v31, %v7202_v9  ;;  %v7446_v31 = vmul.f32 %v7104_v30, %v7114_v36  ;;  %v3497_v30 = vpack.c.bf16 %v7442_v28, %v7438_v51  ;;  %v5600_v9 = vld [vmem:[%s8452_s9 + $0x70] ss:$8 sps:$4 sm:$0xff]   ;;  %v5786_v51 = vld [vmem:[%s8452_s9 + $0x740] ss:$8 sps:$4 sm:$0xff]  }
 0x46c   : > { %v7467_v36 = vmul.f32 %v7112_v33, %v7214_v6  ;;  %v5598_v33 = vld [vmem:[%s8452_s9 + $0x60] ss:$8 sps:$4 sm:$0xff]   ;;  %v5788_v28 = vld [vmem:[%s8452_s9 + $0x750] ss:$8 sps:$4 sm:$0xff]  }
 0x46d   : > { %v3496_v5 = vpack.c.bf16 %v7457_v4, %v7446_v31  ;;  %v5813_v4 = vld [vmem:[%s8452_s9 + $0x824] ss:$8 sps:$4 sm:$0xff]   ;;  %v5814_v31 = vld [vmem:[%s8452_s9 + $0x820] ss:$8 sps:$4 sm:$0xff]  }
 0x46e   : > { %2983 = vmatpush1.bf16.msra.mxu1 %v5594_v26  ;;  %v3410_v26 = vpack.c.bf16 %v7421_v55, %v7415_v24  ;;  %v3499_v6 = vpack.c.bf16 %v7467_v36, %v7461_v52  ;;  %v5781_v55 = vld [vmem:[%s8452_s9 + $0x724] ss:$8 sps:$4 sm:$0xff]   ;;  %v8495_v24 = vpack.c.bf16 %v7429_v0, %v7425_v23  ;;  %v5787_v0 = vld [vmem:[%s8452_s9 + $0x754] ss:$8 sps:$4 sm:$0xff]  }
 0x46f   : > { %2984 = vmatprep.subr.bf16.mxu1 %v5595_v57  ;;  %v7471_v57 = vmul.f32 %v7108_v32, %v7171_v35  ;;  %v5597_v32 = vld [vmem:[%s8452_s9 + $0x64] ss:$8 sps:$4 sm:$0xff]   ;;  %v5599_v35 = vld [vmem:[%s8452_s9 + $0x74] ss:$8 sps:$4 sm:$0xff]  }
 0x470   : > { %v5785_v23 = vld [vmem:[%s8452_s9 + $0x744] ss:$8 sps:$4 sm:$0xff]   ;;  %v8496_v52 = vld [vmem:[#allocation5_spill] sm:$0xff] }
 0x471   : > { %v3498_v47 = vpack.c.bf16 %v7475_v42, %v7471_v57  ;;  %v8497_v36 = vld [vmem:[#allocation3_spill] sm:$0xff] }
 0x472   : > { %2985 = vmatpush1.bf16.msra.mxu1 %v5596_v46  ;;  %v5601_v46 = vld [vmem:[%s8452_s9 + $0x84] ss:$8 sps:$4 sm:$0xff]   ;;  %v5818_v57 = vld [vmem:[%s8452_s9 + $0x840] ss:$8 sps:$4 sm:$0xff]  }
 0x473   : > { %2986 = vmatprep.subr.bf16.mxu1 %v5597_v32  ;;  %v5602_v32 = vld [vmem:[%s8452_s9 + $0x80] ss:$8 sps:$4 sm:$0xff]   ;;  %v5817_v42 = vld [vmem:[%s8452_s9 + $0x844] ss:$8 sps:$4 sm:$0xff]  }
 0x476   : > { %2987 = vmatpush1.bf16.msra.mxu1 %v5598_v33  ;;  %v5603_v33 = vld [vmem:[%s8452_s9 + $0x94] ss:$8 sps:$4 sm:$0xff]  }
 0x477   : > { %2988 = vmatprep.subr.bf16.mxu1 %v5599_v35  ;;  %v5604_v35 = vld [vmem:[%s8452_s9 + $0x90] ss:$8 sps:$4 sm:$0xff]  }
 0x47a   : > { %2989 = vmatpush1.bf16.msra.mxu1 %v5600_v9  ;;  %v5605_v9 = vld [vmem:[%s8452_s9 + $0xa4] ss:$8 sps:$4 sm:$0xff]  }
 0x47b   : > { %2990 = vmatprep.subr.bf16.mxu1 %v5601_v46  ;;  %v5606_v46 = vld [vmem:[%s8452_s9 + $0xa0] ss:$8 sps:$4 sm:$0xff]  }
 0x47e   : > { %2991 = vmatpush1.bf16.msra.mxu1 %v5602_v32  ;;  %v5607_v32 = vld [vmem:[%s8452_s9 + $0xb4] ss:$8 sps:$4 sm:$0xff]  }
 0x47f   : > { %2992 = vmatprep.subr.bf16.mxu1 %v5603_v33  ;;  %v5608_v33 = vld [vmem:[%s8452_s9 + $0xb0] ss:$8 sps:$4 sm:$0xff]  }
 0x482   : > { %2993 = vmatpush1.bf16.msra.mxu1 %v5604_v35  ;;  %v5609_v35 = vld [vmem:[%s8452_s9 + $0xc4] ss:$8 sps:$4 sm:$0xff]  }
 0x483   : > { %2994 = vmatprep.subr.bf16.mxu1 %v5605_v9  ;;  %v5610_v9 = vld [vmem:[%s8452_s9 + $0xc0] ss:$8 sps:$4 sm:$0xff]  }
 0x486   : > { %2995 = vmatpush1.bf16.msra.mxu1 %v5606_v46  ;;  %v5611_v46 = vld [vmem:[%s8452_s9 + $0xd4] ss:$8 sps:$4 sm:$0xff]  }
 0x487   : > { %2996 = vmatprep.subr.bf16.mxu1 %v5607_v32  ;;  %v5612_v32 = vld [vmem:[%s8452_s9 + $0xd0] ss:$8 sps:$4 sm:$0xff]  }
 0x48a   : > { %2997 = vmatpush1.bf16.msra.mxu1 %v5608_v33  ;;  %v5613_v33 = vld [vmem:[%s8452_s9 + $0xe4] ss:$8 sps:$4 sm:$0xff]  }
 0x48b   : > { %2998 = vmatprep.subr.bf16.mxu1 %v5609_v35  ;;  %v5614_v35 = vld [vmem:[%s8452_s9 + $0xe0] ss:$8 sps:$4 sm:$0xff]  }
 0x48e   : > { %2999 = vmatpush1.bf16.msra.mxu1 %v5610_v9  ;;  %v5615_v9 = vld [vmem:[%s8452_s9 + $0xf4] ss:$8 sps:$4 sm:$0xff]  }
 0x48f   : > { %3000 = vmatprep.subr.bf16.mxu1 %v5611_v46  ;;  %v5616_v46 = vld [vmem:[%s8452_s9 + $0xf0] ss:$8 sps:$4 sm:$0xff]  }
 0x492   : > { %3001 = vmatpush1.bf16.msra.mxu1 %v5612_v32  ;;  %v5617_v32 = vld [vmem:[%s8452_s9 + $0x204] ss:$8 sps:$4 sm:$0xff]  }
 0x493   : > { %3002 = vmatprep.subr.bf16.mxu1 %v5613_v33  ;;  %v8474_v33 = vpack.c.bf16 %v7141_v56, %v7125_v50  ;;  %v5621_v50 = vld [vmem:[%s8452_s9 + $0x224] ss:$8 sps:$4 sm:$0xff]   ;;  %v8476_v56 = vpack.c.bf16 %v7235_v40, %v7208_v17  ;;  %v5628_v40 = vld [vmem:[%s8452_s9 + $0x250] ss:$8 sps:$4 sm:$0xff]  }
 0x494   : > { %v5625_v17 = vld [vmem:[%s8452_s9 + $0x244] ss:$8 sps:$4 sm:$0xff]  }
 0x496   : > { %3003 = vmatpush1.bf16.msra.mxu1 %v5614_v35  ;;  %v8475_v35 = vpack.c.bf16 %v7246_v34, %v7223_v61  ;;  %v5622_v61 = vld [vmem:[%s8452_s9 + $0x220] ss:$8 sps:$4 sm:$0xff]   ;;  %v8477_v34 = vpack.c.bf16 %v7155_v60, %v7144_v39  ;;  %v5627_v60 = vld [vmem:[%s8452_s9 + $0x254] ss:$8 sps:$4 sm:$0xff]  }
 0x497   : > { %3004 = vmatprep.subr.bf16.mxu1 %v5615_v9  ;;  %v5618_v9 = vld [vmem:[%s8452_s9 + $0x200] ss:$8 sps:$4 sm:$0xff]  }
 0x498   : > { %v5626_v39 = vld [vmem:[%s8452_s9 + $0x240] ss:$8 sps:$4 sm:$0xff]  }
 0x49a   : > { %3005 = vmatpush1.bf16.msra.mxu1 %v5616_v46  ;;  %v5619_v46 = vld [vmem:[%s8452_s9 + $0x214] ss:$8 sps:$4 sm:$0xff]  }
 0x49b   : > { %3055 = vmatprep.subr.bf16.mxu1 %v5617_v32  ;;  %v5620_v32 = vld [vmem:[%s8452_s9 + $0x210] ss:$8 sps:$4 sm:$0xff]  }
 0x49d   : > { %3007 = vmatmul.mubr.bf16.vlgmr.msra.gmra.mrb[8].mxu1 %v8474_v33  ;;  %v5623_v33 = vld [vmem:[%s8452_s9 + $0x234] ss:$8 sps:$4 sm:$0xff]  }
 0x49e   : > { %3016 = vmatprep.mubr.bf16.mxu1 %v8475_v35  ;;  %3056 = vmatpush1.bf16.msra.mxu1 %v5618_v9  ;;  %v5624_v35 = vld [vmem:[%s8452_s9 + $0x230] ss:$8 sps:$4 sm:$0xff]   ;;  %v5629_v9 = vld [vmem:[%s8452_s9 + $0x264] ss:$8 sps:$4 sm:$0xff]  }
 0x49f   : > { %3057 = vmatprep.subr.bf16.mxu1 %v5619_v46  ;;  %v5630_v46 = vld [vmem:[%s8452_s9 + $0x260] ss:$8 sps:$4 sm:$0xff]  }
 0x4a2   : > { %3058 = vmatpush1.bf16.msra.mxu1 %v5620_v32  ;;  %v5631_v32 = vld [vmem:[%s8452_s9 + $0x274] ss:$8 sps:$4 sm:$0xff]  }
 0x4a3   : > { %3059 = vmatprep.subr.bf16.mxu1 %v5621_v50  ;;  %v5632_v50 = vld [vmem:[%s8452_s9 + $0x270] ss:$8 sps:$4 sm:$0xff]  }
 0x4a5   : > { %3017 = vmatmul.mubr.bf16.gmra.mrb[12].mxu1 %v8476_v56  ;;  %v5633_v56 = vld [vmem:[%s8452_s9 + $0x284] ss:$8 sps:$4 sm:$0xff]  }
 0x4a6   : > { %3060 = vmatpush1.bf16.msra.mxu1 %v5622_v61  ;;  %3087 = vmatprep.mubr.bf16.mxu1 %v8477_v34  ;;  %v5634_v61 = vld [vmem:[%s8452_s9 + $0x280] ss:$8 sps:$4 sm:$0xff]   ;;  %v5635_v34 = vld [vmem:[%s8452_s9 + $0x294] ss:$8 sps:$4 sm:$0xff]  }
 0x4a7   : > { %3061 = vmatprep.subr.bf16.mxu1 %v5623_v33  ;;  %v5636_v33 = vld [vmem:[%s8452_s9 + $0x290] ss:$8 sps:$4 sm:$0xff]  }
 0x4aa   : > { %3062 = vmatpush1.bf16.msra.mxu1 %v5624_v35  ;;  %v5637_v35 = vld [vmem:[%s8452_s9 + $0x2a4] ss:$8 sps:$4 sm:$0xff]  }
 0x4ab   : > { %3063 = vmatprep.subr.bf16.mxu1 %v5625_v17  ;;  %v5638_v17 = vld [vmem:[%s8452_s9 + $0x2a0] ss:$8 sps:$4 sm:$0xff]  }
 0x4ae   : > { %3064 = vmatpush1.bf16.msra.mxu1 %v5626_v39  ;;  %v5639_v39 = vld [vmem:[%s8452_s9 + $0x2b4] ss:$8 sps:$4 sm:$0xff]  }
 0x4af   : > { %3065 = vmatprep.subr.bf16.mxu1 %v5627_v60  ;;  %v5640_v60 = vld [vmem:[%s8452_s9 + $0x2b0] ss:$8 sps:$4 sm:$0xff]  }
 0x4b2   : > { %3066 = vmatpush1.bf16.msra.mxu1 %v5628_v40  ;;  %v5641_v40 = vld [vmem:[%s8452_s9 + $0x2c4] ss:$8 sps:$4 sm:$0xff]  }
 0x4b3   : > { %3067 = vmatprep.subr.bf16.mxu1 %v5629_v9  ;;  %v5642_v9 = vld [vmem:[%s8452_s9 + $0x2c0] ss:$8 sps:$4 sm:$0xff]  }
 0x4b6   : > { %3068 = vmatpush1.bf16.msra.mxu1 %v5630_v46  ;;  %v5643_v46 = vld [vmem:[%s8452_s9 + $0x2d4] ss:$8 sps:$4 sm:$0xff]  }
 0x4b7   : > { %3069 = vmatprep.subr.bf16.mxu1 %v5631_v32  ;;  %v5644_v32 = vld [vmem:[%s8452_s9 + $0x2d0] ss:$8 sps:$4 sm:$0xff]  }
 0x4ba   : > { %3070 = vmatpush1.bf16.msra.mxu1 %v5632_v50  ;;  %v5645_v50 = vld [vmem:[%s8452_s9 + $0x2e4] ss:$8 sps:$4 sm:$0xff]  }
 0x4bb   : > { %3071 = vmatprep.subr.bf16.mxu1 %v5633_v56  ;;  %v5646_v56 = vld [vmem:[%s8452_s9 + $0x2e0] ss:$8 sps:$4 sm:$0xff]  }
 0x4be   : > { %3072 = vmatpush1.bf16.msra.mxu1 %v5634_v61  ;;  %v5647_v61 = vld [vmem:[%s8452_s9 + $0x2f4] ss:$8 sps:$4 sm:$0xff]  }
 0x4bf   : > { %3073 = vmatprep.subr.bf16.mxu1 %v5635_v34  ;;  %v5648_v34 = vld [vmem:[%s8452_s9 + $0x2f0] ss:$8 sps:$4 sm:$0xff]  }
 0x4c2   : > { %3074 = vmatpush1.bf16.msra.mxu1 %v5636_v33  ;;  %v5649_v33 = vld [vmem:[%s8452_s9 + $0x304] ss:$8 sps:$4 sm:$0xff]  }
 0x4c3   : > { %3075 = vmatprep.subr.bf16.mxu1 %v5637_v35  ;;  %v8478_v35 = vpack.c.bf16 %v7175_v41, %v7162_v2  ;;  %v5653_v2 = vld [vmem:[%s8452_s9 + $0x324] ss:$8 sps:$4 sm:$0xff]   ;;  %v8480_v41 = vpack.c.bf16 %v7278_v10, %v7269_v16  ;;  %v5660_v16 = vld [vmem:[%s8452_s9 + $0x350] ss:$8 sps:$4 sm:$0xff]  }
 0x4c4   : > { %v5657_v10 = vld [vmem:[%s8452_s9 + $0x344] ss:$8 sps:$4 sm:$0xff]  }
 0x4c6   : > { %3076 = vmatpush1.bf16.msra.mxu1 %v5638_v17  ;;  %v8479_v17 = vpack.c.bf16 %v7258_v53, %v7250_v18  ;;  %v5654_v18 = vld [vmem:[%s8452_s9 + $0x320] ss:$8 sps:$4 sm:$0xff]   ;;  %v8481_v53 = vpack.c.bf16 %v7182_v44, %v7179_v43  ;;  %v5659_v44 = vld [vmem:[%s8452_s9 + $0x354] ss:$8 sps:$4 sm:$0xff]  }
 0x4c7   : > { %3077 = vmatprep.subr.bf16.mxu1 %v5639_v39  ;;  %v5650_v39 = vld [vmem:[%s8452_s9 + $0x300] ss:$8 sps:$4 sm:$0xff]  }
 0x4c8   : > { %v5658_v43 = vld [vmem:[%s8452_s9 + $0x340] ss:$8 sps:$4 sm:$0xff]  }
 0x4ca   : > { %3078 = vmatpush1.bf16.msra.mxu1 %v5640_v60  ;;  %v5651_v60 = vld [vmem:[%s8452_s9 + $0x314] ss:$8 sps:$4 sm:$0xff]  }
 0x4cb   : > { %3079 = vmatprep.subr.bf16.mxu1 %v5641_v40  ;;  %v5652_v40 = vld [vmem:[%s8452_s9 + $0x310] ss:$8 sps:$4 sm:$0xff]  }
 0x4ce   : > { %3080 = vmatpush1.bf16.msra.mxu1 %v5642_v9  ;;  %v5655_v9 = vld [vmem:[%s8452_s9 + $0x334] ss:$8 sps:$4 sm:$0xff]  }
 0x4cf   : > { %3081 = vmatprep.subr.bf16.mxu1 %v5643_v46  ;;  %v5656_v46 = vld [vmem:[%s8452_s9 + $0x330] ss:$8 sps:$4 sm:$0xff]  }
 0x4d2   : > { %3082 = vmatpush1.bf16.msra.mxu1 %v5644_v32  ;;  %v5661_v32 = vld [vmem:[%s8452_s9 + $0x364] ss:$8 sps:$4 sm:$0xff]  }
 0x4d3   : > { %3083 = vmatprep.subr.bf16.mxu1 %v5645_v50  ;;  %v5662_v50 = vld [vmem:[%s8452_s9 + $0x360] ss:$8 sps:$4 sm:$0xff]  }
 0x4d6   : > { %3084 = vmatpush1.bf16.msra.mxu1 %v5646_v56  ;;  %v5663_v56 = vld [vmem:[%s8452_s9 + $0x374] ss:$8 sps:$4 sm:$0xff]  }
 0x4d7   : > { %3085 = vmatprep.subr.bf16.mxu1 %v5647_v61  ;;  %v5664_v61 = vld [vmem:[%s8452_s9 + $0x370] ss:$8 sps:$4 sm:$0xff]  }
 0x4da   : > { %3086 = vmatpush1.bf16.msra.mxu1 %v5648_v34  ;;  %v5665_v34 = vld [vmem:[%s8452_s9 + $0x384] ss:$8 sps:$4 sm:$0xff]  }
 0x4db   : > { %3144 = vmatprep.subr.bf16.mxu1 %v5649_v33  ;;  %v5666_v33 = vld [vmem:[%s8452_s9 + $0x380] ss:$8 sps:$4 sm:$0xff]  }
 0x4dd   : > { %3088 = vmatmul.mubr.bf16.vlgmr.msra.gmra.mrb[8].mxu1 %v8478_v35  ;;  %v5667_v35 = vld [vmem:[%s8452_s9 + $0x394] ss:$8 sps:$4 sm:$0xff]  }
 0x4de   : > { %3097 = vmatprep.mubr.bf16.mxu1 %v8479_v17  ;;  %3145 = vmatpush1.bf16.msra.mxu1 %v5650_v39  ;;  %v5668_v17 = vld [vmem:[%s8452_s9 + $0x390] ss:$8 sps:$4 sm:$0xff]   ;;  %v5669_v39 = vld [vmem:[%s8452_s9 + $0x3a4] ss:$8 sps:$4 sm:$0xff]  }
 0x4df   : > { %3146 = vmatprep.subr.bf16.mxu1 %v5651_v60  ;;  %v5670_v60 = vld [vmem:[%s8452_s9 + $0x3a0] ss:$8 sps:$4 sm:$0xff]  }
 0x4e2   : > { %3147 = vmatpush1.bf16.msra.mxu1 %v5652_v40  ;;  %v5671_v40 = vld [vmem:[%s8452_s9 + $0x3b4] ss:$8 sps:$4 sm:$0xff]  }
 0x4e3   : > { %3148 = vmatprep.subr.bf16.mxu1 %v5653_v2  ;;  %v5672_v2 = vld [vmem:[%s8452_s9 + $0x3b0] ss:$8 sps:$4 sm:$0xff]  }
 0x4e5   : > { %3098 = vmatmul.mubr.bf16.gmra.mrb[12].mxu1 %v8480_v41  ;;  %v5673_v41 = vld [vmem:[%s8452_s9 + $0x3c4] ss:$8 sps:$4 sm:$0xff]  }
 0x4e6   : > { %3149 = vmatpush1.bf16.msra.mxu1 %v5654_v18  ;;  %3176 = vmatprep.mubr.bf16.mxu1 %v8481_v53  ;;  %v5674_v18 = vld [vmem:[%s8452_s9 + $0x3c0] ss:$8 sps:$4 sm:$0xff]   ;;  %v5675_v53 = vld [vmem:[%s8452_s9 + $0x3d4] ss:$8 sps:$4 sm:$0xff]  }
 0x4e7   : > { %3150 = vmatprep.subr.bf16.mxu1 %v5655_v9  ;;  %v5676_v9 = vld [vmem:[%s8452_s9 + $0x3d0] ss:$8 sps:$4 sm:$0xff]  }
 0x4ea   : > { %3151 = vmatpush1.bf16.msra.mxu1 %v5656_v46  ;;  %v5677_v46 = vld [vmem:[%s8452_s9 + $0x3e4] ss:$8 sps:$4 sm:$0xff]  }
 0x4eb   : > { %3152 = vmatprep.subr.bf16.mxu1 %v5657_v10  ;;  %v5678_v10 = vld [vmem:[%s8452_s9 + $0x3e0] ss:$8 sps:$4 sm:$0xff]  }
 0x4ee   : > { %3153 = vmatpush1.bf16.msra.mxu1 %v5658_v43  ;;  %v5679_v43 = vld [vmem:[%s8452_s9 + $0x3f4] ss:$8 sps:$4 sm:$0xff]  }
 0x4ef   : > { %3154 = vmatprep.subr.bf16.mxu1 %v5659_v44  ;;  %v5680_v44 = vld [vmem:[%s8452_s9 + $0x3f0] ss:$8 sps:$4 sm:$0xff]  }
 0x4f2   : > { %3155 = vmatpush1.bf16.msra.mxu1 %v5660_v16  ;;  %v5681_v16 = vld [vmem:[%s8452_s9 + $0x404] ss:$8 sps:$4 sm:$0xff]  }
 0x4f3   : > { %3156 = vmatprep.subr.bf16.mxu1 %v5661_v32  ;;  %v8482_v32 = vpack.c.bf16 %v7192_v14, %v7189_v38  ;;  %v5685_v38 = vld [vmem:[%s8452_s9 + $0x424] ss:$8 sps:$4 sm:$0xff]   ;;  %v8484_v14 = vpack.c.bf16 %v7298_v3, %v7294_v12  ;;  %v5692_v3 = vld [vmem:[%s8452_s9 + $0x450] ss:$8 sps:$4 sm:$0xff]  }
 0x4f4   : > { %v5689_v12 = vld [vmem:[%s8452_s9 + $0x444] ss:$8 sps:$4 sm:$0xff]  }
 0x4f6   : > { %3157 = vmatpush1.bf16.msra.mxu1 %v5662_v50  ;;  %v8483_v50 = vpack.c.bf16 %v7290_v13, %v7286_v15  ;;  %v5686_v15 = vld [vmem:[%s8452_s9 + $0x420] ss:$8 sps:$4 sm:$0xff]   ;;  %v8485_v13 = vpack.c.bf16 %v7304_v49, %v7196_v58  ;;  %v5691_v49 = vld [vmem:[%s8452_s9 + $0x454] ss:$8 sps:$4 sm:$0xff]  }
 0x4f7   : > { %3158 = vmatprep.subr.bf16.mxu1 %v5663_v56  ;;  %v5682_v56 = vld [vmem:[%s8452_s9 + $0x400] ss:$8 sps:$4 sm:$0xff]  }
 0x4f8   : > { %v5690_v58 = vld [vmem:[%s8452_s9 + $0x440] ss:$8 sps:$4 sm:$0xff]  }
 0x4fa   : > { %3159 = vmatpush1.bf16.msra.mxu1 %v5664_v61  ;;  %v5683_v61 = vld [vmem:[%s8452_s9 + $0x414] ss:$8 sps:$4 sm:$0xff]  }
 0x4fb   : > { %3160 = vmatprep.subr.bf16.mxu1 %v5665_v34  ;;  %v5684_v34 = vld [vmem:[%s8452_s9 + $0x410] ss:$8 sps:$4 sm:$0xff]  }
 0x4fe   : > { %3161 = vmatpush1.bf16.msra.mxu1 %v5666_v33  ;;  %v5687_v33 = vld [vmem:[%s8452_s9 + $0x434] ss:$8 sps:$4 sm:$0xff]  }
 0x4ff   : > { %3162 = vmatprep.subr.bf16.mxu1 %v5667_v35  ;;  %v5688_v35 = vld [vmem:[%s8452_s9 + $0x430] ss:$8 sps:$4 sm:$0xff]  }
 0x502   : > { %3163 = vmatpush1.bf16.msra.mxu1 %v5668_v17  ;;  %v5693_v17 = vld [vmem:[%s8452_s9 + $0x464] ss:$8 sps:$4 sm:$0xff]  }
 0x503   : > { %3164 = vmatprep.subr.bf16.mxu1 %v5669_v39  ;;  %v5694_v39 = vld [vmem:[%s8452_s9 + $0x460] ss:$8 sps:$4 sm:$0xff]  }
 0x506   : > { %3165 = vmatpush1.bf16.msra.mxu1 %v5670_v60  ;;  %v5695_v60 = vld [vmem:[%s8452_s9 + $0x474] ss:$8 sps:$4 sm:$0xff]  }
 0x507   : > { %3166 = vmatprep.subr.bf16.mxu1 %v5671_v40  ;;  %v5696_v40 = vld [vmem:[%s8452_s9 + $0x470] ss:$8 sps:$4 sm:$0xff]  }
 0x50a   : > { %3167 = vmatpush1.bf16.msra.mxu1 %v5672_v2  ;;  %v5697_v2 = vld [vmem:[%s8452_s9 + $0x484] ss:$8 sps:$4 sm:$0xff]  }
 0x50b   : > { %3168 = vmatprep.subr.bf16.mxu1 %v5673_v41  ;;  %v5698_v41 = vld [vmem:[%s8452_s9 + $0x480] ss:$8 sps:$4 sm:$0xff]  }
 0x50e   : > { %3169 = vmatpush1.bf16.msra.mxu1 %v5674_v18  ;;  %v5699_v18 = vld [vmem:[%s8452_s9 + $0x494] ss:$8 sps:$4 sm:$0xff]  }
 0x50f   : > { %3170 = vmatprep.subr.bf16.mxu1 %v5675_v53  ;;  %v5700_v53 = vld [vmem:[%s8452_s9 + $0x490] ss:$8 sps:$4 sm:$0xff]  }
 0x512   : > { %3171 = vmatpush1.bf16.msra.mxu1 %v5676_v9  ;;  %v5701_v9 = vld [vmem:[%s8452_s9 + $0x4a4] ss:$8 sps:$4 sm:$0xff]  }
 0x513   : > { %3172 = vmatprep.subr.bf16.mxu1 %v5677_v46  ;;  %v5702_v46 = vld [vmem:[%s8452_s9 + $0x4a0] ss:$8 sps:$4 sm:$0xff]  }
 0x516   : > { %3173 = vmatpush1.bf16.msra.mxu1 %v5678_v10  ;;  %v5703_v10 = vld [vmem:[%s8452_s9 + $0x4b4] ss:$8 sps:$4 sm:$0xff]  }
 0x517   : > { %3174 = vmatprep.subr.bf16.mxu1 %v5679_v43  ;;  %v5704_v43 = vld [vmem:[%s8452_s9 + $0x4b0] ss:$8 sps:$4 sm:$0xff]  }
 0x51a   : > { %3175 = vmatpush1.bf16.msra.mxu1 %v5680_v44  ;;  %v5705_v44 = vld [vmem:[%s8452_s9 + $0x4c4] ss:$8 sps:$4 sm:$0xff]  }
 0x51b   : > { %3233 = vmatprep.subr.bf16.mxu1 %v5681_v16  ;;  %v5706_v16 = vld [vmem:[%s8452_s9 + $0x4c0] ss:$8 sps:$4 sm:$0xff]  }
 0x51d   : > { %3177 = vmatmul.mubr.bf16.vlgmr.msra.gmra.mrb[8].mxu1 %v8482_v32  ;;  %v5707_v32 = vld [vmem:[%s8452_s9 + $0x4d4] ss:$8 sps:$4 sm:$0xff]  }
 0x51e   : > { %3186 = vmatprep.mubr.bf16.mxu1 %v8483_v50  ;;  %3234 = vmatpush1.bf16.msra.mxu1 %v5682_v56  ;;  %v5708_v50 = vld [vmem:[%s8452_s9 + $0x4d0] ss:$8 sps:$4 sm:$0xff]   ;;  %v5709_v56 = vld [vmem:[%s8452_s9 + $0x4e4] ss:$8 sps:$4 sm:$0xff]  }
 0x51f   : > { %3235 = vmatprep.subr.bf16.mxu1 %v5683_v61  ;;  %v5710_v61 = vld [vmem:[%s8452_s9 + $0x4e0] ss:$8 sps:$4 sm:$0xff]  }
 0x522   : > { %3236 = vmatpush1.bf16.msra.mxu1 %v5684_v34  ;;  %v5711_v34 = vld [vmem:[%s8452_s9 + $0x4f4] ss:$8 sps:$4 sm:$0xff]  }
 0x523   : > { %3237 = vmatprep.subr.bf16.mxu1 %v5685_v38  ;;  %v5712_v38 = vld [vmem:[%s8452_s9 + $0x4f0] ss:$8 sps:$4 sm:$0xff]  }
 0x525   : > { %3187 = vmatmul.mubr.bf16.gmra.mrb[12].mxu1 %v8484_v14  ;;  %v5713_v14 = vld [vmem:[%s8452_s9 + $0x504] ss:$8 sps:$4 sm:$0xff]  }
 0x526   : > { %3238 = vmatpush1.bf16.msra.mxu1 %v5686_v15  ;;  %3265 = vmatprep.mubr.bf16.mxu1 %v8485_v13  ;;  %v8486_v15 = vpack.c.bf16 %v7312_v19, %v7308_v62  ;;  %v8487_v13 = vpack.c.bf16 %v7337_v59, %v7326_v11  ;;  %v5717_v11 = vld [vmem:[%s8452_s9 + $0x524] ss:$8 sps:$4 sm:$0xff]   ;;  %v8488_v62 = vpack.c.bf16 %v7345_v29, %v7341_v20  ;;  %v5718_v19 = vld [vmem:[%s8452_s9 + $0x520] ss:$8 sps:$4 sm:$0xff]   ;;  %v5723_v20 = vld [vmem:[%s8452_s9 + $0x554] ss:$8 sps:$4 sm:$0xff]  }
 0x527   : > { %3239 = vmatprep.subr.bf16.mxu1 %v5687_v33  ;;  %v5714_v33 = vld [vmem:[%s8452_s9 + $0x500] ss:$8 sps:$4 sm:$0xff]   ;;  %v8489_v59 = vpack.c.bf16 %v7353_v1, %v7349_v37  ;;  %v5721_v29 = vld [vmem:[%s8452_s9 + $0x544] ss:$8 sps:$4 sm:$0xff]   ;;  %v5724_v37 = vld [vmem:[%s8452_s9 + $0x550] ss:$8 sps:$4 sm:$0xff]  }
 0x528   : > { %v5722_v1 = vld [vmem:[%s8452_s9 + $0x540] ss:$8 sps:$4 sm:$0xff]  }
 0x52a   : > { %3240 = vmatpush1.bf16.msra.mxu1 %v5688_v35  ;;  %v5715_v35 = vld [vmem:[%s8452_s9 + $0x514] ss:$8 sps:$4 sm:$0xff]  }
 0x52b   : > { %3241 = vmatprep.subr.bf16.mxu1 %v5689_v12  ;;  %v5716_v12 = vld [vmem:[%s8452_s9 + $0x510] ss:$8 sps:$4 sm:$0xff]  }
 0x52e   : > { %3242 = vmatpush1.bf16.msra.mxu1 %v5690_v58  ;;  %v5719_v58 = vld [vmem:[%s8452_s9 + $0x534] ss:$8 sps:$4 sm:$0xff]  }
 0x52f   : > { %3243 = vmatprep.subr.bf16.mxu1 %v5691_v49  ;;  %v5720_v49 = vld [vmem:[%s8452_s9 + $0x530] ss:$8 sps:$4 sm:$0xff]  }
 0x532   : > { %3244 = vmatpush1.bf16.msra.mxu1 %v5692_v3  ;;  %v5725_v3 = vld [vmem:[%s8452_s9 + $0x564] ss:$8 sps:$4 sm:$0xff]  }
 0x533   : > { %3245 = vmatprep.subr.bf16.mxu1 %v5693_v17  ;;  %v5726_v17 = vld [vmem:[%s8452_s9 + $0x560] ss:$8 sps:$4 sm:$0xff]  }
 0x536   : > { %3246 = vmatpush1.bf16.msra.mxu1 %v5694_v39  ;;  %v5727_v39 = vld [vmem:[%s8452_s9 + $0x574] ss:$8 sps:$4 sm:$0xff]  }
 0x537   : > { %3247 = vmatprep.subr.bf16.mxu1 %v5695_v60  ;;  %v5728_v60 = vld [vmem:[%s8452_s9 + $0x570] ss:$8 sps:$4 sm:$0xff]  }
 0x53a   : > { %3248 = vmatpush1.bf16.msra.mxu1 %v5696_v40  ;;  %v5729_v40 = vld [vmem:[%s8452_s9 + $0x584] ss:$8 sps:$4 sm:$0xff]  }
 0x53b   : > { %3249 = vmatprep.subr.bf16.mxu1 %v5697_v2  ;;  %v5730_v2 = vld [vmem:[%s8452_s9 + $0x580] ss:$8 sps:$4 sm:$0xff]  }
 0x53e   : > { %3250 = vmatpush1.bf16.msra.mxu1 %v5698_v41  ;;  %v5731_v41 = vld [vmem:[%s8452_s9 + $0x594] ss:$8 sps:$4 sm:$0xff]  }
 0x53f   : > { %3251 = vmatprep.subr.bf16.mxu1 %v5699_v18  ;;  %v5732_v18 = vld [vmem:[%s8452_s9 + $0x590] ss:$8 sps:$4 sm:$0xff]  }
 0x542   : > { %3252 = vmatpush1.bf16.msra.mxu1 %v5700_v53  ;;  %v5733_v53 = vld [vmem:[%s8452_s9 + $0x5a4] ss:$8 sps:$4 sm:$0xff]  }
 0x543   : > { %3253 = vmatprep.subr.bf16.mxu1 %v5701_v9  ;;  %v5734_v9 = vld [vmem:[%s8452_s9 + $0x5a0] ss:$8 sps:$4 sm:$0xff]  }
 0x546   : > { %3254 = vmatpush1.bf16.msra.mxu1 %v5702_v46  ;;  %v5735_v46 = vld [vmem:[%s8452_s9 + $0x5b4] ss:$8 sps:$4 sm:$0xff]  }
 0x547   : > { %3255 = vmatprep.subr.bf16.mxu1 %v5703_v10  ;;  %v5736_v10 = vld [vmem:[%s8452_s9 + $0x5b0] ss:$8 sps:$4 sm:$0xff]  }
 0x54a   : > { %3256 = vmatpush1.bf16.msra.mxu1 %v5704_v43  ;;  %v5737_v43 = vld [vmem:[%s8452_s9 + $0x5c4] ss:$8 sps:$4 sm:$0xff]  }
 0x54b   : > { %3257 = vmatprep.subr.bf16.mxu1 %v5705_v44  ;;  %v5738_v44 = vld [vmem:[%s8452_s9 + $0x5c0] ss:$8 sps:$4 sm:$0xff]  }
 0x54e   : > { %3258 = vmatpush1.bf16.msra.mxu1 %v5706_v16  ;;  %v5739_v16 = vld [vmem:[%s8452_s9 + $0x5d4] ss:$8 sps:$4 sm:$0xff]  }
 0x54f   : > { %3259 = vmatprep.subr.bf16.mxu1 %v5707_v32  ;;  %v5740_v32 = vld [vmem:[%s8452_s9 + $0x5d0] ss:$8 sps:$4 sm:$0xff]  }
 0x552   : > { %3260 = vmatpush1.bf16.msra.mxu1 %v5708_v50  ;;  %v5741_v50 = vld [vmem:[%s8452_s9 + $0x5e4] ss:$8 sps:$4 sm:$0xff]  }
 0x553   : > { %3261 = vmatprep.subr.bf16.mxu1 %v5709_v56  ;;  %v5742_v56 = vld [vmem:[%s8452_s9 + $0x5e0] ss:$8 sps:$4 sm:$0xff]  }
 0x556   : > { %3262 = vmatpush1.bf16.msra.mxu1 %v5710_v61  ;;  %v5743_v61 = vld [vmem:[%s8452_s9 + $0x5f4] ss:$8 sps:$4 sm:$0xff]  }
 0x557   : > { %3263 = vmatprep.subr.bf16.mxu1 %v5711_v34  ;;  %v5744_v34 = vld [vmem:[%s8452_s9 + $0x5f0] ss:$8 sps:$4 sm:$0xff]  }
 0x55a   : > { %3264 = vmatpush1.bf16.msra.mxu1 %v5712_v38  ;;  %v5745_v38 = vld [vmem:[%s8452_s9 + $0x604] ss:$8 sps:$4 sm:$0xff]  }
 0x55b   : > { %3322 = vmatprep.subr.bf16.mxu1 %v5713_v14  ;;  %v8490_v14 = vpack.c.bf16 %v7363_v45, %v7357_v54  ;;  %v8492_v45 = vpack.c.bf16 %v7386_v7, %v7382_v8  ;;  %v5750_v54 = vld [vmem:[%s8452_s9 + $0x620] ss:$8 sps:$4 sm:$0xff]   ;;  %v5753_v7 = vld [vmem:[%s8452_s9 + $0x644] ss:$8 sps:$4 sm:$0xff]  }
 0x55c   : > { %v5754_v8 = vld [vmem:[%s8452_s9 + $0x640] ss:$8 sps:$4 sm:$0xff]  }
 0x55d   : > { %3266 = vmatmul.mubr.bf16.vlgmr.msra.gmra.mrb[8].mxu1 %v8486_v15  ;;  %v8491_v15 = vpack.c.bf16 %v7371_v63, %v7367_v25  ;;  %v5749_v63 = vld [vmem:[%s8452_s9 + $0x624] ss:$8 sps:$4 sm:$0xff]   ;;  %v8493_v25 = vpack.c.bf16 %v7401_v48, %v7397_v27  ;;  %v5755_v27 = vld [vmem:[%s8452_s9 + $0x654] ss:$8 sps:$4 sm:$0xff]   ;;  %v5756_v48 = vld [vmem:[%s8452_s9 + $0x650] ss:$8 sps:$4 sm:$0xff]  }
 0x55e   : > { %3275 = vmatprep.mubr.bf16.mxu1 %v8487_v13  ;;  %3323 = vmatpush1.bf16.msra.mxu1 %v5714_v33  ;;  %v5746_v13 = vld [vmem:[%s8452_s9 + $0x600] ss:$8 sps:$4 sm:$0xff]   ;;  %v5747_v33 = vld [vmem:[%s8452_s9 + $0x614] ss:$8 sps:$4 sm:$0xff]  }
 0x55f   : > { %3324 = vmatprep.subr.bf16.mxu1 %v5715_v35  ;;  %v5748_v35 = vld [vmem:[%s8452_s9 + $0x610] ss:$8 sps:$4 sm:$0xff]  }
 0x562   : > { %3325 = vmatpush1.bf16.msra.mxu1 %v5716_v12  ;;  %v5751_v12 = vld [vmem:[%s8452_s9 + $0x634] ss:$8 sps:$4 sm:$0xff]  }
 0x563   : > { %3326 = vmatprep.subr.bf16.mxu1 %v5717_v11  ;;  %v5752_v11 = vld [vmem:[%s8452_s9 + $0x630] ss:$8 sps:$4 sm:$0xff]  }
 0x565   : > { %3276 = vmatmul.mubr.bf16.gmra.mrb[12].mxu1 %v8488_v62  ;;  %v5757_v62 = vld [vmem:[%s8452_s9 + $0x664] ss:$8 sps:$4 sm:$0xff]  }
 0x566   : > { %3327 = vmatpush1.bf16.msra.mxu1 %v5718_v19  ;;  %3354 = vmatprep.mubr.bf16.mxu1 %v8489_v59  ;;  %v5758_v19 = vld [vmem:[%s8452_s9 + $0x660] ss:$8 sps:$4 sm:$0xff]   ;;  %v5759_v59 = vld [vmem:[%s8452_s9 + $0x674] ss:$8 sps:$4 sm:$0xff]  }
 0x567   : > { %3328 = vmatprep.subr.bf16.mxu1 %v5719_v58  ;;  %v5760_v58 = vld [vmem:[%s8452_s9 + $0x670] ss:$8 sps:$4 sm:$0xff]  }
 0x56a   : > { %3329 = vmatpush1.bf16.msra.mxu1 %v5720_v49  ;;  %v5761_v49 = vld [vmem:[%s8452_s9 + $0x684] ss:$8 sps:$4 sm:$0xff]  }
 0x56b   : > { %3330 = vmatprep.subr.bf16.mxu1 %v5721_v29  ;;  %v5762_v29 = vld [vmem:[%s8452_s9 + $0x680] ss:$8 sps:$4 sm:$0xff]  }
 0x56e   : > { %3331 = vmatpush1.bf16.msra.mxu1 %v5722_v1  ;;  %v5763_v1 = vld [vmem:[%s8452_s9 + $0x694] ss:$8 sps:$4 sm:$0xff]  }
 0x56f   : > { %3332 = vmatprep.subr.bf16.mxu1 %v5723_v20  ;;  %v5764_v20 = vld [vmem:[%s8452_s9 + $0x690] ss:$8 sps:$4 sm:$0xff]  }
 0x572   : > { %3333 = vmatpush1.bf16.msra.mxu1 %v5724_v37  ;;  %v5765_v37 = vld [vmem:[%s8452_s9 + $0x6a4] ss:$8 sps:$4 sm:$0xff]  }
 0x573   : > { %3334 = vmatprep.subr.bf16.mxu1 %v5725_v3  ;;  %v5766_v3 = vld [vmem:[%s8452_s9 + $0x6a0] ss:$8 sps:$4 sm:$0xff]  }
 0x576   : > { %3335 = vmatpush1.bf16.msra.mxu1 %v5726_v17  ;;  %v5767_v17 = vld [vmem:[%s8452_s9 + $0x6b4] ss:$8 sps:$4 sm:$0xff]  }
 0x577   : > { %3336 = vmatprep.subr.bf16.mxu1 %v5727_v39  ;;  %v5768_v39 = vld [vmem:[%s8452_s9 + $0x6b0] ss:$8 sps:$4 sm:$0xff]  }
 0x57a   : > { %3337 = vmatpush1.bf16.msra.mxu1 %v5728_v60  ;;  %v5769_v60 = vld [vmem:[%s8452_s9 + $0x6c4] ss:$8 sps:$4 sm:$0xff]  }
 0x57b   : > { %3338 = vmatprep.subr.bf16.mxu1 %v5729_v40  ;;  %v5770_v40 = vld [vmem:[%s8452_s9 + $0x6c0] ss:$8 sps:$4 sm:$0xff]  }
 0x57e   : > { %3339 = vmatpush1.bf16.msra.mxu1 %v5730_v2  ;;  %v5771_v2 = vld [vmem:[%s8452_s9 + $0x6d4] ss:$8 sps:$4 sm:$0xff]  }
 0x57f   : > { %3340 = vmatprep.subr.bf16.mxu1 %v5731_v41  ;;  %v5772_v41 = vld [vmem:[%s8452_s9 + $0x6d0] ss:$8 sps:$4 sm:$0xff]  }
 0x582   : > { %3341 = vmatpush1.bf16.msra.mxu1 %v5732_v18  ;;  %v5773_v18 = vld [vmem:[%s8452_s9 + $0x6e4] ss:$8 sps:$4 sm:$0xff]  }
 0x583   : > { %3342 = vmatprep.subr.bf16.mxu1 %v5733_v53  ;;  %v5774_v53 = vld [vmem:[%s8452_s9 + $0x6e0] ss:$8 sps:$4 sm:$0xff]  }
 0x586   : > { %3343 = vmatpush1.bf16.msra.mxu1 %v5734_v9  ;;  %v5775_v9 = vld [vmem:[%s8452_s9 + $0x6f4] ss:$8 sps:$4 sm:$0xff]  }
 0x587   : > { %3344 = vmatprep.subr.bf16.mxu1 %v5735_v46  ;;  %v5776_v46 = vld [vmem:[%s8452_s9 + $0x6f0] ss:$8 sps:$4 sm:$0xff]  }
 0x58a   : > { %3345 = vmatpush1.bf16.msra.mxu1 %v5736_v10  ;;  %v5777_v10 = vld [vmem:[%s8452_s9 + $0x704] ss:$8 sps:$4 sm:$0xff]  }
 0x58b   : > { %3346 = vmatprep.subr.bf16.mxu1 %v5737_v43  ;;  %v8494_v43 = vpack.c.bf16 %v7411_v21, %v7407_v22  ;;  %v5782_v21 = vld [vmem:[%s8452_s9 + $0x720] ss:$8 sps:$4 sm:$0xff]   ;;  %v5783_v22 = vld [vmem:[%s8452_s9 + $0x734] ss:$8 sps:$4 sm:$0xff]  }
 0x58e   : > { %3347 = vmatpush1.bf16.msra.mxu1 %v5738_v44  ;;  %v5778_v44 = vld [vmem:[%s8452_s9 + $0x700] ss:$8 sps:$4 sm:$0xff]  }
 0x58f   : > { %3348 = vmatprep.subr.bf16.mxu1 %v5739_v16  ;;  %v5779_v16 = vld [vmem:[%s8452_s9 + $0x714] ss:$8 sps:$4 sm:$0xff]  }
 0x592   : > { %3349 = vmatpush1.bf16.msra.mxu1 %v5740_v32  ;;  %v5780_v32 = vld [vmem:[%s8452_s9 + $0x710] ss:$8 sps:$4 sm:$0xff]  }
 0x593   : > { %3350 = vmatprep.subr.bf16.mxu1 %v5741_v50  ;;  %v5790_v50 = vld [vmem:[%s8452_s9 + $0x760] ss:$8 sps:$4 sm:$0xff]  }
 0x596   : > { %3351 = vmatpush1.bf16.msra.mxu1 %v5742_v56  ;;  %v5791_v56 = vld [vmem:[%s8452_s9 + $0x774] ss:$8 sps:$4 sm:$0xff]  }
 0x597   : > { %3352 = vmatprep.subr.bf16.mxu1 %v5743_v61  ;;  %v5792_v61 = vld [vmem:[%s8452_s9 + $0x770] ss:$8 sps:$4 sm:$0xff]  }
 0x59a   : > { %3353 = vmatpush1.bf16.msra.mxu1 %v5744_v34  ;;  %v5793_v34 = vld [vmem:[%s8452_s9 + $0x784] ss:$8 sps:$4 sm:$0xff]  }
 0x59b   : > { %3411 = vmatprep.subr.bf16.mxu1 %v5745_v38  ;;  %v5794_v38 = vld [vmem:[%s8452_s9 + $0x780] ss:$8 sps:$4 sm:$0xff]  }
 0x59d   : > { %3355 = vmatmul.mubr.bf16.vlgmr.msra.gmra.mrb[8].mxu1 %v8490_v14  ;;  %v5795_v14 = vld [vmem:[%s8452_s9 + $0x794] ss:$8 sps:$4 sm:$0xff]  }
 0x59e   : > { %3364 = vmatprep.mubr.bf16.mxu1 %v8491_v15  ;;  %3412 = vmatpush1.bf16.msra.mxu1 %v5746_v13  ;;  %v5796_v15 = vld [vmem:[%s8452_s9 + $0x790] ss:$8 sps:$4 sm:$0xff]   ;;  %v5797_v13 = vld [vmem:[%s8452_s9 + $0x7a4] ss:$8 sps:$4 sm:$0xff]  }
 0x59f   : > { %3413 = vmatprep.subr.bf16.mxu1 %v5747_v33  ;;  %v5798_v33 = vld [vmem:[%s8452_s9 + $0x7a0] ss:$8 sps:$4 sm:$0xff]  }
 0x5a2   : > { %3414 = vmatpush1.bf16.msra.mxu1 %v5748_v35  ;;  %v5799_v35 = vld [vmem:[%s8452_s9 + $0x7b4] ss:$8 sps:$4 sm:$0xff]  }
 0x5a3   : > { %3415 = vmatprep.subr.bf16.mxu1 %v5749_v63  ;;  %v5800_v63 = vld [vmem:[%s8452_s9 + $0x7b0] ss:$8 sps:$4 sm:$0xff]  }
 0x5a5   : > { %3365 = vmatmul.mubr.bf16.gmra.mrb[12].mxu1 %v8492_v45  ;;  %v5801_v45 = vld [vmem:[%s8452_s9 + $0x7c4] ss:$8 sps:$4 sm:$0xff]  }
 0x5a6   : > { %3416 = vmatpush1.bf16.msra.mxu1 %v5750_v54  ;;  %3443 = vmatprep.mubr.bf16.mxu1 %v8493_v25  ;;  %v5802_v54 = vld [vmem:[%s8452_s9 + $0x7c0] ss:$8 sps:$4 sm:$0xff]   ;;  %v5803_v25 = vld [vmem:[%s8452_s9 + $0x7d4] ss:$8 sps:$4 sm:$0xff]  }
 0x5a7   : > { %3417 = vmatprep.subr.bf16.mxu1 %v5751_v12  ;;  %v5804_v12 = vld [vmem:[%s8452_s9 + $0x7d0] ss:$8 sps:$4 sm:$0xff]  }
 0x5aa   : > { %3418 = vmatpush1.bf16.msra.mxu1 %v5752_v11  ;;  %v5805_v11 = vld [vmem:[%s8452_s9 + $0x7e4] ss:$8 sps:$4 sm:$0xff]  }
 0x5ab   : > { %3419 = vmatprep.subr.bf16.mxu1 %v5753_v7  ;;  %v5806_v7 = vld [vmem:[%s8452_s9 + $0x7e0] ss:$8 sps:$4 sm:$0xff]  }
 0x5ae   : > { %3420 = vmatpush1.bf16.msra.mxu1 %v5754_v8  ;;  %v5807_v8 = vld [vmem:[%s8452_s9 + $0x7f4] ss:$8 sps:$4 sm:$0xff]  }
 0x5af   : > { %3421 = vmatprep.subr.bf16.mxu1 %v5755_v27  ;;  %v5808_v27 = vld [vmem:[%s8452_s9 + $0x7f0] ss:$8 sps:$4 sm:$0xff]  }
 0x5b2   : > { %3422 = vmatpush1.bf16.msra.mxu1 %v5756_v48  ;;  %v5809_v48 = vld [vmem:[%s8452_s9 + $0x804] ss:$8 sps:$4 sm:$0xff]  }
 0x5b3   : > { %3423 = vmatprep.subr.bf16.mxu1 %v5757_v62  ;;  %v5810_v62 = vld [vmem:[%s8452_s9 + $0x800] ss:$8 sps:$4 sm:$0xff]  }
 0x5b6   : > { %3424 = vmatpush1.bf16.msra.mxu1 %v5758_v19  ;;  %v5811_v19 = vld [vmem:[%s8452_s9 + $0x814] ss:$8 sps:$4 sm:$0xff]  }
 0x5b7   : > { %3425 = vmatprep.subr.bf16.mxu1 %v5759_v59  ;;  %v5812_v59 = vld [vmem:[%s8452_s9 + $0x810] ss:$8 sps:$4 sm:$0xff]  }
 0x5ba   : > { %3426 = vmatpush1.bf16.msra.mxu1 %v5760_v58  ;;  %v5816_v58 = vld [vmem:[%s8452_s9 + $0x830] ss:$8 sps:$4 sm:$0xff]  }
 0x5bb   : > { %3427 = vmatprep.subr.bf16.mxu1 %v5761_v49  ;;  %v5820_v49 = vld [vmem:[%s8452_s9 + $0x850] ss:$8 sps:$4 sm:$0xff]  }
 0x5be   : > { %3428 = vmatpush1.bf16.msra.mxu1 %v5762_v29  ;;  %v5821_v29 = vld [vmem:[%s8452_s9 + $0x864] ss:$8 sps:$4 sm:$0xff]  }
 0x5bf   : > { %3429 = vmatprep.subr.bf16.mxu1 %v5763_v1  ;;  %v5822_v1 = vld [vmem:[%s8452_s9 + $0x860] ss:$8 sps:$4 sm:$0xff]  }
 0x5c2   : > { %3430 = vmatpush1.bf16.msra.mxu1 %v5764_v20  ;;  %v5823_v20 = vld [vmem:[%s8452_s9 + $0x874] ss:$8 sps:$4 sm:$0xff]  }
 0x5c3   : > { %3431 = vmatprep.subr.bf16.mxu1 %v5765_v37  ;;  %v5824_v37 = vld [vmem:[%s8452_s9 + $0x870] ss:$8 sps:$4 sm:$0xff]  }
 0x5c6   : > { %3432 = vmatpush1.bf16.msra.mxu1 %v5766_v3  ;;  %v5825_v3 = vld [vmem:[%s8452_s9 + $0x884] ss:$8 sps:$4 sm:$0xff]  }
 0x5c7   : > { %3433 = vmatprep.subr.bf16.mxu1 %v5767_v17  ;;  %v5826_v17 = vld [vmem:[%s8452_s9 + $0x880] ss:$8 sps:$4 sm:$0xff]  }
 0x5ca   : > { %3434 = vmatpush1.bf16.msra.mxu1 %v5768_v39  ;;  %v5827_v39 = vld [vmem:[%s8452_s9 + $0x894] ss:$8 sps:$4 sm:$0xff]  }
 0x5cb   : > { %3435 = vmatprep.subr.bf16.mxu1 %v5769_v60  ;;  %v5828_v60 = vld [vmem:[%s8452_s9 + $0x890] ss:$8 sps:$4 sm:$0xff]  }
 0x5ce   : > { %3436 = vmatpush1.bf16.msra.mxu1 %v5770_v40  ;;  %v5829_v40 = vld [vmem:[%s8452_s9 + $0x8a4] ss:$8 sps:$4 sm:$0xff]  }
 0x5cf   : > { %3437 = vmatprep.subr.bf16.mxu1 %v5771_v2  ;;  %v5830_v2 = vld [vmem:[%s8452_s9 + $0x8a0] ss:$8 sps:$4 sm:$0xff]  }
 0x5d2   : > { %3438 = vmatpush1.bf16.msra.mxu1 %v5772_v41  ;;  %v5831_v41 = vld [vmem:[%s8452_s9 + $0x8b4] ss:$8 sps:$4 sm:$0xff]  }
 0x5d3   : > { %3439 = vmatprep.subr.bf16.mxu1 %v5773_v18  ;;  %v5832_v18 = vld [vmem:[%s8452_s9 + $0x8b0] ss:$8 sps:$4 sm:$0xff]  }
 0x5d6   : > { %3440 = vmatpush1.bf16.msra.mxu1 %v5774_v53  ;;  %v5833_v53 = vld [vmem:[%s8452_s9 + $0x8c4] ss:$8 sps:$4 sm:$0xff]  }
 0x5d7   : > { %3441 = vmatprep.subr.bf16.mxu1 %v5775_v9  ;;  %v5834_v9 = vld [vmem:[%s8452_s9 + $0x8c0] ss:$8 sps:$4 sm:$0xff]  }
 0x5da   : > { %3442 = vmatpush1.bf16.msra.mxu1 %v5776_v46  ;;  %v5835_v46 = vld [vmem:[%s8452_s9 + $0x8d4] ss:$8 sps:$4 sm:$0xff]  }
 0x5db   : > { %3500 = vmatprep.subr.bf16.mxu1 %v5777_v10  ;;  %v5836_v10 = vld [vmem:[%s8452_s9 + $0x8d0] ss:$8 sps:$4 sm:$0xff]  }
 0x5dd   : > { %3444 = vmatmul.mubr.bf16.vlgmr.msra.gmra.mrb[8].mxu1 %v8494_v43  ;;  %v5837_v43 = vld [vmem:[%s8452_s9 + $0x8e4] ss:$8 sps:$4 sm:$0xff]  }
 0x5de   : > { %3453 = vmatprep.mubr.bf16.mxu1 %v3410_v26  ;;  %3501 = vmatpush1.bf16.msra.mxu1 %v5778_v44  ;;  %v5784_v26 = vld [vmem:[%s8452_s9 + $0x730] ss:$8 sps:$4 sm:$0xff]   ;;  %v5838_v44 = vld [vmem:[%s8452_s9 + $0x8e0] ss:$8 sps:$4 sm:$0xff]  }
 0x5df   : > { %3502 = vmatprep.subr.bf16.mxu1 %v5779_v16  ;;  %v5839_v16 = vld [vmem:[%s8452_s9 + $0x8f4] ss:$8 sps:$4 sm:$0xff]  }
 0x5e2   : > { %3503 = vmatpush1.bf16.msra.mxu1 %v5780_v32  ;;  %v5840_v32 = vld [vmem:[%s8452_s9 + $0x8f0] ss:$8 sps:$4 sm:$0xff]  }
 0x5e3   : > { %3504 = vmatprep.subr.bf16.mxu1 %v5781_v55  ;;  %v8499_v55 = vld [vmem:[#allocation4_spill] sm:$0xff] }
 0x5e5   : > { %3454 = vmatmul.mubr.bf16.gmra.mrb[12].mxu1 %v8495_v24  ;;  %v8500_v24 = vld [vmem:[#allocation2_spill] sm:$0xff] }
 0x5e6   : > { %3505 = vmatpush1.bf16.msra.mxu1 %v5782_v21  ;;  %3532 = vmatprep.mubr.bf16.mxu1 %v3497_v30  ;;  %v5789_v30 = vld [vmem:[%s8452_s9 + $0x764] ss:$8 sps:$4 sm:$0xff]   ;;  %v8501_v21 = vpack.c.bf16 %v8499_v55, %v8500_v24 }
 0x5e7   : > { %3506 = vmatprep.subr.bf16.mxu1 %v5783_v22  ;;  %v8502_v22 = vld [vmem:[#allocation9_spill] sm:$0xff] }
 0x5ea   : > { %3507 = vmatpush1.bf16.msra.mxu1 %v5784_v26  ;;  %v8503_v26 = vld [vmem:[#allocation7_spill] sm:$0xff] }
 0x5eb   : > { %3508 = vmatprep.subr.bf16.mxu1 %v5785_v23  ;;  %v8504_v23 = vpack.c.bf16 %v8502_v22, %v8503_v26 }
 0x5ee   : > { %3509 = vmatpush1.bf16.msra.mxu1 %v5786_v51  ;;  %v8505_v51 = vld [vmem:[#allocation8_spill] sm:$0xff] }
 0x5ef   : > { %3510 = vmatprep.subr.bf16.mxu1 %v5787_v0  ;;  %v8506_v0 = vld [vmem:[#allocation6_spill] sm:$0xff] }
 0x5f2   : > { %3511 = vmatpush1.bf16.msra.mxu1 %v5788_v28  ;;  %v8507_v28 = vpack.c.bf16 %v8505_v51, %v8506_v0 }
 0x5f3   : > { %3512 = vmatprep.subr.bf16.mxu1 %v5789_v30  ;;  %v8508_v30 = vmov 0  }
 0x5f6   : > { %3513 = vmatpush1.bf16.msra.mxu1 %v5790_v50 }
 0x5f7   : > { %3514 = vmatprep.subr.bf16.mxu1 %v5791_v56 }
 0x5fa   : > { %3515 = vmatpush1.bf16.msra.mxu1 %v5792_v61 }
 0x5fb   : > { %3516 = vmatprep.subr.bf16.mxu1 %v5793_v34 }
 0x5fe   : > { %3517 = vmatpush1.bf16.msra.mxu1 %v5794_v38 }
 0x5ff   : > { %3518 = vmatprep.subr.bf16.mxu1 %v5795_v14 }
 0x602   : > { %3519 = vmatpush1.bf16.msra.mxu1 %v5796_v15 }
 0x603   : > { %3520 = vmatprep.subr.bf16.mxu1 %v5797_v13 }
 0x606   : > { %3521 = vmatpush1.bf16.msra.mxu1 %v5798_v33 }
 0x607   : > { %3522 = vmatprep.subr.bf16.mxu1 %v5799_v35 }
 0x60a   : > { %3523 = vmatpush1.bf16.msra.mxu1 %v5800_v63 }
 0x60b   : > { %3524 = vmatprep.subr.bf16.mxu1 %v5801_v45 }
 0x60e   : > { %3525 = vmatpush1.bf16.msra.mxu1 %v5802_v54  ;;  %v5446_v54 = vld [vmem:[%s8451_s8] sm:$0xff]  }
 0x60f   : > { %3526 = vmatprep.subr.bf16.mxu1 %v5803_v25  ;;  %v5447_v25 = vld [vmem:[%s8451_s8 + $0x10] sm:$0xff]  }
 0x612   : > { %3527 = vmatpush1.bf16.msra.mxu1 %v5804_v12  ;;  %v5448_v12 = vld [vmem:[%s8451_s8 + $0x8] sm:$0xff]  }
 0x613   : > { %3528 = vmatprep.subr.bf16.mxu1 %v5805_v11  ;;  %v5449_v11 = vld [vmem:[%s8451_s8 + $0x18] sm:$0xff]  }
 0x616   : > { %3529 = vmatpush1.bf16.msra.mxu1 %v5806_v7  ;;  %v5450_v7 = vld [vmem:[%s8451_s8 + $0x20] sm:$0xff]  }
 0x617   : > { %3530 = vmatprep.subr.bf16.mxu1 %v5807_v8  ;;  %v5451_v8 = vld [vmem:[%s8451_s8 + $0x28] sm:$0xff]  }
 0x61a   : > { %3531 = vmatpush1.bf16.msra.mxu1 %v5808_v27  ;;  %v5452_v27 = vld [vmem:[%s8451_s8 + $0x30] sm:$0xff]  }
 0x61b   : > { %3589 = vmatprep.subr.bf16.mxu1 %v5809_v48  ;;  %v5453_v48 = vld [vmem:[%s8451_s8 + $0x38] sm:$0xff]  }
 0x61d   : > { %3533 = vmatmul.mubr.bf16.vlgmr.msra.gmra.mrb[8].mxu1 %v3496_v5  ;;  %v8498_v5 = vpack.c.bf16 %v8496_v52, %v8497_v36 }
 0x61e   : > { %3542 = vmatprep.mubr.bf16.mxu1 %v3499_v6  ;;  %3590 = vmatpush1.bf16.msra.mxu1 %v5810_v62  ;;  %v5815_v6 = vld [vmem:[%s8452_s9 + $0x834] ss:$8 sps:$4 sm:$0xff]  }
 0x61f   : > { %3591 = vmatprep.subr.bf16.mxu1 %v5811_v19 }
 0x622   : > { %3592 = vmatpush1.bf16.msra.mxu1 %v5812_v59 }
 0x623   : > { %3593 = vmatprep.subr.bf16.mxu1 %v5813_v4 }
 0x625   : > { %3543 = vmatmul.mubr.bf16.gmra.mrb[12].mxu1 %v3498_v47  ;;  %v5819_v47 = vld [vmem:[%s8452_s9 + $0x854] ss:$8 sps:$4 sm:$0xff]  }
 0x626   : > { %3594 = vmatpush1.bf16.msra.mxu1 %v5814_v31  ;;  %3621 = vmatprep.mubr.bf16.mxu1 %v8498_v5 }
 0x627   : > { %3595 = vmatprep.subr.bf16.mxu1 %v5815_v6 }
 0x62a   : > { %3596 = vmatpush1.bf16.msra.mxu1 %v5816_v58 }
 0x62b   : > { %3597 = vmatprep.subr.bf16.mxu1 %v5817_v42 }
 0x62e   : > { %3598 = vmatpush1.bf16.msra.mxu1 %v5818_v57 }
 0x62f   : > { %3599 = vmatprep.subr.bf16.mxu1 %v5819_v47 }
 0x632   : > { %3600 = vmatpush1.bf16.msra.mxu1 %v5820_v49 }
 0x633   : > { %3601 = vmatprep.subr.bf16.mxu1 %v5821_v29 }
 0x636   : > { %3602 = vmatpush1.bf16.msra.mxu1 %v5822_v1 }
 0x637   : > { %3603 = vmatprep.subr.bf16.mxu1 %v5823_v20 }
 0x63a   : > { %3604 = vmatpush1.bf16.msra.mxu1 %v5824_v37 }
 0x63b   : > { %3605 = vmatprep.subr.bf16.mxu1 %v5825_v3 }
 0x63e   : > { %3606 = vmatpush1.bf16.msra.mxu1 %v5826_v17 }
 0x63f   : > { %3607 = vmatprep.subr.bf16.mxu1 %v5827_v39 }
 0x642   : > { %3608 = vmatpush1.bf16.msra.mxu1 %v5828_v60 }
 0x643   : > { %3609 = vmatprep.subr.bf16.mxu1 %v5829_v40 }
 0x646   : > { %3610 = vmatpush1.bf16.msra.mxu1 %v5830_v2 }
 0x647   : > { %3611 = vmatprep.subr.bf16.mxu1 %v5831_v41 }
 0x64a   : > { %3612 = vmatpush1.bf16.msra.mxu1 %v5832_v18 }
 0x64b   : > { %3613 = vmatprep.subr.bf16.mxu1 %v5833_v53 }
 0x64e   : > { %3614 = vmatpush1.bf16.msra.mxu1 %v5834_v9 }
 0x64f   : > { %3615 = vmatprep.subr.bf16.mxu1 %v5835_v46 }
 0x652   : > { %3616 = vmatpush1.bf16.msra.mxu1 %v5836_v10 }
 0x653   : > { %3617 = vmatprep.subr.bf16.mxu1 %v5837_v43 }
 0x656   : > { %3618 = vmatpush1.bf16.msra.mxu1 %v5838_v44 }
 0x657   : > { %3619 = vmatprep.subr.bf16.mxu1 %v5839_v16 }
 0x65a   : > { %3620 = vmatpush1.bf16.msra.mxu1 %v5840_v32 }
 0x65d   : > { %3622 = vmatmul.mubr.bf16.vlgmr.msra.gmra.mrb[8].mxu1 %v8501_v21 }
 0x65e   : > { %3631 = vmatprep.mubr.bf16.mxu1 %v8504_v23 }
 0x665   : > { %3632 = vmatmul.mubr.bf16.gmra.mrb[12].mxu1 %v8507_v28 }
 0x666   : > { %3916 = vmatprep.mubr.bf16.mxu1 %v8508_v30 }
 0x730   : > { %v3623_v50 = vpop.f32.mrb[8].mxu1 }
 0x731   : > { %v3625_v56 = vpop.f32.mrb[9].mxu1 }
 0x732   : > { %v3627_v61 = vpop.f32.mrb[10].mxu1 }
 0x733   : > { %v3650_v34 = vpack.c.bf16 %v3627_v61, %v3623_v50  ;;  %v3629_v38 = vpop.f32.mrb[11].mxu1 }
 0x734   : > { %v3651_v14 = vpack.c.bf16 %v3629_v38, %v3625_v56 }
 0x736   : > { %3674 = vmatprep.subr.bf16.mxu0 %v3651_v14  ;;  %3884 = vmatprep.subr.bf16.mxu1 %v3651_v14 }
 0x737   : > { %3675 = vmatpush1.bf16.msra.mxu0 %v3650_v34  ;;  %3885 = vmatpush1.bf16.msra.mxu1 %v3650_v34 }
 0x738   : > { %v3633_v15 = vpop.f32.mrb[12].mxu1 }
 0x739   : > { %v3635_v13 = vpop.f32.mrb[13].mxu1 }
 0x73a   : > { %v3637_v33 = vpop.f32.mrb[14].mxu1 }
 0x73b   : > { %v3652_v35 = vpack.c.bf16 %v3637_v33, %v3633_v15  ;;  %v3639_v63 = vpop.f32.mrb[15].mxu1 }
 0x73c   : > { %v3653_v45 = vpack.c.bf16 %v3639_v63, %v3635_v13 }
 0x73e   : > { %3676 = vmatprep.subr.bf16.mxu0 %v3653_v45  ;;  %3886 = vmatprep.subr.bf16.mxu1 %v3653_v45 }
 0x73f   : > { %3677 = vmatpush1.bf16.msra.mxu0 %v3652_v35  ;;  %3887 = vmatpush1.bf16.msra.mxu1 %v3652_v35 }
 0x740   : > { %3787 = vmatprep.subr.bf16.mxu0 %v3651_v14 }
 0x742   : > { %4832 = vmatmul.mubr.msk.bf16.vlgmr.msra.gmra.mrb[4].mxu0 %vm2773_vm2, %v5446_v54  ;;  %4840 = vmatmul.mubr.msk.bf16.vlgmr.msra.gmra.mrb[16].mxu1 %vm2773_vm2, %v5447_v25 }
 0x743   : > { %3788 = vmatpush1.bf16.msra.mxu0 %v3650_v34  ;;  %3716 = vmatprep.mubr.bf16.mxu0 %v8508_v30 }
 0x744   : > { %3789 = vmatprep.subr.bf16.mxu0 %v3653_v45  ;;  %3926 = vmatprep.mubr.bf16.mxu1 %v8508_v30 }
 0x747   : > { %3790 = vmatpush1.bf16.msra.mxu0 %v3652_v35 }
 0x748   : > { %4021 = vmatprep.subr.bf16.mxu0 %v3651_v14 }
 0x74a   : > { %4833 = vmatmul.mubr.msk.bf16.gmra.mrb[8].mxu0 %vm2773_vm2, %v5448_v12  ;;  %4841 = vmatmul.mubr.msk.bf16.gmra.mrb[20].mxu1 %vm2773_vm2, %v5449_v11 }
 0x74b   : > { %3819 = vmatprep.mubr.bf16.mxu0 %v8508_v30 }
 0x752   : > { %4836 = vmatmul.mubr.msk.bf16.vlgmr.msra.gmra.mrb[12].mxu0 %vm2773_vm2, %v5450_v7 }
 0x753   : > { %4022 = vmatpush1.bf16.msra.mxu0 %v3650_v34  ;;  %3829 = vmatprep.mubr.bf16.mxu0 %v8508_v30 }
 0x754   : > { %4023 = vmatprep.subr.bf16.mxu0 %v3653_v45 }
 0x757   : > { %4024 = vmatpush1.bf16.msra.mxu0 %v3652_v35 }
 0x75a   : > { %4837 = vmatmul.mubr.msk.bf16.gmra.mrb[16].mxu0 %vm2773_vm2, %v5451_v8 }
 0x75b   : > { %4053 = vmatprep.mubr.bf16.mxu0 %v8508_v30 }
 0x762   : > { %4844 = vmatmul.mubr.msk.bf16.vlgmr.msra.gmra.mrb[20].mxu0 %vm2773_vm2, %v5452_v27 }
 0x763   : > { %4063 = vmatprep.mubr.bf16.mxu0 %v8508_v30 }
 0x76a   : > { %4845 = vmatmul.mubr.msk.bf16.gmra.mrb[24].mxu0 %vm2773_vm2, %v5453_v48 }
 0x815   : > { %v3708_v62 = vpop.f32.mrb[4].mxu0  ;;  %v3918_v19 = vpop.f32.mrb[16].mxu1 }
 0x816   : > { %v3727_v59 = vsub.f32 0.0, %v3708_v62  ;;  %v3937_v4 = vsub.f32 0.0, %v3918_v19  ;;  %v3710_v31 = vpop.f32.mrb[5].mxu0  ;;  %v3920_v52 = vpop.f32.mrb[17].mxu1 }
 0x817   : > { %v3728_v36 = vsub.f32 0.0, %v3710_v31  ;;  %v3938_v5 = vsub.f32 0.0, %v3920_v52  ;;  %v3712_v6 = vpop.f32.mrb[6].mxu0  ;;  %v3922_v58 = vpop.f32.mrb[18].mxu1 }
 0x818   : > { %v3735_v42 = vmul.f32 1.442695, %v3727_v59  ;;  %v3945_v57 = vmul.f32 1.442695, %v3937_v4  ;;  %v3729_v47 = vsub.f32 0.0, %v3712_v6  ;;  %v3939_v49 = vsub.f32 0.0, %v3922_v58 }
 0x819   : > { %v3737_v29 = vmul.f32 1.442695, %v3728_v36  ;;  %v3947_v1 = vmul.f32 1.442695, %v3938_v5  ;;  %v3714_v20 = vpop.f32.mrb[7].mxu0  ;;  %v3924_v37 = vpop.f32.mrb[19].mxu1 }
 0x81a   : > { %5454 = vpow2.f32 %v3735_v42  ;;  %v3739_v3 = vmul.f32 1.442695, %v3729_v47  ;;  %v3730_v17 = vsub.f32 0.0, %v3714_v20  ;;  %v3949_v39 = vmul.f32 1.442695, %v3939_v49  ;;  %v464_v20 = vld [vmem:[%s8367_s18] sm:$0xff] }
 0x81b   : > { %5456 = vpow2.f32 %v3945_v57  ;;  %v3940_v60 = vsub.f32 0.0, %v3924_v37 }
 0x81c   : > { %5458 = vpow2.f32 %v3737_v29  ;;  %v3741_v40 = vmul.f32 1.442695, %v3730_v17 }
 0x81d   : > { %5460 = vpow2.f32 %v3947_v1  ;;  %v3951_v2 = vmul.f32 1.442695, %v3940_v60  ;;  %v3718_v41 = vpop.f32.mrb[8].mxu0  ;;  %v3928_v18 = vpop.f32.mrb[20].mxu1 }
 0x81e   : > { %5462 = vpow2.f32 %v3739_v3  ;;  %v3731_v53 = vsub.f32 0.0, %v3718_v41  ;;  %v3941_v9 = vsub.f32 0.0, %v3928_v18  ;;  %v3720_v46 = vpop.f32.mrb[9].mxu0  ;;  %v3930_v10 = vpop.f32.mrb[21].mxu1 }
 0x81f   : > { %5464 = vpow2.f32 %v3949_v39  ;;  %v3732_v43 = vsub.f32 0.0, %v3720_v46  ;;  %v3942_v44 = vsub.f32 0.0, %v3930_v10  ;;  %v3722_v16 = vpop.f32.mrb[10].mxu0  ;;  %v3932_v32 = vpop.f32.mrb[22].mxu1 }
 0x820   : > { %5466 = vpow2.f32 %v3741_v40  ;;  %v3743_v55 = vmul.f32 1.442695, %v3731_v53  ;;  %v3953_v24 = vmul.f32 1.442695, %v3941_v9  ;;  %v3733_v21 = vsub.f32 0.0, %v3722_v16  ;;  %v8350_v22 = vpop.f32.mrb[11].mxu0 }
 0x821   : > { %5468 = vpow2.f32 %v3951_v2  ;;  %v3745_v26 = vmul.f32 1.442695, %v3732_v43  ;;  %v3955_v23 = vmul.f32 1.442695, %v3942_v44  ;;  %v8352_v51 = vpop.f32.mrb[23].mxu1  ;;  %v3943_v8 = vsub.f32 0.0, %v3932_v32 }
 0x822   : > { %5470 = vpow2.f32 %v3743_v55  ;;  %v3747_v0 = vmul.f32 1.442695, %v3733_v21  ;;  %v3734_v4 = vsub.f32 0.0, %v8350_v22  ;;  %v3944_v31 = vsub.f32 0.0, %v8352_v51  ;;  %v465_v53 = vld [vmem:[%s8367_s18 + $0x8] sm:$0xff]  ;;  %v466_v55 = vld [vmem:[%s8367_s18 + $0x10] sm:$0xff] }
 0x823   : > { %5472 = vpow2.f32 %v3953_v24  ;;  %v3957_v47 = vmul.f32 1.442695, %v3943_v8 }
 0x824   : > { %v5455_v28 = vpop.eup %5454  ;;  %5474 = vpow2.f32 %v3745_v26  ;;  %v3749_v40 = vmul.f32 1.442695, %v3734_v4  ;;  %v3959_v2 = vmul.f32 1.442695, %v3944_v31 }
 0x825   : > { %v5457_v30 = vpop.eup %5456  ;;  %v3751_v50 = vadd.f32 1.0, %v5455_v28  ;;  %5476 = vpow2.f32 %v3955_v23  ;;  %v3821_v56 = vpop.f32.mrb[12].mxu0 }
 0x826   : > { %v5459_v61 = vpop.eup %5458  ;;  %v3961_v34 = vadd.f32 1.0, %v5457_v30  ;;  %5478 = vpow2.f32 %v3747_v0  ;;  %v3823_v38 = vpop.f32.mrb[13].mxu0  ;;  %v3840_v62 = vmax.f32 %v3821_v56, 0.0  ;;  %v467_v30 = vld [vmem:[%s8367_s18 + $0x18] sm:$0xff] }
 0x827   : > { %v5461_v14 = vpop.eup %5460  ;;  %5480 = vrcp.f32 %v3751_v50  ;;  %v3752_v15 = vadd.f32 1.0, %v5459_v61  ;;  %v8354_v13 = vpop.f32.mrb[14].mxu0  ;;  %v3841_v6 = vmax.f32 %v3823_v38, 0.0 }
 0x828   : > { %v5463_v33 = vpop.eup %5462  ;;  %5482 = vrcp.f32 %v3961_v34  ;;  %v3962_v35 = vadd.f32 1.0, %v5461_v14  ;;  %v8356_v63 = vpop.f32.mrb[15].mxu0  ;;  %v3848_v37 = vmin.f32 %v3840_v62, 6.0  ;;  %v3842_v3 = vmax.f32 %v8354_v13, 0.0 }
 0x829   : > { %v5465_v45 = vpop.eup %5464  ;;  %5484 = vrcp.f32 %v3752_v15  ;;  %v3753_v54 = vadd.f32 1.0, %v5463_v33  ;;  %v3849_v9 = vmin.f32 %v3841_v6, 6.0  ;;  %v3843_v46 = vmax.f32 %v8356_v63, 0.0 }
 0x82a   : > { %v5467_v25 = vpop.eup %5466  ;;  %5486 = vrcp.f32 %v3962_v35  ;;  %v3963_v12 = vadd.f32 1.0, %v5465_v45  ;;  %v3850_v24 = vmin.f32 %v3842_v3, 6.0  ;;  %v468_v45 = vld [vmem:[%s8367_s18 + $0x20] sm:$0xff] }
 0x82b   : > { %v5469_v11 = vpop.eup %5468  ;;  %5488 = vrcp.f32 %v3753_v54  ;;  %v3754_v7 = vadd.f32 1.0, %v5467_v25  ;;  %v3851_v50 = vmin.f32 %v3843_v46, 6.0 }
 0x82c   : > { %v5471_v27 = vpop.eup %5470  ;;  %5490 = vrcp.f32 %v3963_v12  ;;  %v3964_v48 = vadd.f32 1.0, %v5469_v11 }
 0x82d   : > { %v5473_v19 = vpop.eup %5472  ;;  %5492 = vrcp.f32 %v3754_v7  ;;  %v3755_v59 = vadd.f32 1.0, %v5471_v27  ;;  %v3831_v52 = vpop.f32.mrb[16].mxu0 }
 0x82e   : > { %v5475_v36 = vpop.eup %5474  ;;  %5494 = vrcp.f32 %v3964_v48  ;;  %v3965_v5 = vadd.f32 1.0, %v5473_v19  ;;  %v8369_v58 = vpop.f32.mrb[17].mxu0  ;;  %v3844_v44 = vmax.f32 %v3831_v52, 0.0 }
 0x82f   : > { %v5477_v42 = vpop.eup %5476  ;;  %5496 = vrcp.f32 %v3755_v59  ;;  %v3756_v57 = vadd.f32 1.0, %v5475_v36  ;;  %v8371_v49 = vpop.f32.mrb[18].mxu0  ;;  %v3845_v23 = vmax.f32 %v8369_v58, 0.0  ;;  %v469_v59 = vld [vmem:[%s8367_s18 + $0x28] sm:$0xff] }
 0x830   : > { %v5479_v29 = vpop.eup %5478  ;;  %5498 = vrcp.f32 %v3965_v5  ;;  %v3966_v1 = vadd.f32 1.0, %v5477_v42  ;;  %v8375_v17 = vpop.f32.mrb[19].mxu0  ;;  %v3852_v15 = vmin.f32 %v3844_v44, 6.0  ;;  %v3846_v54 = vmax.f32 %v8371_v49, 0.0 }
 0x831   : > { %v5481_v39 = vpop.eup %5480  ;;  %5500 = vrcp.f32 %v3756_v57  ;;  %v3757_v60 = vadd.f32 1.0, %v5479_v29  ;;  %v3853_v48 = vmin.f32 %v3845_v23, 6.0 }
 0x832   : > { %v5483_v41 = vpop.eup %5482  ;;  %5502 = vrcp.f32 %v3966_v1  ;;  %v3856_v18 = vmul.f32 %v5481_v39, %v3848_v37  ;;  %v3854_v42 = vmin.f32 %v3846_v54, 6.0 }
 0x833   : > { %v5485_v10 = vpop.eup %5484  ;;  %5504 = vrcp.f32 %v3757_v60  ;;  %v3977_v43 = vmul.f32 %v5483_v41, %v464_v20 }
 0x834   : > { %v5487_v16 = vpop.eup %5486  ;;  %5506 = vpow2.f32 %v3957_v47  ;;  %v3857_v32 = vmul.f32 %v5485_v10, %v3849_v9 }
 0x835   : > { %v5489_v21 = vpop.eup %5488  ;;  %5508 = vpow2.f32 %v3749_v40  ;;  %v8386_v22 = vadd.f32 %v3977_v43, %v3856_v18  ;;  %v3978_v26 = vmul.f32 %v5487_v16, %v465_v53  ;;  %v4055_v51 = vpop.f32.mrb[20].mxu0 }
 0x836   : > { %v5491_v0 = vpop.eup %5490  ;;  %5510 = vpow2.f32 %v3959_v2  ;;  %v3858_v28 = vmul.f32 %v5489_v21, %v3850_v24  ;;  %v4074_v56 = vsub.f32 0.0, %v4055_v51  ;;  %v4057_v61 = vpop.f32.mrb[21].mxu0 }
 0x837   : > { %v5493_v34 = vpop.eup %5492  ;;  %3993 = vst [vmem:[%s8383_s12] sm:$0xff] %v8386_v22  ;;  %v8392_v38 = vadd.f32 %v3978_v26, %v3857_v32  ;;  %v3979_v14 = vmul.f32 %v5491_v0, %v466_v55  ;;  %v4075_v13 = vsub.f32 0.0, %v4057_v61  ;;  %v4059_v33 = vpop.f32.mrb[22].mxu0  ;;  %v3847_v0 = vmax.f32 %v8375_v17, 0.0 }
 0x838   : > { %v5495_v35 = vpop.eup %5494  ;;  %v3859_v63 = vmul.f32 %v5493_v34, %v3851_v50  ;;  %v4082_v25 = vmul.f32 1.442695, %v4074_v56  ;;  %v4076_v12 = vsub.f32 0.0, %v4059_v33  ;;  %v4061_v11 = vpop.f32.mrb[23].mxu0  ;;  %v470_v50 = vld [vmem:[%s8367_s18 + $0x30] sm:$0xff] }
 0x839   : > { %v5497_v7 = vpop.eup %5496  ;;  %3994 = vst [vmem:[%s8383_s12 + $0x8] sm:$0xff] %v8392_v38  ;;  %v8398_v8 = vadd.f32 %v3979_v14, %v3858_v28  ;;  %v3980_v27 = vmul.f32 %v5495_v35, %v467_v30  ;;  %v4084_v4 = vmul.f32 1.442695, %v4075_v13  ;;  %v4077_v57 = vsub.f32 0.0, %v4061_v11  ;;  %v471_v14 = vld [vmem:[%s8367_s18 + $0x38] sm:$0xff] }
 0x83a   : > { %v5499_v62 = vpop.eup %5498  ;;  %v3860_v19 = vmul.f32 %v5497_v7, %v3852_v15  ;;  %5512 = vpow2.f32 %v4082_v25  ;;  %v4086_v31 = vmul.f32 1.442695, %v4076_v12  ;;  %v3855_v15 = vmin.f32 %v3847_v0, 6.0 }
 0x83b   : > { %v5501_v52 = vpop.eup %5500  ;;  %3995 = vst [vmem:[%s8383_s12 + $0x10] sm:$0xff] %v8398_v8  ;;  %v8403_v36 = vadd.f32 %v3980_v27, %v3859_v63  ;;  %v3981_v5 = vmul.f32 %v5499_v62, %v468_v45  ;;  %5514 = vpow2.f32 %v4084_v4  ;;  %v4088_v3 = vmul.f32 1.442695, %v4077_v57 }
 0x83c   : > { %v5503_v6 = vpop.eup %5502  ;;  %v3861_v58 = vmul.f32 %v5501_v52, %v3853_v48  ;;  %5516 = vpow2.f32 %v4086_v31  ;;  %v4114_v35 = vmax.f32 %v8386_v22, 0.0  ;;  %v4115_v25 = vmax.f32 %v8392_v38, 0.0 }
 0x83d   : > { %v5505_v47 = vpop.eup %5504  ;;  %3996 = vst [vmem:[%s8383_s12 + $0x18] sm:$0xff] %v8403_v36  ;;  %v8407_v49 = vadd.f32 %v3981_v5, %v3860_v19  ;;  %v3982_v29 = vmul.f32 %v5503_v6, %v469_v59  ;;  %v4065_v1 = vpop.f32.mrb[24].mxu0  ;;  %5518 = vpow2.f32 %v4088_v3  ;;  %v4116_v19 = vmax.f32 %v8398_v8, 0.0 }
 0x83e   : > { %v5507_v20 = vpop.eup %5506  ;;  %v3862_v37 = vmul.f32 %v5505_v47, %v3854_v42  ;;  %v4078_v39 = vsub.f32 0.0, %v4065_v1  ;;  %v4067_v60 = vpop.f32.mrb[25].mxu0  ;;  %v4122_v62 = vmin.f32 %v4114_v35, 6.0  ;;  %v4123_v52 = vmin.f32 %v4115_v25, 6.0 }
 0x83f   : > { %v5509_v40 = vpop.eup %5508  ;;  %v3967_v2 = vadd.f32 1.0, %v5507_v20  ;;  %3997 = vst [vmem:[%s8383_s12 + $0x20] sm:$0xff] %v8407_v49  ;;  %v8411_v41 = vadd.f32 %v3982_v29, %v3861_v58  ;;  %v4069_v18 = vpop.f32.mrb[26].mxu0  ;;  %v4079_v10 = vsub.f32 0.0, %v4067_v60  ;;  %v4117_v5 = vmax.f32 %v8403_v36, 0.0 }
 0x840   : > { %v5511_v53 = vpop.eup %5510  ;;  %v3758_v9 = vadd.f32 1.0, %v5509_v40  ;;  %v4090_v46 = vmul.f32 1.442695, %v4078_v39  ;;  %v4071_v43 = vpop.f32.mrb[27].mxu0  ;;  %v4080_v32 = vsub.f32 0.0, %v4069_v18  ;;  %v4124_v42 = vmin.f32 %v4116_v19, 6.0 }
 0x841   : > { %5520 = vrcp.f32 %v3967_v2  ;;  %v3968_v44 = vadd.f32 1.0, %v5511_v53  ;;  %3998 = vst [vmem:[%s8383_s12 + $0x28] sm:$0xff] %v8411_v41  ;;  %v4092_v16 = vmul.f32 1.442695, %v4079_v10  ;;  %v4081_v55 = vsub.f32 0.0, %v4071_v43 }
 0x842   : > { %5522 = vrcp.f32 %v3758_v9  ;;  %v4094_v21 = vmul.f32 1.442695, %v4080_v32  ;;  %v4125_v29 = vmin.f32 %v4117_v5, 6.0  ;;  %v4118_v1 = vmax.f32 %v8407_v49, 0.0 }
 0x843   : > { %5524 = vrcp.f32 %v3968_v44  ;;  %v4096_v26 = vmul.f32 1.442695, %v4081_v55  ;;  %v4119_v36 = vmax.f32 %v8411_v41, 0.0 }
 0x844   : > { %v5513_v24 = vpop.eup %5512  ;;  %5526 = vpow2.f32 %v4090_v46  ;;  %v4126_v60 = vmin.f32 %v4118_v1, 6.0 }
 0x845   : > { %v4098_v23 = vadd.f32 1.0, %v5513_v24  ;;  %5528 = vpow2.f32 %v4092_v16  ;;  %v5515_v51 = vpop.eup %5514  ;;  %v4127_v18 = vmin.f32 %v4119_v36, 6.0 }
 0x846   : > { %5530 = vpow2.f32 %v4094_v21  ;;  %v4099_v28 = vadd.f32 1.0, %v5515_v51  ;;  %v5517_v30 = vpop.eup %5516 }
 0x847   : > { %5532 = vrcp.f32 %v4098_v23  ;;  %v4100_v56 = vadd.f32 1.0, %v5517_v30  ;;  %v5519_v61 = vpop.eup %5518 }
 0x848   : > { %5534 = vpow2.f32 %v4096_v26  ;;  %v4101_v13 = vadd.f32 1.0, %v5519_v61 }
 0x849   : > { %5536 = vrcp.f32 %v4099_v28 }
 0x84a   : > { %5538 = vrcp.f32 %v4100_v56 }
 0x84b   : > { %v5521_v34 = vpop.eup %5520  ;;  %5540 = vrcp.f32 %v4101_v13 }
 0x84c   : > { %v5523_v33 = vpop.eup %5522  ;;  %v3983_v63 = vmul.f32 %v5521_v34, %v470_v50 }
 0x84d   : > { %v5525_v45 = vpop.eup %5524  ;;  %v3863_v17 = vmul.f32 %v5523_v33, %v3855_v15 }
 0x84e   : > { %v5527_v54 = vpop.eup %5526  ;;  %v3991_v12 = vadd.f32 %v3983_v63, %v3862_v37  ;;  %v3984_v11 = vmul.f32 %v5525_v45, %v471_v14 }
 0x84f   : > { %v5529_v7 = vpop.eup %5528  ;;  %v4102_v27 = vadd.f32 1.0, %v5527_v54 }
 0x850   : > { %v5531_v48 = vpop.eup %5530  ;;  %3999 = vst [vmem:[%s8383_s12 + $0x30] sm:$0xff] %v3991_v12  ;;  %v3992_v59 = vadd.f32 %v3984_v11, %v3863_v17  ;;  %v4103_v22 = vadd.f32 1.0, %v5529_v7  ;;  %v4120_v3 = vmax.f32 %v3991_v12, 0.0 }
 0x851   : > { %v5533_v4 = vpop.eup %5532  ;;  %5542 = vrcp.f32 %v4102_v27  ;;  %v4104_v38 = vadd.f32 1.0, %v5531_v48 }
 0x852   : > { %v5535_v31 = vpop.eup %5534  ;;  %4000 = vst [vmem:[%s8383_s12 + $0x38] sm:$0xff] %v3992_v59  ;;  %v4130_v6 = vmul.f32 %v5533_v4, %v4122_v62  ;;  %5544 = vrcp.f32 %v4103_v22  ;;  %v4121_v40 = vmax.f32 %v3992_v59, 0.0  ;;  %v4128_v9 = vmin.f32 %v4120_v3, 6.0 }
 0x853   : > { %v5537_v8 = vpop.eup %5536  ;;  %5546 = vrcp.f32 %v4104_v38  ;;  %v4105_v58 = vadd.f32 1.0, %v5535_v31 }
 0x854   : > { %4138 = vst [vmem:[%s8426_s15] sm:$0xff] %v4130_v6  ;;  %v4131_v57 = vmul.f32 %v5537_v8, %v4123_v52  ;;  %v5539_v47 = vpop.eup %5538  ;;  %v4129_v43 = vmin.f32 %v4121_v40, 6.0 }
 0x855   : > { %5548 = vrcp.f32 %v4105_v58  ;;  %v4132_v20 = vmul.f32 %v5539_v47, %v4124_v42  ;;  %v5541_v37 = vpop.eup %5540 }
 0x856   : > { %4139 = vst [vmem:[%s8426_s15 + $0x8] sm:$0xff] %v4131_v57  ;;  %v4133_v39 = vmul.f32 %v5541_v37, %v4125_v29 }
 0x857   : > { %4140 = vst [vmem:[%s8426_s15 + $0x10] sm:$0xff] %v4132_v20 }
 0x858   : > { %4141 = vst [vmem:[%s8426_s15 + $0x18] sm:$0xff] %v4133_v39 }
 0x85b   : > { %v5543_v2 = vpop.eup %5542 }
 0x85c   : > { %v5545_v53 = vpop.eup %5544  ;;  %v4134_v49 = vmul.f32 %v5543_v2, %v4126_v60 }
 0x85d   : > { %v5547_v46 = vpop.eup %5546  ;;  %v4135_v10 = vmul.f32 %v5545_v53, %v4127_v18 }
 0x85e   : > { %4142 = vst [vmem:[%s8426_s15 + $0x20] sm:$0xff] %v4134_v49  ;;  %v4136_v44 = vmul.f32 %v5547_v46, %v4128_v9 }
 0x85f   : > { %v5549_v41 = vpop.eup %5548  ;;  %4143 = vst [vmem:[%s8426_s15 + $0x28] sm:$0xff] %v4135_v10 }
 0x860   : > { %4144 = vst [vmem:[%s8426_s15 + $0x30] sm:$0xff] %v4136_v44  ;;  %v4137_v16 = vmul.f32 %v5549_v41, %v4129_v43 }
 0x862   : > { %4145 = vst [vmem:[%s8426_s15 + $0x38] sm:$0xff] %v4137_v16 }
 0x863 PF: > { %s22_s17 = sadd.s32 1, %s5847_s17  }
 0x864   : > { %p19_p4 = scmp.ge.s32.totalorder %s22_s17, 4  }
 0x866   :  { %21 = sbr.rel (!%p19_p4) target bundleno = 1 (0x1), region = 116 }

</bundles_post_ra>
